<compile_context>
chip_gen: v5e
topology: v5e:2x2
jax: 0.10.0
libtpu: 0.0.40
codegen_flags: <defaults>
</compile_context>

<pallas_src>
import jax
import jax.numpy as jnp
from jax import lax
from jax.experimental import pallas as pl
from jax.experimental.pallas import tpu as pltpu

NEG_SLOPE = 0.2


def _leaky(x):
    return jnp.where(x >= 0, x, NEG_SLOPE * x)


def _mxu(a, b):
    """MXU matmul; both operands cast to the narrower dtype, f32 accumulate."""
    dt = a.dtype if jnp.dtype(a.dtype).itemsize <= jnp.dtype(b.dtype).itemsize \
        else b.dtype
    return jnp.dot(a.astype(dt), b.astype(dt),
                   preferred_element_type=jnp.float32)


def _round_up(n, m):
    return ((n + m - 1) // m) * m


def _pad(a, shape, dtype=None):
    dtype = a.dtype if dtype is None else dtype
    out = jnp.zeros(shape, dtype)
    return out.at[tuple(slice(0, s) for s in a.shape)].set(a.astype(dtype))


# ----------------------------- Pallas kernels ------------------------------

def _fused_kernel(x_ref, src0_ref, adj_ref,
                  w1_ref, b1_ref, w2_ref, b2_ref,
                  wm_ref, bm_ref, wu_ref, bu_ref,
                  wdx_ref, wdh_ref, bd_ref, wg_ref, bg_ref,
                  seg_dag_ref, seg_obs_ref,
                  hn_ref, hd_ref, hg_ref):
    """Entire EncoderNetwork forward in one invocation (no grid)."""
    x = x_ref[...]

    # mlp_prep
    hi = _leaky(_mxu(x, w1_ref[...]) + b1_ref[...])
    hi = _leaky(_mxu(hi, w2_ref[...]) + b2_ref[...])

    # h-independent DagEncoder term hoisted off the serial tail.
    dag_x = _mxu(x, wdx_ref[...]) + bd_ref[...]

    wu = wu_ref[...]
    bu = bu_ref[...]
    wm = wm_ref[...]
    bm = bm_ref[...]

    # Leaf-node init: nodes that are never destinations get mlp_update(h_init).
    # src0 already zeroes padded node rows.
    h = src0_ref[...] * _leaky(_mxu(hi, wu) + bu)

    num_levels = adj_ref.shape[0]

    def level_body(l, h):
        adj = adj_ref[l]                                           # [Np, Np]
        # src mask folded away: adjacency columns of non-source nodes are 0.
        msg = _leaky(_mxu(h, wm) + bm)
        agg = _mxu(adj, msg)
        upd = _leaky(_mxu(agg, wu) + bu)
        # dst mask from adjacency row sums (XLU lane reduce, free slot).
        dst = jnp.sum(adj.astype(jnp.float32), axis=-1, keepdims=True) > 0.0
        return jnp.where(dst, hi + upd, h)

    h = lax.fori_loop(0, num_levels, level_body, h, unroll=True)
    hn_ref[...] = h

    # DagEncoder: Linear(cat([x, h])) split into two matmuls; segment_csr as a
    # small segment matrix on the MXU.
    hd_pre = _leaky(dag_x + _mxu(h, wdh_ref[...]))
    hd = _mxu(seg_dag_ref[...], hd_pre)
    hd_ref[...] = hd

    # GlobalEncoder: per-dag mlp then segment-sum (or full sum).
    hg_pre = _leaky(_mxu(hd, wg_ref[...]) + bg_ref[...])
    hg_ref[...] = _mxu(seg_obs_ref[...], hg_pre)


def _no_mp_kernel(x_ref, w1_ref, b1_ref, w2_ref, b2_ref,
                  wdx_ref, wdh_ref, bd_ref, wg_ref, bg_ref,
                  seg_dag_ref, seg_obs_ref,
                  hn_ref, hd_ref, hg_ref):
    """edge_masks empty: h_node = mlp_prep(x); dag/global epilogue unchanged."""
    x = x_ref[...]
    hi = _leaky(_mxu(x, w1_ref[...]) + b1_ref[...])
    hi = _leaky(_mxu(hi, w2_ref[...]) + b2_ref[...])
    hn_ref[...] = hi
    hd_pre = _leaky(_mxu(x, wdx_ref[...]) + _mxu(hi, wdh_ref[...])
                    + bd_ref[...])
    hd = _mxu(seg_dag_ref[...], hd_pre)
    hd_ref[...] = hd
    hg_pre = _leaky(_mxu(hd, wg_ref[...]) + bg_ref[...])
    hg_ref[...] = _mxu(seg_obs_ref[...], hg_pre)


# --------------------- graph preprocessing (cacheable) ----------------------

def build_graph_constants(edge_index, edge_masks, ptr, num_nodes,
                          obs_ptr=None, reverse_flow=True,
                          compute_dtype=jnp.float32):
    """Topology-only constants.  Cache this across forward calls whenever
    edge_index / edge_masks / ptr / obs_ptr are static."""
    f32 = jnp.float32
    N = num_nodes
    G = len(ptr) - 1
    O = 1 if obs_ptr is None else len(obs_ptr) - 1
    L = int(edge_masks.shape[0])

    # Lane-dense padding: node and dag axes appear as lane (last) dims of
    # adj / seg_dag / seg_obs, so pad them to 128.
    Np = _round_up(max(N, 1), 128)
    Gp = _round_up(max(G, 1), 128)
    Op = _round_up(max(O, 1), 8)

    # segment matrices (segment_csr expressed as matmuls)
    ptr_a = jnp.asarray(ptr, jnp.int32)
    nidx = jnp.arange(Np, dtype=jnp.int32)
    seg_dag = ((nidx[None, :] >= ptr_a[:-1, None])
               & (nidx[None, :] < ptr_a[1:, None])).astype(f32)
    seg_dag = _pad(seg_dag, (Gp, Np), compute_dtype)
    if obs_ptr is None:
        seg_obs = jnp.ones((1, G), f32)
    else:
        optr = jnp.asarray(obs_ptr, jnp.int32)
        gidx = jnp.arange(G, dtype=jnp.int32)
        seg_obs = ((gidx[None, :] >= optr[:-1, None])
                   & (gidx[None, :] < optr[1:, None])).astype(f32)
    seg_obs = _pad(seg_obs, (Op, Gp), compute_dtype)

    consts = dict(N=N, G=G, O=O, L=L, Np=Np, Gp=Gp, Op=Op,
                  seg_dag=seg_dag, seg_obs=seg_obs)

    if L > 0:
        j, i = (1, 0) if reverse_flow else (0, 1)
        # Stack adjacency for ALL levels once, already in processing order.
        order = list(range(L - 1, -1, -1)) if reverse_flow else list(range(L))
        em_ord = edge_masks[jnp.asarray(order)].astype(f32)          # [L, E]
        e0, e1 = edge_index[0], edge_index[1]
        # Duplicate edges accumulate -- matches the reference adjacency.
        adj = jnp.zeros((L, Np, Np), f32).at[:, e0, e1].add(em_ord)
        if not reverse_flow:
            adj = jnp.swapaxes(adj, 1, 2)
        consts["adj_stack"] = adj.astype(compute_dtype)
        # Leaf mask (full edge set), zeroed on padded node rows so h never
        # carries garbage beyond row N.
        valid = (jnp.arange(Np) < N).astype(f32)
        dst_full = jnp.zeros((Np,), f32).at[edge_index[i]].set(1.0)
        consts["src0"] = ((1.0 - dst_full) * valid)[:, None]         # [Np, 1]
    return consts


# ------------------------------- forward pass -------------------------------

def encoder_forward(x, edge_index, edge_masks, ptr, params,
                    obs_ptr=None, reverse_flow=True,
                    compute_dtype=jnp.float32, graph_consts=None):
    """Pallas implementation of EncoderNetwork.forward.

    Returns dict(node=[N,D], dag=[G,D], glob=[O,D]).
    compute_dtype=jnp.bfloat16 enables the bf16 matmul-operand path (v6e/v7x);
    activations and blends stay f32."""
    f32 = jnp.float32
    N, F = x.shape
    H = params["w1"].shape[1]
    D = params["w2"].shape[1]

    if graph_consts is None:
        graph_consts = build_graph_constants(
            edge_index, edge_masks, ptr, N, obs_ptr=obs_ptr,
            reverse_flow=reverse_flow, compute_dtype=compute_dtype)
    gc = graph_consts
    G, O, L = gc["G"], gc["O"], gc["L"]
    Np, Gp, Op = gc["Np"], gc["Gp"], gc["Op"]

    Fp, Hp, Dp = _round_up(F, 128), _round_up(H, 128), _round_up(D, 128)
    cdt = compute_dtype

    x_p = _pad(x.astype(f32), (Np, Fp), f32)
    w1 = _pad(params["w1"], (Fp, Hp), cdt); b1 = _pad(params["b1"], (1, Hp), f32)
    w2 = _pad(params["w2"], (Hp, Dp), cdt); b2 = _pad(params["b2"], (1, Dp), f32)
    wm = _pad(params["wm"], (Dp, Dp), cdt); bm = _pad(params["bm"], (1, Dp), f32)
    wu = _pad(params["wu"], (Dp, Dp), cdt); bu = _pad(params["bu"], (1, Dp), f32)
    wdx = _pad(params["wd"][:F], (Fp, Dp), cdt)   # cat([x, h]) -> split weight
    wdh = _pad(params["wd"][F:], (Dp, Dp), cdt)
    bd = _pad(params["bd"], (1, Dp), f32)
    wg = _pad(params["wg"], (Dp, Dp), cdt); bg = _pad(params["bg"], (1, Dp), f32)

    out_shapes = (jax.ShapeDtypeStruct((Np, Dp), f32),
                  jax.ShapeDtypeStruct((Gp, Dp), f32),
                  jax.ShapeDtypeStruct((Op, Dp), f32))
    vmem = pl.BlockSpec(memory_space=pltpu.MemorySpace.VMEM)

    if L == 0:  # _forward_no_mp branch
        args = (x_p, w1, b1, w2, b2, wdx, wdh, bd, wg, bg,
                gc["seg_dag"], gc["seg_obs"])
        hn, hd, hg = pl.pallas_call(
            _no_mp_kernel,
            out_shape=out_shapes,
            in_specs=[vmem] * len(args),
            out_specs=(vmem, vmem, vmem),
        )(*args)
    else:
        args = (x_p, gc["src0"], gc["adj_stack"],
                w1, b1, w2, b2, wm, bm, wu, bu,
                wdx, wdh, bd, wg, bg, gc["seg_dag"], gc["seg_obs"])
        hn, hd, hg = pl.pallas_call(
            _fused_kernel,
            out_shape=out_shapes,
            in_specs=[vmem] * len(args),
            out_specs=(vmem, vmem, vmem),
        )(*args)

    return {"node": hn[:N, :D], "dag": hd[:G, :D], "glob": hg[:O, :D]}


# --------------------------- pure-JAX reference -----------------------------

def _ref_encoder(x, edge_index, edge_masks, ptr, params,
                 obs_ptr=None, reverse_flow=True):
    def lrelu(v):
        return jnp.where(v >= 0, v, NEG_SLOPE * v)

    def prep(v):
        return lrelu(lrelu(v @ params["w1"] + params["b1"])
                     @ params["w2"] + params["b2"])

    def msg_f(v):
        return lrelu(v @ params["wm"] + params["bm"])

    def upd_f(v):
        return lrelu(v @ params["wu"] + params["bu"])

    n = x.shape[0]
    L = edge_masks.shape[0]
    j, i = (1, 0) if reverse_flow else (0, 1)

    if L == 0:
        h = prep(x)
    else:
        h_init = prep(x)
        in_i = jnp.zeros((n,), jnp.float32).at[edge_index[i]].set(1.0)
        h = (1.0 - in_i)[:, None] * upd_f(h_init)
        order = range(L - 1, -1, -1) if reverse_flow else range(L)
        for lvl in order:
            em = edge_masks[lvl].astype(jnp.float32)
            adj = jnp.zeros((n, n), jnp.float32).at[edge_index[0],
                                                    edge_index[1]].add(em)
            if not reverse_flow:
                adj = adj.T
            src = (jnp.zeros((n,), jnp.float32).at[edge_index[j]].add(em) > 0
                   ).astype(jnp.float32)[:, None]
            dst = (jnp.zeros((n,), jnp.float32).at[edge_index[i]].add(em) > 0
                   ).astype(jnp.float32)[:, None]
            msg = src * msg_f(h)
            agg = adj @ msg
            h = dst * (h_init + upd_f(agg)) + (1.0 - dst) * h

    # DagEncoder
    per_node = lrelu(jnp.concatenate([x, h], axis=1) @ params["wd"]
                     + params["bd"])
    G = len(ptr) - 1
    h_dag = jnp.stack([per_node[ptr[g]:ptr[g + 1]].sum(0) for g in range(G)])

    # GlobalEncoder
    hd_m = lrelu(h_dag @ params["wg"] + params["bg"])
    if obs_ptr is None:
        h_glob = hd_m.sum(0, keepdims=True)
    else:
        h_glob = jnp.stack([hd_m[obs_ptr[k]:obs_ptr[k + 1]].sum(0)
                            for k in range(len(obs_ptr) - 1)])
    return h, h_dag, h_glob


# ------------------------------- parameters ---------------------------------

def make_params(key, num_node_features, hidden_dim, embed_dim):
    ks = jax.random.split(key, 8)

    def lin(kw, fan_in, fan_out):
        lim = 1.0 / jnp.sqrt(jnp.float32(fan_in))
        w = jax.random.uniform(kw, (fan_in, fan_out), jnp.float32, -lim, lim)
        b = jax.random.uniform(jax.random.fold_in(kw, 1), (1, fan_out),
                               jnp.float32, -lim, lim)
        return w, b

    w1, b1 = lin(ks[0], num_node_features, hidden_dim)             # mlp_prep 1
    w2, b2 = lin(ks[1], hidden_dim, embed_dim)                     # mlp_prep 2
    wm, bm = lin(ks[2], embed_dim, embed_dim)                      # mlp_msg
    wu, bu = lin(ks[3], embed_dim, embed_dim)                      # mlp_update
    wd, bd = lin(ks[4], num_node_features + embed_dim, embed_dim)  # DagEncoder
    wg, bg = lin(ks[5], embed_dim, embed_dim)                      # GlobalEnc.
    return dict(w1=w1, b1=b1, w2=w2, b2=b2, wm=wm, bm=bm, wu=wu, bu=bu,
                wd=wd, bd=bd, wg=wg, bg=bg)


# ----------------------------------- main ------------------------------------

if __name__ == "__main__":
    key = jax.random.PRNGKey(0)

    NUM_NODE_FEATURES = 8
    HIDDEN_DIM = 32
    EMBED_DIM = 32
    N = 16

    # Three DAGs with contiguous node ranges (PyG-style batching).
    # edge_index[0] = parent, edge_index[1] = child.
    edges = [(0, 1), (0, 2), (6, 7), (6, 8), (11, 12),                # level 0
             (1, 3), (2, 4), (7, 9), (8, 10), (12, 13), (12, 14),     # level 1
             (3, 5), (13, 15)]                                        # level 2
    levels = [0, 0, 0, 0, 0, 1, 1, 1, 1, 1, 1, 2, 2]
    num_levels = 3

    edge_index = jnp.array([[p for p, _ in edges],
                            [c for _, c in edges]], dtype=jnp.int32)
    edge_masks = jnp.array([[lv == l for lv in levels]
                            for l in range(num_levels)], dtype=bool)
    ptr = [0, 6, 11, 16]        # 3 dags: nodes 0-5, 6-10, 11-15
    obs_ptr = [0, 2, 3]         # 2 observations: dags {0,1}, {2}

    kx, kp = jax.random.split(key)
    x = jax.random.normal(kx, (N, NUM_NODE_FEATURES), jnp.float32)
    params = make_params(kp, NUM_NODE_FEATURES, HIDDEN_DIM, EMBED_DIM)

    rn, rd, rg = _ref_encoder(x, edge_index, edge_masks, ptr, params,
                              obs_ptr=obs_ptr, reverse_flow=True)

    # --- full forward (message passing + dag + global with obs_ptr), f32 -----
    # Graph constants built once and passed in (cacheable across calls).
    gcs = build_graph_constants(edge_index, edge_masks, ptr, N,
                                obs_ptr=obs_ptr, reverse_flow=True)
    out = encoder_forward(x, edge_index, edge_masks, ptr, params,
                          obs_ptr=obs_ptr, reverse_flow=True,
                          graph_consts=gcs)
    out = jax.block_until_ready(out)
    assert out["node"].shape == (N, EMBED_DIM)
    assert out["dag"].shape == (3, EMBED_DIM)
    assert out["glob"].shape == (2, EMBED_DIM)
    assert jnp.allclose(out["node"], rn, atol=1e-5, rtol=1e-5), "node mismatch"
    assert jnp.allclose(out["dag"], rd, atol=1e-5, rtol=1e-5), "dag mismatch"
    assert jnp.allclose(out["glob"], rg, atol=1e-5, rtol=1e-5), "glob mismatch"

    # --- _forward_no_mp branch (empty edge_masks) + global sum (no obs_ptr) --
    empty_masks = jnp.zeros((0, edge_index.shape[1]), dtype=bool)
    out2 = encoder_forward(x, edge_index, empty_masks, ptr, params,
                           obs_ptr=None)
    out2 = jax.block_until_ready(out2)
    rn2, rd2, rg2 = _ref_encoder(x, edge_index, empty_masks, ptr, params,
                                 obs_ptr=None)
    assert jnp.allclose(out2["node"], rn2, atol=1e-5, rtol=1e-5)
    assert jnp.allclose(out2["dag"], rd2, atol=1e-5, rtol=1e-5)
    assert jnp.allclose(out2["glob"], rg2, atol=1e-5, rtol=1e-5)

    # --- bf16 matmul-operand path (v6e/v7x), f32 accumulation, loose tol -----
    out3 = encoder_forward(x, edge_index, edge_masks, ptr, params,
                           obs_ptr=obs_ptr, reverse_flow=True,
                           compute_dtype=jnp.bfloat16)
    out3 = jax.block_until_ready(out3)
    assert jnp.max(jnp.abs(out3["node"] - rn)) < 0.1
    assert jnp.max(jnp.abs(out3["dag"] - rd)) < 0.3
    assert jnp.max(jnp.abs(out3["glob"] - rg)) < 0.5

    print("KERNEL_OK")
</pallas_src>

<mosaic_0001>
module attributes {stable_mosaic.version = 11 : i64} {
  func.func @_fused_kernel(%arg0: memref<128x128xf32, #tpu.memory_space<vmem>>, %arg1: memref<128x1xf32, #tpu.memory_space<vmem>>, %arg2: memref<3x128x128xf32, #tpu.memory_space<vmem>>, %arg3: memref<128x128xf32, #tpu.memory_space<vmem>>, %arg4: memref<1x128xf32, #tpu.memory_space<vmem>>, %arg5: memref<128x128xf32, #tpu.memory_space<vmem>>, %arg6: memref<1x128xf32, #tpu.memory_space<vmem>>, %arg7: memref<128x128xf32, #tpu.memory_space<vmem>>, %arg8: memref<1x128xf32, #tpu.memory_space<vmem>>, %arg9: memref<128x128xf32, #tpu.memory_space<vmem>>, %arg10: memref<1x128xf32, #tpu.memory_space<vmem>>, %arg11: memref<128x128xf32, #tpu.memory_space<vmem>>, %arg12: memref<128x128xf32, #tpu.memory_space<vmem>>, %arg13: memref<1x128xf32, #tpu.memory_space<vmem>>, %arg14: memref<128x128xf32, #tpu.memory_space<vmem>>, %arg15: memref<1x128xf32, #tpu.memory_space<vmem>>, %arg16: memref<128x128xf32, #tpu.memory_space<vmem>>, %arg17: memref<8x128xf32, #tpu.memory_space<vmem>>, %arg18: memref<128x128xf32, #tpu.memory_space<vmem>>, %arg19: memref<128x128xf32, #tpu.memory_space<vmem>>, %arg20: memref<8x128xf32, #tpu.memory_space<vmem>>) attributes {dimension_semantics = [], scalar_prefetch = 0 : i64, scratch_operands = 0 : i64, tpu.core_type = #tpu.core_type<tc>} {
    %c0 = arith.constant 0 : index
    %c0_0 = arith.constant 0 : index
    %0 = vector.load %arg0[%c0, %c0_0] : memref<128x128xf32, #tpu.memory_space<vmem>>, vector<128x128xf32>
    %c0_1 = arith.constant 0 : index
    %c0_2 = arith.constant 0 : index
    %1 = vector.load %arg3[%c0_1, %c0_2] : memref<128x128xf32, #tpu.memory_space<vmem>>, vector<128x128xf32>
    %cst = arith.constant dense<0.000000e+00> : vector<128x128xf32>
    %2 = tpu.matmul %0, %1, %cst {dimension_numbers = #tpu.dot_dimension_numbers<[1], [0], [0], [1], [0, 0, 1, 1], [], []>} : vector<128x128xf32>, vector<128x128xf32>, vector<128x128xf32> -> vector<128x128xf32>
    %c0_3 = arith.constant 0 : index
    %c0_4 = arith.constant 0 : index
    %3 = vector.load %arg4[%c0_3, %c0_4] : memref<1x128xf32, #tpu.memory_space<vmem>>, vector<1x128xf32>
    %4 = vector.broadcast %3 : vector<1x128xf32> to vector<128x128xf32>
    %5 = arith.addf %2, %4 : vector<128x128xf32>
    %cst_5 = arith.constant 0.000000e+00 : f32
    %6 = vector.broadcast %cst_5 : f32 to vector<128x128xf32>
    %7 = arith.cmpf oge, %5, %6 : vector<128x128xf32>
    %cst_6 = arith.constant 2.000000e-01 : f32
    %8 = vector.broadcast %cst_6 : f32 to vector<128x128xf32>
    %9 = arith.mulf %8, %5 : vector<128x128xf32>
    %10 = arith.select %7, %5, %9 : vector<128x128xi1>, vector<128x128xf32>
    %c0_7 = arith.constant 0 : index
    %c0_8 = arith.constant 0 : index
    %11 = vector.load %arg5[%c0_7, %c0_8] : memref<128x128xf32, #tpu.memory_space<vmem>>, vector<128x128xf32>
    %cst_9 = arith.constant dense<0.000000e+00> : vector<128x128xf32>
    %12 = tpu.matmul %10, %11, %cst_9 {dimension_numbers = #tpu.dot_dimension_numbers<[1], [0], [0], [1], [0, 0, 1, 1], [], []>} : vector<128x128xf32>, vector<128x128xf32>, vector<128x128xf32> -> vector<128x128xf32>
    %c0_10 = arith.constant 0 : index
    %c0_11 = arith.constant 0 : index
    %13 = vector.load %arg6[%c0_10, %c0_11] : memref<1x128xf32, #tpu.memory_space<vmem>>, vector<1x128xf32>
    %14 = vector.broadcast %13 : vector<1x128xf32> to vector<128x128xf32>
    %15 = arith.addf %12, %14 : vector<128x128xf32>
    %cst_12 = arith.constant 0.000000e+00 : f32
    %16 = vector.broadcast %cst_12 : f32 to vector<128x128xf32>
    %17 = arith.cmpf oge, %15, %16 : vector<128x128xf32>
    %cst_13 = arith.constant 2.000000e-01 : f32
    %18 = vector.broadcast %cst_13 : f32 to vector<128x128xf32>
    %19 = arith.mulf %18, %15 : vector<128x128xf32>
    %20 = arith.select %17, %15, %19 : vector<128x128xi1>, vector<128x128xf32>
    %c0_14 = arith.constant 0 : index
    %c0_15 = arith.constant 0 : index
    %21 = vector.load %arg11[%c0_14, %c0_15] : memref<128x128xf32, #tpu.memory_space<vmem>>, vector<128x128xf32>
    %cst_16 = arith.constant dense<0.000000e+00> : vector<128x128xf32>
    %22 = tpu.matmul %0, %21, %cst_16 {dimension_numbers = #tpu.dot_dimension_numbers<[1], [0], [0], [1], [0, 0, 1, 1], [], []>} : vector<128x128xf32>, vector<128x128xf32>, vector<128x128xf32> -> vector<128x128xf32>
    %c0_17 = arith.constant 0 : index
    %c0_18 = arith.constant 0 : index
    %23 = vector.load %arg13[%c0_17, %c0_18] : memref<1x128xf32, #tpu.memory_space<vmem>>, vector<1x128xf32>
    %24 = vector.broadcast %23 : vector<1x128xf32> to vector<128x128xf32>
    %25 = arith.addf %22, %24 : vector<128x128xf32>
    %c0_19 = arith.constant 0 : index
    %c0_20 = arith.constant 0 : index
    %26 = vector.load %arg9[%c0_19, %c0_20] : memref<128x128xf32, #tpu.memory_space<vmem>>, vector<128x128xf32>
    %c0_21 = arith.constant 0 : index
    %c0_22 = arith.constant 0 : index
    %27 = vector.load %arg10[%c0_21, %c0_22] : memref<1x128xf32, #tpu.memory_space<vmem>>, vector<1x128xf32>
    %c0_23 = arith.constant 0 : index
    %c0_24 = arith.constant 0 : index
    %28 = vector.load %arg7[%c0_23, %c0_24] : memref<128x128xf32, #tpu.memory_space<vmem>>, vector<128x128xf32>
    %c0_25 = arith.constant 0 : index
    %c0_26 = arith.constant 0 : index
    %29 = vector.load %arg8[%c0_25, %c0_26] : memref<1x128xf32, #tpu.memory_space<vmem>>, vector<1x128xf32>
    %c0_27 = arith.constant 0 : index
    %c0_28 = arith.constant 0 : index
    %30 = vector.load %arg1[%c0_27, %c0_28] : memref<128x1xf32, #tpu.memory_space<vmem>>, vector<128x1xf32>
    %cst_29 = arith.constant dense<0.000000e+00> : vector<128x128xf32>
    %31 = tpu.matmul %20, %26, %cst_29 {dimension_numbers = #tpu.dot_dimension_numbers<[1], [0], [0], [1], [0, 0, 1, 1], [], []>} : vector<128x128xf32>, vector<128x128xf32>, vector<128x128xf32> -> vector<128x128xf32>
    %32 = vector.broadcast %27 : vector<1x128xf32> to vector<128x128xf32>
    %33 = arith.addf %31, %32 : vector<128x128xf32>
    %cst_30 = arith.constant 0.000000e+00 : f32
    %34 = vector.broadcast %cst_30 : f32 to vector<128x128xf32>
    %35 = arith.cmpf oge, %33, %34 : vector<128x128xf32>
    %cst_31 = arith.constant 2.000000e-01 : f32
    %36 = vector.broadcast %cst_31 : f32 to vector<128x128xf32>
    %37 = arith.mulf %36, %33 : vector<128x128xf32>
    %38 = arith.select %35, %33, %37 : vector<128x128xi1>, vector<128x128xf32>
    %39 = vector.broadcast %30 : vector<128x1xf32> to vector<128x128xf32>
    %40 = arith.mulf %39, %38 : vector<128x128xf32>
    %c0_i32 = arith.constant 0 : i32
    %41 = arith.index_cast %c0_i32 : i32 to index
    %c0_32 = arith.constant 0 : index
    %c0_33 = arith.constant 0 : index
    %42 = vector.load %arg2[%41, %c0_32, %c0_33] : memref<3x128x128xf32, #tpu.memory_space<vmem>>, vector<1x128x128xf32>
    %43 = vector.shape_cast %42 : vector<1x128x128xf32> to vector<128x128xf32>
    %cst_34 = arith.constant dense<0.000000e+00> : vector<128x128xf32>
    %44 = tpu.matmul %40, %28, %cst_34 {dimension_numbers = #tpu.dot_dimension_numbers<[1], [0], [0], [1], [0, 0, 1, 1], [], []>} : vector<128x128xf32>, vector<128x128xf32>, vector<128x128xf32> -> vector<128x128xf32>
    %45 = vector.broadcast %29 : vector<1x128xf32> to vector<128x128xf32>
    %46 = arith.addf %44, %45 : vector<128x128xf32>
    %cst_35 = arith.constant 0.000000e+00 : f32
    %47 = vector.broadcast %cst_35 : f32 to vector<128x128xf32>
    %48 = arith.cmpf oge, %46, %47 : vector<128x128xf32>
    %cst_36 = arith.constant 2.000000e-01 : f32
    %49 = vector.broadcast %cst_36 : f32 to vector<128x128xf32>
    %50 = arith.mulf %49, %46 : vector<128x128xf32>
    %51 = arith.select %48, %46, %50 : vector<128x128xi1>, vector<128x128xf32>
    %cst_37 = arith.constant dense<0.000000e+00> : vector<128x128xf32>
    %52 = tpu.matmul %43, %51, %cst_37 {dimension_numbers = #tpu.dot_dimension_numbers<[1], [0], [0], [1], [0, 0, 1, 1], [], []>} : vector<128x128xf32>, vector<128x128xf32>, vector<128x128xf32> -> vector<128x128xf32>
    %cst_38 = arith.constant dense<0.000000e+00> : vector<128x128xf32>
    %53 = tpu.matmul %52, %26, %cst_38 {dimension_numbers = #tpu.dot_dimension_numbers<[1], [0], [0], [1], [0, 0, 1, 1], [], []>} : vector<128x128xf32>, vector<128x128xf32>, vector<128x128xf32> -> vector<128x128xf32>
    %54 = vector.broadcast %27 : vector<1x128xf32> to vector<128x128xf32>
    %55 = arith.addf %53, %54 : vector<128x128xf32>
    %cst_39 = arith.constant 0.000000e+00 : f32
    %56 = vector.broadcast %cst_39 : f32 to vector<128x128xf32>
    %57 = arith.cmpf oge, %55, %56 : vector<128x128xf32>
    %cst_40 = arith.constant 2.000000e-01 : f32
    %58 = vector.broadcast %cst_40 : f32 to vector<128x128xf32>
    %59 = arith.mulf %58, %55 : vector<128x128xf32>
    %60 = arith.select %57, %55, %59 : vector<128x128xi1>, vector<128x128xf32>
    %cst_41 = arith.constant dense<0.000000e+00> : vector<128xf32>
    %61 = vector.multi_reduction <add>, %43, %cst_41 [1] : vector<128x128xf32> to vector<128xf32>
    %62 = vector.shape_cast %61 : vector<128xf32> to vector<128x1xf32>
    %cst_42 = arith.constant 0.000000e+00 : f32
    %63 = vector.broadcast %cst_42 : f32 to vector<128x1xf32>
    %64 = arith.cmpf ogt, %62, %63 : vector<128x1xf32>
    %65 = arith.addf %20, %60 : vector<128x128xf32>
    %66 = vector.shape_cast %64 : vector<128x1xi1> to vector<128x1xi1>
    %67 = vector.broadcast %66 : vector<128x1xi1> to vector<128x128xi1>
    %68 = arith.select %67, %65, %40 : vector<128x128xi1>, vector<128x128xf32>
    %c1_i32 = arith.constant 1 : i32
    %69 = arith.index_cast %c1_i32 : i32 to index
    %c0_43 = arith.constant 0 : index
    %c0_44 = arith.constant 0 : index
    %70 = vector.load %arg2[%69, %c0_43, %c0_44] : memref<3x128x128xf32, #tpu.memory_space<vmem>>, vector<1x128x128xf32>
    %71 = vector.shape_cast %70 : vector<1x128x128xf32> to vector<128x128xf32>
    %cst_45 = arith.constant dense<0.000000e+00> : vector<128x128xf32>
    %72 = tpu.matmul %68, %28, %cst_45 {dimension_numbers = #tpu.dot_dimension_numbers<[1], [0], [0], [1], [0, 0, 1, 1], [], []>} : vector<128x128xf32>, vector<128x128xf32>, vector<128x128xf32> -> vector<128x128xf32>
    %73 = vector.broadcast %29 : vector<1x128xf32> to vector<128x128xf32>
    %74 = arith.addf %72, %73 : vector<128x128xf32>
    %cst_46 = arith.constant 0.000000e+00 : f32
    %75 = vector.broadcast %cst_46 : f32 to vector<128x128xf32>
    %76 = arith.cmpf oge, %74, %75 : vector<128x128xf32>
    %cst_47 = arith.constant 2.000000e-01 : f32
    %77 = vector.broadcast %cst_47 : f32 to vector<128x128xf32>
    %78 = arith.mulf %77, %74 : vector<128x128xf32>
    %79 = arith.select %76, %74, %78 : vector<128x128xi1>, vector<128x128xf32>
    %cst_48 = arith.constant dense<0.000000e+00> : vector<128x128xf32>
    %80 = tpu.matmul %71, %79, %cst_48 {dimension_numbers = #tpu.dot_dimension_numbers<[1], [0], [0], [1], [0, 0, 1, 1], [], []>} : vector<128x128xf32>, vector<128x128xf32>, vector<128x128xf32> -> vector<128x128xf32>
    %cst_49 = arith.constant dense<0.000000e+00> : vector<128x128xf32>
    %81 = tpu.matmul %80, %26, %cst_49 {dimension_numbers = #tpu.dot_dimension_numbers<[1], [0], [0], [1], [0, 0, 1, 1], [], []>} : vector<128x128xf32>, vector<128x128xf32>, vector<128x128xf32> -> vector<128x128xf32>
    %82 = vector.broadcast %27 : vector<1x128xf32> to vector<128x128xf32>
    %83 = arith.addf %81, %82 : vector<128x128xf32>
    %cst_50 = arith.constant 0.000000e+00 : f32
    %84 = vector.broadcast %cst_50 : f32 to vector<128x128xf32>
    %85 = arith.cmpf oge, %83, %84 : vector<128x128xf32>
    %cst_51 = arith.constant 2.000000e-01 : f32
    %86 = vector.broadcast %cst_51 : f32 to vector<128x128xf32>
    %87 = arith.mulf %86, %83 : vector<128x128xf32>
    %88 = arith.select %85, %83, %87 : vector<128x128xi1>, vector<128x128xf32>
    %cst_52 = arith.constant dense<0.000000e+00> : vector<128xf32>
    %89 = vector.multi_reduction <add>, %71, %cst_52 [1] : vector<128x128xf32> to vector<128xf32>
    %90 = vector.shape_cast %89 : vector<128xf32> to vector<128x1xf32>
    %cst_53 = arith.constant 0.000000e+00 : f32
    %91 = vector.broadcast %cst_53 : f32 to vector<128x1xf32>
    %92 = arith.cmpf ogt, %90, %91 : vector<128x1xf32>
    %93 = arith.addf %20, %88 : vector<128x128xf32>
    %94 = vector.shape_cast %92 : vector<128x1xi1> to vector<128x1xi1>
    %95 = vector.broadcast %94 : vector<128x1xi1> to vector<128x128xi1>
    %96 = arith.select %95, %93, %68 : vector<128x128xi1>, vector<128x128xf32>
    %c2_i32 = arith.constant 2 : i32
    %97 = arith.index_cast %c2_i32 : i32 to index
    %c0_54 = arith.constant 0 : index
    %c0_55 = arith.constant 0 : index
    %98 = vector.load %arg2[%97, %c0_54, %c0_55] : memref<3x128x128xf32, #tpu.memory_space<vmem>>, vector<1x128x128xf32>
    %99 = vector.shape_cast %98 : vector<1x128x128xf32> to vector<128x128xf32>
    %cst_56 = arith.constant dense<0.000000e+00> : vector<128x128xf32>
    %100 = tpu.matmul %96, %28, %cst_56 {dimension_numbers = #tpu.dot_dimension_numbers<[1], [0], [0], [1], [0, 0, 1, 1], [], []>} : vector<128x128xf32>, vector<128x128xf32>, vector<128x128xf32> -> vector<128x128xf32>
    %101 = vector.broadcast %29 : vector<1x128xf32> to vector<128x128xf32>
    %102 = arith.addf %100, %101 : vector<128x128xf32>
    %cst_57 = arith.constant 0.000000e+00 : f32
    %103 = vector.broadcast %cst_57 : f32 to vector<128x128xf32>
    %104 = arith.cmpf oge, %102, %103 : vector<128x128xf32>
    %cst_58 = arith.constant 2.000000e-01 : f32
    %105 = vector.broadcast %cst_58 : f32 to vector<128x128xf32>
    %106 = arith.mulf %105, %102 : vector<128x128xf32>
    %107 = arith.select %104, %102, %106 : vector<128x128xi1>, vector<128x128xf32>
    %cst_59 = arith.constant dense<0.000000e+00> : vector<128x128xf32>
    %108 = tpu.matmul %99, %107, %cst_59 {dimension_numbers = #tpu.dot_dimension_numbers<[1], [0], [0], [1], [0, 0, 1, 1], [], []>} : vector<128x128xf32>, vector<128x128xf32>, vector<128x128xf32> -> vector<128x128xf32>
    %cst_60 = arith.constant dense<0.000000e+00> : vector<128x128xf32>
    %109 = tpu.matmul %108, %26, %cst_60 {dimension_numbers = #tpu.dot_dimension_numbers<[1], [0], [0], [1], [0, 0, 1, 1], [], []>} : vector<128x128xf32>, vector<128x128xf32>, vector<128x128xf32> -> vector<128x128xf32>
    %110 = vector.broadcast %27 : vector<1x128xf32> to vector<128x128xf32>
    %111 = arith.addf %109, %110 : vector<128x128xf32>
    %cst_61 = arith.constant 0.000000e+00 : f32
    %112 = vector.broadcast %cst_61 : f32 to vector<128x128xf32>
    %113 = arith.cmpf oge, %111, %112 : vector<128x128xf32>
    %cst_62 = arith.constant 2.000000e-01 : f32
    %114 = vector.broadcast %cst_62 : f32 to vector<128x128xf32>
    %115 = arith.mulf %114, %111 : vector<128x128xf32>
    %116 = arith.select %113, %111, %115 : vector<128x128xi1>, vector<128x128xf32>
    %cst_63 = arith.constant dense<0.000000e+00> : vector<128xf32>
    %117 = vector.multi_reduction <add>, %99, %cst_63 [1] : vector<128x128xf32> to vector<128xf32>
    %118 = vector.shape_cast %117 : vector<128xf32> to vector<128x1xf32>
    %cst_64 = arith.constant 0.000000e+00 : f32
    %119 = vector.broadcast %cst_64 : f32 to vector<128x1xf32>
    %120 = arith.cmpf ogt, %118, %119 : vector<128x1xf32>
    %121 = arith.addf %20, %116 : vector<128x128xf32>
    %122 = vector.shape_cast %120 : vector<128x1xi1> to vector<128x1xi1>
    %123 = vector.broadcast %122 : vector<128x1xi1> to vector<128x128xi1>
    %124 = arith.select %123, %121, %96 : vector<128x128xi1>, vector<128x128xf32>
    %c3_i32 = arith.constant 3 : i32
    %c0_65 = arith.constant 0 : index
    %c0_66 = arith.constant 0 : index
    %125 = vector.load %arg18[%c0_65, %c0_66] : memref<128x128xf32, #tpu.memory_space<vmem>>, vector<128x128xf32>
    tpu.vector_store %arg18[%c0_65, %c0_66], %124 {strides = array<i32>} : memref<128x128xf32, #tpu.memory_space<vmem>>, vector<128x128xf32>,
    %c0_67 = arith.constant 0 : index
    %c0_68 = arith.constant 0 : index
    %126 = vector.load %arg12[%c0_67, %c0_68] : memref<128x128xf32, #tpu.memory_space<vmem>>, vector<128x128xf32>
    %cst_69 = arith.constant dense<0.000000e+00> : vector<128x128xf32>
    %127 = tpu.matmul %124, %126, %cst_69 {dimension_numbers = #tpu.dot_dimension_numbers<[1], [0], [0], [1], [0, 0, 1, 1], [], []>} : vector<128x128xf32>, vector<128x128xf32>, vector<128x128xf32> -> vector<128x128xf32>
    %128 = arith.addf %25, %127 : vector<128x128xf32>
    %cst_70 = arith.constant 0.000000e+00 : f32
    %129 = vector.broadcast %cst_70 : f32 to vector<128x128xf32>
    %130 = arith.cmpf oge, %128, %129 : vector<128x128xf32>
    %cst_71 = arith.constant 2.000000e-01 : f32
    %131 = vector.broadcast %cst_71 : f32 to vector<128x128xf32>
    %132 = arith.mulf %131, %128 : vector<128x128xf32>
    %133 = arith.select %130, %128, %132 : vector<128x128xi1>, vector<128x128xf32>
    %c0_72 = arith.constant 0 : index
    %c0_73 = arith.constant 0 : index
    %134 = vector.load %arg16[%c0_72, %c0_73] : memref<128x128xf32, #tpu.memory_space<vmem>>, vector<128x128xf32>
    %cst_74 = arith.constant dense<0.000000e+00> : vector<128x128xf32>
    %135 = tpu.matmul %134, %133, %cst_74 {dimension_numbers = #tpu.dot_dimension_numbers<[1], [0], [0], [1], [0, 0, 1, 1], [], []>} : vector<128x128xf32>, vector<128x128xf32>, vector<128x128xf32> -> vector<128x128xf32>
    %c0_75 = arith.constant 0 : index
    %c0_76 = arith.constant 0 : index
    %136 = vector.load %arg19[%c0_75, %c0_76] : memref<128x128xf32, #tpu.memory_space<vmem>>, vector<128x128xf32>
    tpu.vector_store %arg19[%c0_75, %c0_76], %135 {strides = array<i32>} : memref<128x128xf32, #tpu.memory_space<vmem>>, vector<128x128xf32>,
    %c0_77 = arith.constant 0 : index
    %c0_78 = arith.constant 0 : index
    %137 = vector.load %arg14[%c0_77, %c0_78] : memref<128x128xf32, #tpu.memory_space<vmem>>, vector<128x128xf32>
    %cst_79 = arith.constant dense<0.000000e+00> : vector<128x128xf32>
    %138 = tpu.matmul %135, %137, %cst_79 {dimension_numbers = #tpu.dot_dimension_numbers<[1], [0], [0], [1], [0, 0, 1, 1], [], []>} : vector<128x128xf32>, vector<128x128xf32>, vector<128x128xf32> -> vector<128x128xf32>
    %c0_80 = arith.constant 0 : index
    %c0_81 = arith.constant 0 : index
    %139 = vector.load %arg15[%c0_80, %c0_81] : memref<1x128xf32, #tpu.memory_space<vmem>>, vector<1x128xf32>
    %140 = vector.broadcast %139 : vector<1x128xf32> to vector<128x128xf32>
    %141 = arith.addf %138, %140 : vector<128x128xf32>
    %cst_82 = arith.constant 0.000000e+00 : f32
    %142 = vector.broadcast %cst_82 : f32 to vector<128x128xf32>
    %143 = arith.cmpf oge, %141, %142 : vector<128x128xf32>
    %cst_83 = arith.constant 2.000000e-01 : f32
    %144 = vector.broadcast %cst_83 : f32 to vector<128x128xf32>
    %145 = arith.mulf %144, %141 : vector<128x128xf32>
    %146 = arith.select %143, %141, %145 : vector<128x128xi1>, vector<128x128xf32>
    %c0_84 = arith.constant 0 : index
    %c0_85 = arith.constant 0 : index
    %147 = vector.load %arg17[%c0_84, %c0_85] : memref<8x128xf32, #tpu.memory_space<vmem>>, vector<8x128xf32>
    %cst_86 = arith.constant dense<0.000000e+00> : vector<8x128xf32>
    %148 = tpu.matmul %147, %146, %cst_86 {dimension_numbers = #tpu.dot_dimension_numbers<[1], [0], [0], [1], [0, 0, 1, 1], [], []>} : vector<8x128xf32>, vector<128x128xf32>, vector<8x128xf32> -> vector<8x128xf32>
    %c0_87 = arith.constant 0 : index
    %c0_88 = arith.constant 0 : index
    %149 = vector.load %arg20[%c0_87, %c0_88] : memref<8x128xf32, #tpu.memory_space<vmem>>, vector<8x128xf32>
    tpu.vector_store %arg20[%c0_87, %c0_88], %148 {strides = array<i32>} : memref<8x128xf32, #tpu.memory_space<vmem>>, vector<8x128xf32>,
    return
  }
}

</mosaic_0001>

<bundles_post_ra>
// kernel: tpu_custom_call.1
= control target key start
LH: loop header
LB: loop body
LE: loop exit
PB: predicated region body
PF: predicated region fallthrough
CT: control target
= control target key end

     0   :  { %s4270_s0 = inlined_call_operand.vmem [shape: f32[128,128], index: 0, kind: input, shape index: {}]   ;;  %s4271_s1 = inlined_call_operand.vmem [shape: f32[128,1], index: 1, kind: input, shape index: {}]   ;;  %s4272_s2 = inlined_call_operand.hbm [shape: f32[3,128,128], index: 2, kind: input, shape index: {}]   ;;  %s4273_s3 = inlined_call_operand.hbm [shape: f32[128,128], index: 3, kind: input, shape index: {}]   ;;  %s4274_s4 = inlined_call_operand.hbm [shape: f32[1,128], index: 4, kind: input, shape index: {}]   ;;  %s4275_s5 = inlined_call_operand.hbm [shape: f32[128,128], index: 5, kind: input, shape index: {}]   ;;  %s4276_s6 = inlined_call_operand.hbm [shape: f32[1,128], index: 6, kind: input, shape index: {}]   ;;  %s4277_s7 = inlined_call_operand.hbm [shape: f32[128,128], index: 7, kind: input, shape index: {}]   ;;  %s4278_s8 = inlined_call_operand.hbm [shape: f32[1,128], index: 8, kind: input, shape index: {}]   ;;  %s4279_s9 = inlined_call_operand.hbm [shape: f32[128,128], index: 9, kind: input, shape index: {}]   ;;  %s4280_s10 = inlined_call_operand.vmem [shape: f32[1,128], index: 10, kind: input, shape index: {}]   ;;  %s4281_s11 = inlined_call_operand.hbm [shape: f32[128,128], index: 11, kind: input, shape index: {}]   ;;  %s4282_s12 = inlined_call_operand.hbm [shape: f32[128,128], index: 12, kind: input, shape index: {}]   ;;  %s4283_s13 = inlined_call_operand.vmem [shape: f32[1,128], index: 13, kind: input, shape index: {}]   ;;  %s4284_s14 = inlined_call_operand.hbm [shape: f32[128,128], index: 14, kind: input, shape index: {}]   ;;  %s4285_s15 = inlined_call_operand.vmem [shape: f32[1,128], index: 15, kind: input, shape index: {}]   ;;  %s4286_s16 = inlined_call_operand.hbm [shape: f32[128,128], index: 16, kind: input, shape index: {}]   ;;  %s4287_s17 = inlined_call_operand.vmem [shape: f32[8,128], index: 17, kind: input, shape index: {}]   ;;  %s4288_s18 = inlined_call_operand.hbm [shape: f32[128,128], index: 18, kind: output, shape index: {0}]   ;;  %s4289_s19 = inlined_call_operand.hbm [shape: f32[128,128], index: 19, kind: output, shape index: {1}]   ;;  %s4290_s20 = inlined_call_operand.hbm [shape: f32[8,128], index: 20, kind: output, shape index: {2}]  }
   0x1   :  { %4341 = sst [smem:[#allocation78_spill]] %s4270_s0 }
   0x2   :  { %4342 = sst [smem:[#allocation79_spill]] %s4271_s1 }
   0x3   :  { %4343 = sst [smem:[#allocation80_spill]] %s4272_s2 }
   0x4   :  { %4344 = sst [smem:[#allocation81_spill]] %s4273_s3 }
   0x5   :  { %4345 = sst [smem:[#allocation82_spill]] %s4274_s4 }
   0x6   :  { %26 = vsyncpa [#allocation3], 0 }
   0x7   :  { %27 = vsyncpa [#allocation6], 0 }
   0x8   :  { %28 = vsyncpa [#allocation9], 0 }
   0x9   :  { %29 = vsyncpa [#allocation12], 0 }
   0xa   :  { %30 = vsyncpa [#allocation15], 0 }
   0xb   :  { %31 = vsyncpa [#allocation18], 0 }
   0xc   :  { %32 = vsyncpa [#allocation21], 0 }
   0xd   :  { %33 = vsyncpa [#allocation4], 0 }
   0xe   :  { %34 = vsyncpa [#allocation24], 0  ;;  %s4346_s23 = sld [smem:[#allocation81_spill]]  ;;  %s3047_s2 = smov [#allocation5]  }
   0xf   :  { %s58_s25 = sshll.u32 %s3047_s2, 4  ;;  %s80_s27 = sshll.u32 %s4275_s5, 4  ;;  %s59_s25 = int_to_ptr.vmem [resolvable:$true] %s58_s25  ;;  %s81_s27 = int_to_ptr.hbm [resolvable:$true] %s80_s27 }
  0x10   :  { %s3048_s28 = smov 128   ;;  %s3049_s4 = smov 8  }
  0x11   :  { %s3050_s29 = smov [#allocation8]   ;;  %s104_s1 = sshll.u32 %s4277_s7, 4  ;;  %s105_s1 = int_to_ptr.hbm [resolvable:$true] %s104_s1 }
  0x12   :  { %s82_s30 = sshll.u32 %s3050_s29, 4  ;;  %s3051_s2 = smov [#allocation11]   ;;  %s83_s30 = int_to_ptr.vmem [resolvable:$true] %s82_s30 }
  0x13   :  { %88 = dma.hbm_to_vmem [thread:$0]  %s81_s27, 2048, %s83_s30, [#allocation9], %s3048_s28, %s3048_s28, %s3049_s4  }
  0x14   :  { %s56_s24 = sshll.u32 %s4346_s23, 4  ;;  %s128_s23 = sshll.u32 %s4279_s9, 4  ;;  %s57_s24 = int_to_ptr.hbm [resolvable:$true] %s56_s24  ;;  %s129_s23 = int_to_ptr.hbm [resolvable:$true] %s128_s23 }
  0x15   :  { %64 = dma.hbm_to_vmem [thread:$0]  %s57_s24, 2048, %s59_s25, [#allocation6], %s3048_s28, %s3048_s28, %s3049_s4  }
  0x16   :  { %s106_s3 = sshll.u32 %s3051_s2, 4  ;;  %s3052_s24 = smov [#allocation14]   ;;  %s107_s3 = int_to_ptr.vmem [resolvable:$true] %s106_s3 }
  0x17   :  { %112 = dma.hbm_to_vmem [thread:$0]  %s105_s1, 2048, %s107_s3, [#allocation12], %s3048_s28, %s3048_s28, %s3049_s4  }
  0x18   :  { %s130_s7 = sshll.u32 %s3052_s24, 4  ;;  %s156_s29 = sshll.u32 %s4282_s12, 4  ;;  %s131_s7 = int_to_ptr.vmem [resolvable:$true] %s130_s7  ;;  %s157_s29 = int_to_ptr.hbm [resolvable:$true] %s156_s29 }
  0x19   :  { %136 = dma.hbm_to_vmem [thread:$0]  %s129_s23, 2048, %s131_s7, [#allocation15], %s3048_s28, %s3048_s28, %s3049_s4  }
  0x1a   :  { %s4347_s30 = sld [smem:[#allocation80_spill]]  ;;  %s3053_s21 = smov [#allocation17]  }
  0x1b   :  { %s158_s5 = sshll.u32 %s3053_s21, 4  ;;  %s3054_s1 = smov [#allocation2]   ;;  %s159_s5 = int_to_ptr.vmem [resolvable:$true] %s158_s5 }
  0x1c   :  { %164 = dma.hbm_to_vmem [thread:$0]  %s157_s29, 2048, %s159_s5, [#allocation18], %s3048_s28, %s3048_s28, %s3049_s4  }
  0x1d   :  { %s45_s12 = sshll.u32 %s3054_s1, 4  ;;  %s4348_s3 = sld [smem:[#allocation82_spill]]  ;;  %s46_s12 = int_to_ptr.vmem [resolvable:$true] %s45_s12 }
  0x1e   :  { %s94_s25 = sshll.u32 %s4276_s6, 4  ;;  %s3055_s26 = smov [#allocation7]   ;;  %s95_s25 = int_to_ptr.hbm [resolvable:$true] %s94_s25 }
  0x1f   :  { %s72_s9 = sshll.u32 %s3055_s26, 4  ;;  %s3056_s29 = smov [#allocation10]   ;;  %s73_s9 = int_to_ptr.vmem [resolvable:$true] %s72_s9 }
  0x20   :  { %s43_s0 = sshll.u32 %s4347_s30, 4  ;;  %s96_s27 = sshll.u32 %s3056_s29, 4  ;;  %s44_s0 = int_to_ptr.hbm [resolvable:$true] %s43_s0  ;;  %s97_s27 = int_to_ptr.vmem [resolvable:$true] %s96_s27 }
  0x21   :  { %51 = dma.hbm_to_vmem [thread:$0]  %s44_s0, 6144, %s46_s12, [#allocation3], %s3048_s28, %s3048_s28, %s3049_s4  }
  0x22   :  { %s118_s5 = sshll.u32 %s4278_s8, 4  ;;  %s143_s12 = sshll.u32 %s4281_s11, 4  ;;  %s119_s5 = int_to_ptr.hbm [resolvable:$true] %s118_s5  ;;  %s144_s12 = int_to_ptr.hbm [resolvable:$true] %s143_s12 }
  0x23   :  { %s70_s24 = sshll.u32 %s4348_s3, 4  ;;  %s3057_s22 = smov [#allocation13]   ;;  %s71_s24 = int_to_ptr.hbm [resolvable:$true] %s70_s24 }
  0x24   :  { %75 = dma.hbm_to_vmem [thread:$0]  %s71_s24, 16, %s73_s9, [#allocation6]  }
  0x25   :  { %99 = dma.hbm_to_vmem [thread:$0]  %s95_s25, 16, %s97_s27, [#allocation9]  }
  0x26   :  { %s120_s6 = sshll.u32 %s3057_s22, 4  ;;  %s3058_s2 = smov [#allocation16]   ;;  %s121_s6 = int_to_ptr.vmem [resolvable:$true] %s120_s6 }
  0x27   :  { %123 = dma.hbm_to_vmem [thread:$0]  %s119_s5, 16, %s121_s6, [#allocation12]  }
  0x28   :  { %s145_s3 = sshll.u32 %s3058_s2, 4  ;;  %s171_s7 = sshll.u32 %s4284_s14, 4  ;;  %s146_s3 = int_to_ptr.vmem [resolvable:$true] %s145_s3  ;;  %s172_s7 = int_to_ptr.hbm [resolvable:$true] %s171_s7 }
  0x29   :  { %151 = dma.hbm_to_vmem [thread:$0]  %s144_s12, 2048, %s146_s3, [#allocation15], %s3048_s28, %s3048_s28, %s3049_s4  }
  0x2a   :  { %s186_s11 = sshll.u32 %s4286_s16, 4  ;;  %s3059_s26 = smov [#allocation19]   ;;  %s187_s11 = int_to_ptr.hbm [resolvable:$true] %s186_s11 }
  0x2b   :  { %s173_s9 = sshll.u32 %s3059_s26, 4  ;;  %s3060_s29 = smov [#allocation20]   ;;  %s174_s9 = int_to_ptr.vmem [resolvable:$true] %s173_s9 }
  0x2c   :  { %179 = dma.hbm_to_vmem [thread:$0]  %s172_s7, 2048, %s174_s9, [#allocation18], %s3048_s28, %s3048_s28, %s3049_s4  }
  0x2d   :  { %s188_s14 = sshll.u32 %s3060_s29, 4  ;;  %s189_s14 = int_to_ptr.vmem [resolvable:$true] %s188_s14 }
  0x2e   :  { %194 = dma.hbm_to_vmem [thread:$0]  %s187_s11, 2048, %s189_s14, [#allocation21], %s3048_s28, %s3048_s28, %s3049_s4  }
  0x2f   :  { %3029 = dma.done.wait [#allocation3], 6144  }
  0x30   :  { %3030 = vsyncadd [#allocation3], 4294961152 }
  0x31   :  { %3031 = dma.done.wait [#allocation6], 2064  }
  0x32   :  { %3032 = vsyncadd [#allocation6], 4294965232 }
  0x33   :  { %3033 = dma.done.wait [#allocation9], 2064  }
  0x34   :  { %3034 = vsyncadd [#allocation9], 4294965232 }
  0x35   :  { %3035 = dma.done.wait [#allocation12], 2064  }
  0x36   :  { %3036 = vsyncadd [#allocation12], 4294965232 }
  0x37   :  { %3037 = dma.done.wait [#allocation15], 4096  }
  0x38   :  { %3038 = vsyncadd [#allocation15], 4294963200 }
  0x39   :  { %3039 = dma.done.wait [#allocation18], 4096  }
  0x3a   :  { %3040 = vsyncadd [#allocation18], 4294963200 }
  0x3b   :  { %3041 = dma.done.wait [#allocation21], 2048  }
  0x3c   :  { %3042 = vsyncadd [#allocation21], 4294965248  ;;  %v276_v0 = vld [vmem:[#allocation5 + $0x78] sm:$0xff]  ;;  %v275_v1 = vld [vmem:[#allocation5 + $0x70] sm:$0xff]  ;;  %s4349_s30 = sld [smem:[#allocation78_spill]]  ;;  %s2555_s22 = sshll.u32 %s4288_s18, 4  ;;  %s2556_s22 = int_to_ptr.hbm [resolvable:$true] %s2555_s22 }
  0x3d   :  { %281 = vmatpush.msra.mxu0 %v276_v0  ;;  %v274_v2 = vld [vmem:[#allocation5 + $0x68] sm:$0xff]  ;;  %v273_v3 = vld [vmem:[#allocation5 + $0x60] sm:$0xff]  ;;  %v272_v4 = vld [vmem:[#allocation5 + $0x58] sm:$0xff]  ;;  %s4350_s7 = sld [smem:[#allocation79_spill]]  ;;  %s3063_s6 = smov [#allocation22]  }
  0x3e   :  { %v271_v5 = vld [vmem:[#allocation5 + $0x50] sm:$0xff]  ;;  %v270_v6 = vld [vmem:[#allocation5 + $0x48] sm:$0xff]  ;;  %v269_v7 = vld [vmem:[#allocation5 + $0x40] sm:$0xff]  ;;  %s2582_s23 = sshll.u32 %s4290_s20, 4  ;;  %s2583_s23 = int_to_ptr.hbm [resolvable:$true] %s2582_s23 }
  0x3f   :  { %282 = vmatpush.msra.mxu0 %v275_v1  ;;  %v268_v8 = vld [vmem:[#allocation5 + $0x38] sm:$0xff]  ;;  %v267_v9 = vld [vmem:[#allocation5 + $0x30] sm:$0xff]  ;;  %v266_v10 = vld [vmem:[#allocation5 + $0x28] sm:$0xff] }
  0x40   :  { %v265_v11 = vld [vmem:[#allocation5 + $0x20] sm:$0xff]  ;;  %v264_v12 = vld [vmem:[#allocation5 + $0x18] sm:$0xff]  ;;  %v263_v13 = vld [vmem:[#allocation5 + $0x10] sm:$0xff] }
  0x41   :  { %283 = vmatpush.msra.mxu0 %v274_v2  ;;  %v262_v14 = vld [vmem:[#allocation5 + $0x8] sm:$0xff]  ;;  %v261_v15 = vld [vmem:[#allocation5] sm:$0xff]  ;;  %v408_v26 = vld [vmem:[#allocation8 + $0x70] sm:$0xff] }
  0x42   :  { %v245_v16 = vld [vmem:[%s4349_s30] sm:$0xff]  ;;  %v246_v17 = vld [vmem:[%s4349_s30 + $0x8] sm:$0xff]  ;;  %v247_v18 = vld [vmem:[%s4349_s30 + $0x10] sm:$0xff] }
  0x43   :  { %284 = vmatpush.msra.mxu0 %v273_v3  ;;  %v248_v19 = vld [vmem:[%s4349_s30 + $0x18] sm:$0xff]  ;;  %v249_v20 = vld [vmem:[%s4349_s30 + $0x20] sm:$0xff]  ;;  %v250_v21 = vld [vmem:[%s4349_s30 + $0x28] sm:$0xff] }
  0x44   :  { %v251_v22 = vld [vmem:[%s4349_s30 + $0x30] sm:$0xff]  ;;  %v252_v23 = vld [vmem:[%s4349_s30 + $0x38] sm:$0xff]  ;;  %v253_v24 = vld [vmem:[%s4349_s30 + $0x40] sm:$0xff] }
  0x45   :  { %285 = vmatpush.msra.mxu0 %v272_v4  ;;  %v409_v25 = vld [vmem:[#allocation8 + $0x78] sm:$0xff]  ;;  %v254_v27 = vld [vmem:[%s4349_s30 + $0x48] sm:$0xff]  ;;  %v404_v31 = vld [vmem:[#allocation8 + $0x50] sm:$0xff] }
  0x46   :  { %414 = vmatpush.msra.mxu1 %v409_v25  ;;  %v407_v28 = vld [vmem:[#allocation8 + $0x68] sm:$0xff]  ;;  %v406_v29 = vld [vmem:[#allocation8 + $0x60] sm:$0xff]  ;;  %v405_v30 = vld [vmem:[#allocation8 + $0x58] sm:$0xff] }
  0x47   :  { %286 = vmatpush.msra.mxu0 %v271_v5  ;;  %v255_v32 = vld [vmem:[%s4349_s30 + $0x50] sm:$0xff]  ;;  %v402_v34 = vld [vmem:[#allocation8 + $0x40] sm:$0xff]  ;;  %v401_v35 = vld [vmem:[#allocation8 + $0x38] sm:$0xff] }
  0x48   :  { %415 = vmatpush.msra.mxu1 %v408_v26  ;;  %v403_v33 = vld [vmem:[#allocation8 + $0x48] sm:$0xff]  ;;  %v400_v36 = vld [vmem:[#allocation8 + $0x30] sm:$0xff]  ;;  %v398_v39 = vld [vmem:[#allocation8 + $0x20] sm:$0xff] }
  0x49   :  { %287 = vmatpush.msra.mxu0 %v270_v6  ;;  %v256_v37 = vld [vmem:[%s4349_s30 + $0x58] sm:$0xff]  ;;  %v399_v38 = vld [vmem:[#allocation8 + $0x28] sm:$0xff]  ;;  %v257_v41 = vld [vmem:[%s4349_s30 + $0x60] sm:$0xff] }
  0x4a   :  { %416 = vmatpush.msra.mxu1 %v407_v28  ;;  %v397_v40 = vld [vmem:[#allocation8 + $0x18] sm:$0xff]  ;;  %v396_v42 = vld [vmem:[#allocation8 + $0x10] sm:$0xff]  ;;  %v395_v43 = vld [vmem:[#allocation8 + $0x8] sm:$0xff] }
  0x4b   :  { %288 = vmatpush.msra.mxu0 %v269_v7  ;;  %v394_v44 = vld [vmem:[#allocation8] sm:$0xff]  ;;  %v259_v46 = vld [vmem:[%s4349_s30 + $0x70] sm:$0xff]  ;;  %v260_v47 = vld [vmem:[%s4349_s30 + $0x78] sm:$0xff] }
  0x4c   :  { %417 = vmatpush.msra.mxu1 %v406_v29  ;;  %v258_v45 = vld [vmem:[%s4349_s30 + $0x68] sm:$0xff]  ;;  %v3281_v48 = vld [vmem:[#allocation7] ss:$0 sm:$0xff] }
  0x4d   :  { %289 = vmatpush.msra.mxu0 %v268_v8  ;;  %v3302_v28 = vld [vmem:[#allocation14 + $0x60] sm:$0xff] }
  0x4e   :  { %418 = vmatpush.msra.mxu1 %v405_v30 }
  0x4f   :  { %290 = vmatpush.msra.mxu0 %v267_v9 }
  0x50   :  { %419 = vmatpush.msra.mxu1 %v404_v31  ;;  %v3306_v31 = vld [vmem:[#allocation14 + $0x58] sm:$0xff] }
  0x51   :  { %291 = vmatpush.msra.mxu0 %v266_v10 }
  0x52   :  { %420 = vmatpush.msra.mxu1 %v403_v33  ;;  %v3061_v33 = vmov 0  }
  0x53   :  { %292 = vmatpush.msra.mxu0 %v265_v11  ;;  %2625 = vset.pattern.permute.xlu0 %v3061_v33 }
  0x54   :  { %421 = vmatpush.msra.mxu1 %v402_v34  ;;  %2626 = vset.pattern.permute.xlu1 %v3061_v33 }
  0x55   :  { %293 = vmatpush.msra.mxu0 %v264_v12  ;;  %2627 = vset.pattern.permute.xlu2 %v3061_v33 }
  0x56   :  { %422 = vmatpush.msra.mxu1 %v401_v35 }
  0x57   :  { %294 = vmatpush.msra.mxu0 %v263_v13 }
  0x58   :  { %423 = vmatpush.msra.mxu1 %v400_v36  ;;  %v3312_v36 = vld [vmem:[#allocation14 + $0x48] sm:$0xff] }
  0x59   :  { %295 = vmatpush.msra.mxu0 %v262_v14 }
  0x5a   :  { %424 = vmatpush.msra.mxu1 %v399_v38  ;;  %v3318_v38 = vld [vmem:[#allocation14 + $0x40] sm:$0xff] }
  0x5b   :  { %296 = vmatpush.msra.mxu0 %v261_v15 }
  0x5c   :  { %297 = vmatmul.f32.vlgmr.msra.gmra.mxu0 %v245_v16  ;;  %425 = vmatpush.msra.mxu1 %v398_v39 }
  0x5e   :  { %426 = vmatpush.msra.mxu1 %v397_v40 }
  0x60   :  { %427 = vmatpush.msra.mxu1 %v396_v42  ;;  %v3324_v42 = vld [vmem:[#allocation14 + $0x30] sm:$0xff] }
  0x62   :  { %428 = vmatpush.msra.mxu1 %v395_v43 }
  0x64   :  { %300 = vmatmul.f32.gmra.mxu0 %v246_v17  ;;  %429 = vmatpush.msra.mxu1 %v394_v44 }
  0x6c   :  { %303 = vmatmul.f32.gmra.mxu0 %v247_v18 }
  0x74   :  { %306 = vmatmul.f32.gmra.mxu0 %v248_v19 }
  0x7c   :  { %309 = vmatmul.f32.gmra.mxu0 %v249_v20 }
  0x84   :  { %312 = vmatmul.f32.gmra.mxu0 %v250_v21 }
  0x8c   :  { %315 = vmatmul.f32.gmra.mxu0 %v251_v22 }
  0x94   :  { %318 = vmatmul.f32.gmra.mxu0 %v252_v23  ;;  %v3293_v23 = vld [vmem:[#allocation14 + $0x78] sm:$0xff] }
  0x95   :  { %665 = vmatpush.msra.mxu3 %v3293_v23 }
  0x9c   :  { %321 = vmatmul.f32.gmra.mxu0 %v253_v24  ;;  %v3295_v24 = vld [vmem:[#allocation14 + $0x70] sm:$0xff] }
  0x9d   :  { %666 = vmatpush.msra.mxu3 %v3295_v24 }
  0xa4   :  { %324 = vmatmul.f32.gmra.mxu0 %v254_v27  ;;  %v3299_v27 = vld [vmem:[#allocation14 + $0x68] sm:$0xff] }
  0xa5   :  { %667 = vmatpush.msra.mxu3 %v3299_v27 }
  0xa7   :  { %668 = vmatpush.msra.mxu3 %v3302_v28 }
  0xa9   :  { %669 = vmatpush.msra.mxu3 %v3306_v31 }
  0xac   :  { %327 = vmatmul.f32.gmra.mxu0 %v255_v32  ;;  %v3308_v32 = vld [vmem:[#allocation14 + $0x50] sm:$0xff] }
  0xad   :  { %670 = vmatpush.msra.mxu3 %v3308_v32 }
  0xaf   :  { %671 = vmatpush.msra.mxu3 %v3312_v36 }
  0xb1   :  { %672 = vmatpush.msra.mxu3 %v3318_v38 }
  0xb4   :  { %330 = vmatmul.f32.gmra.mxu0 %v256_v37  ;;  %v646_v37 = vld [vmem:[%s4350_s7] sm:$0xff] }
  0xb5   :  { %780 = vperm.xlu0 %2625, %v646_v37   ;;  %v651_v37 = vld [vmem:[%s4350_s7 + $0x28] sm:$0xff] }
  0xbc   :  { %333 = vmatmul.f32.gmra.mxu0 %v257_v41  ;;  %v3322_v41 = vld [vmem:[#allocation14 + $0x38] sm:$0xff] }
  0xbd   :  { %673 = vmatpush.msra.mxu3 %v3322_v41 }
  0xbf   :  { %674 = vmatpush.msra.mxu3 %v3324_v42 }
  0xc4   :  { %336 = vmatmul.f32.gmra.mxu0 %v258_v45  ;;  %v3328_v45 = vld [vmem:[#allocation14 + $0x28] sm:$0xff] }
  0xc5   :  { %675 = vmatpush.msra.mxu3 %v3328_v45 }
  0xcc   :  { %339 = vmatmul.f32.gmra.mxu0 %v259_v46  ;;  %v647_v46 = vld [vmem:[%s4350_s7 + $0x8] sm:$0xff] }
  0xcd   :  { %785 = vperm.xlu0 %2625, %v647_v46   ;;  %v654_v46 = vld [vmem:[%s4350_s7 + $0x40] sm:$0xff] }
  0xd4   :  { %342 = vmatmul.f32.gmra.mxu0 %v260_v47  ;;  %v3334_v47 = vld [vmem:[#allocation14 + $0x20] sm:$0xff] }
  0xd5   :  { %676 = vmatpush.msra.mxu3 %v3334_v47 }
  0xd9   :  { %v298_v49 = vpop.f32.mrf.mxu0 }
  0xda   :  { %v299_v50 = vadd.f32 %v3281_v48, %v298_v49  ;;  %v3336_v49 = vld [vmem:[#allocation14 + $0x18] sm:$0xff] }
  0xdb   :  { %677 = vmatpush.msra.mxu3 %v3336_v49 }
  0xdc   :  { %vm346_vm0 = vcmp.ge.f32.partialorder %v299_v50, 0.0  ;;  %v362_v51 = vmul.f32 0.2, %v299_v50 }
  0xde   :  { %v378_v52 = vsel %vm346_vm0, %v299_v50, %v362_v51 }
  0xdf   :  { %430 = vmatmul.f32.vlgmr.msra.gmra.mxu1 %v378_v52 }
  0xe1   :  { %v301_v53 = vpop.f32.mrf.mxu0 }
  0xe2   :  { %v302_v54 = vadd.f32 %v3281_v48, %v301_v53  ;;  %v3341_v53 = vld [vmem:[#allocation14 + $0x10] sm:$0xff] }
  0xe3   :  { %678 = vmatpush.msra.mxu3 %v3341_v53 }
  0xe4   :  { %vm347_vm1 = vcmp.ge.f32.partialorder %v302_v54, 0.0  ;;  %v363_v55 = vmul.f32 0.2, %v302_v54 }
  0xe6   :  { %v379_v56 = vsel %vm347_vm1, %v302_v54, %v363_v55  ;;  %v3344_v55 = vld [vmem:[#allocation14 + $0x8] sm:$0xff] }
  0xe7   :  { %433 = vmatmul.f32.gmra.mxu1 %v379_v56  ;;  %679 = vmatpush.msra.mxu3 %v3344_v55  ;;  %v652_v56 = vld [vmem:[%s4350_s7 + $0x30] sm:$0xff] }
  0xe8   :  { %810 = vperm.xlu0 %2625, %v652_v56   ;;  %v657_v56 = vld [vmem:[%s4350_s7 + $0x58] sm:$0xff] }
  0xe9   :  { %v304_v57 = vpop.f32.mrf.mxu0 }
  0xea   :  { %v305_v58 = vadd.f32 %v3281_v48, %v304_v57  ;;  %v3350_v57 = vld [vmem:[#allocation14] sm:$0xff] }
  0xeb   :  { %680 = vmatpush.msra.mxu3 %v3350_v57 }
  0xec   :  { %vm348_vm2 = vcmp.ge.f32.partialorder %v305_v58, 0.0  ;;  %v364_v59 = vmul.f32 0.2, %v305_v58 }
  0xee   :  { %v380_v60 = vsel %vm348_vm2, %v305_v58, %v364_v59 }
  0xef   :  { %436 = vmatmul.f32.gmra.mxu1 %v380_v60 }
  0xf1   :  { %v307_v61 = vpop.f32.mrf.mxu0 }
  0xf2   :  { %v308_v62 = vadd.f32 %v3281_v48, %v307_v61 }
  0xf4   :  { %vm349_vm3 = vcmp.ge.f32.partialorder %v308_v62, 0.0  ;;  %v365_v63 = vmul.f32 0.2, %v308_v62 }
  0xf6   :  { %v381_v0 = vsel %vm349_vm3, %v308_v62, %v365_v63  ;;  %v648_v62 = vld [vmem:[%s4350_s7 + $0x10] sm:$0xff]  ;;  %v655_v63 = vld [vmem:[%s4350_s7 + $0x48] sm:$0xff] }
  0xf7   :  { %439 = vmatmul.f32.gmra.mxu1 %v381_v0  ;;  %790 = vperm.xlu1 %2626, %v648_v62   ;;  %v660_v62 = vld [vmem:[%s4350_s7 + $0x70] sm:$0xff] }
  0xf8   :  { %825 = vperm.xlu0 %2625, %v655_v63  }
  0xf9   :  { %v310_v1 = vpop.f32.mrf.mxu0 }
  0xfa   :  { %v311_v2 = vadd.f32 %v3281_v48, %v310_v1 }
  0xfc   :  { %vm350_vm4 = vcmp.ge.f32.partialorder %v311_v2, 0.0  ;;  %v366_v3 = vmul.f32 0.2, %v311_v2 }
  0xfe   :  { %v382_v4 = vsel %vm350_vm4, %v311_v2, %v366_v3 }
  0xff   :  { %442 = vmatmul.f32.gmra.mxu1 %v382_v4  ;;  %v649_v4 = vld [vmem:[%s4350_s7 + $0x18] sm:$0xff] }
 0x100   :  { %795 = vperm.xlu1 %2626, %v649_v4  }
 0x101   :  { %v313_v5 = vpop.f32.mrf.mxu0 }
 0x102   :  { %v314_v6 = vadd.f32 %v3281_v48, %v313_v5  ;;  %v658_v5 = vld [vmem:[%s4350_s7 + $0x60] sm:$0xff] }
 0x103   :  { %840 = vperm.xlu0 %2625, %v658_v5  }
 0x104   :  { %vm351_vm5 = vcmp.ge.f32.partialorder %v314_v6, 0.0  ;;  %v367_v7 = vmul.f32 0.2, %v314_v6 }
 0x106   :  { %v383_v8 = vsel %vm351_vm5, %v314_v6, %v367_v7 }
 0x107   :  { %445 = vmatmul.f32.gmra.mxu1 %v383_v8 }
 0x109   :  { %v316_v9 = vpop.f32.mrf.mxu0 }
 0x10a   :  { %v317_v10 = vadd.f32 %v3281_v48, %v316_v9 }
 0x10c   :  { %vm352_vm6 = vcmp.ge.f32.partialorder %v317_v10, 0.0  ;;  %v368_v11 = vmul.f32 0.2, %v317_v10 }
 0x10e   :  { %v384_v12 = vsel %vm352_vm6, %v317_v10, %v368_v11  ;;  %v653_v10 = vld [vmem:[%s4350_s7 + $0x38] sm:$0xff] }
 0x10f   :  { %448 = vmatmul.f32.gmra.mxu1 %v384_v12  ;;  %v661_v11 = vld [vmem:[%s4350_s7 + $0x78] sm:$0xff]  ;;  %815 = vperm.xlu1 %2626, %v653_v10   ;;  %v3374_v12 = vld [vmem:[#allocation10] ss:$0 sm:$0xff] }
 0x110   :  { %855 = vperm.xlu0 %2625, %v661_v11  }
 0x111   :  { %v319_v13 = vpop.f32.mrf.mxu0 }
 0x112   :  { %v320_v14 = vadd.f32 %v3281_v48, %v319_v13 }
 0x114   :  { %vm353_vm7 = vcmp.ge.f32.partialorder %v320_v14, 0.0  ;;  %v369_v15 = vmul.f32 0.2, %v320_v14 }
 0x116   :  { %v385_v16 = vsel %vm353_vm7, %v320_v14, %v369_v15  ;;  %v656_v15 = vld [vmem:[%s4350_s7 + $0x50] sm:$0xff] }
 0x117   :  { %451 = vmatmul.f32.gmra.mxu1 %v385_v16  ;;  %830 = vperm.xlu1 %2626, %v656_v15  }
 0x119   :  { %v322_v17 = vpop.f32.mrf.mxu0 }
 0x11a   :  { %v323_v18 = vadd.f32 %v3281_v48, %v322_v17 }
 0x11c   :  { %vm354_vm8 = vcmp.ge.f32.partialorder %v323_v18, 0.0  ;;  %v370_v19 = vmul.f32 0.2, %v323_v18 }
 0x11e   :  { %v386_v20 = vsel %vm354_vm8, %v323_v18, %v370_v19 }
 0x11f   :  { %454 = vmatmul.f32.gmra.mxu1 %v386_v20  ;;  %v659_v20 = vld [vmem:[%s4350_s7 + $0x68] sm:$0xff] }
 0x120   :  { %845 = vperm.xlu1 %2626, %v659_v20   ;;  %v3452_v20 = vld [vmem:[#allocation11 + $0x60] sm:$0xff] }
 0x121   :  { %v325_v21 = vpop.f32.mrf.mxu0 }
 0x122   :  { %v326_v22 = vadd.f32 %v3281_v48, %v325_v21 }
 0x124   :  { %vm355_vm9 = vcmp.ge.f32.partialorder %v326_v22, 0.0  ;;  %v371_v25 = vmul.f32 0.2, %v326_v22 }
 0x126   :  { %v387_v26 = vsel %vm355_vm9, %v326_v22, %v371_v25 }
 0x127   :  { %457 = vmatmul.f32.gmra.mxu1 %v387_v26 }
 0x129   :  { %v328_v29 = vpop.f32.mrf.mxu0 }
 0x12a   :  { %v329_v30 = vadd.f32 %v3281_v48, %v328_v29  ;;  %v650_v29 = vld [vmem:[%s4350_s7 + $0x20] sm:$0xff]  ;;  %s2568_s7 = sshll.u32 %s4289_s19, 4  ;;  %s2553_s19 = sshll.u32 %s3063_s6, 4  ;;  %s2569_s7 = int_to_ptr.hbm [resolvable:$true] %s2568_s7  ;;  %s2554_s19 = int_to_ptr.vmem [resolvable:$true] %s2553_s19 }
 0x12b   :  { %800 = vperm.xlu2 %2627, %v650_v29  }
 0x12c   :  { %vm356_vm10 = vcmp.ge.f32.partialorder %v329_v30, 0.0  ;;  %v372_v34 = vmul.f32 0.2, %v329_v30 }
 0x12e   :  { %v388_v35 = vsel %vm356_vm10, %v329_v30, %v372_v34 }
 0x12f   :  { %460 = vmatmul.f32.gmra.mxu1 %v388_v35 }
 0x131   :  { %v331_v39 = vpop.f32.mrf.mxu0 }
 0x132   :  { %v332_v40 = vadd.f32 %v3281_v48, %v331_v39 }
 0x133   :  { %805 = vperm.xlu2 %2627, %v651_v37   ;;  %v3472_v37 = vld [vmem:[#allocation11 + $0x40] sm:$0xff] }
 0x134   :  { %vm357_vm11 = vcmp.ge.f32.partialorder %v332_v40, 0.0  ;;  %v373_v43 = vmul.f32 0.2, %v332_v40 }
 0x136   :  { %v389_v44 = vsel %vm357_vm11, %v332_v40, %v373_v43 }
 0x137   :  { %463 = vmatmul.f32.gmra.mxu1 %v389_v44 }
 0x139   :  { %v334_v50 = vpop.f32.mrf.mxu0 }
 0x13a   :  { %v335_v51 = vadd.f32 %v3281_v48, %v334_v50 }
 0x13b   :  { %820 = vperm.xlu2 %2627, %v654_v46   ;;  %v3479_v46 = vld [vmem:[#allocation11 + $0x30] sm:$0xff] }
 0x13c   :  { %vm358_vm12 = vcmp.ge.f32.partialorder %v335_v51, 0.0  ;;  %v374_v52 = vmul.f32 0.2, %v335_v51 }
 0x13e   :  { %v390_v54 = vsel %vm358_vm12, %v335_v51, %v374_v52 }
 0x13f   :  { %466 = vmatmul.f32.gmra.mxu1 %v390_v54 }
 0x141   :  { %v337_v58 = vpop.f32.mrf.mxu0 }
 0x142   :  { %v338_v59 = vadd.f32 %v3281_v48, %v337_v58 }
 0x143   :  { %835 = vperm.xlu2 %2627, %v657_v56   ;;  %v3489_v56 = vld [vmem:[#allocation11 + $0x20] sm:$0xff] }
 0x144   :  { %vm359_vm13 = vcmp.ge.f32.partialorder %v338_v59, 0.0  ;;  %v375_v60 = vmul.f32 0.2, %v338_v59 }
 0x146   :  { %v391_v61 = vsel %vm359_vm13, %v338_v59, %v375_v60 }
 0x147   :  { %469 = vmatmul.f32.gmra.mxu1 %v391_v61 }
 0x149   :  { %v340_v0 = vpop.f32.mrf.mxu0 }
 0x14a   :  { %v341_v1 = vadd.f32 %v3281_v48, %v340_v0 }
 0x14b   :  { %850 = vperm.xlu2 %2627, %v660_v62  }
 0x14c   :  { %vm360_vm14 = vcmp.ge.f32.partialorder %v341_v1, 0.0  ;;  %v376_v2 = vmul.f32 0.2, %v341_v1 }
 0x14e   :  { %v392_v3 = vsel %vm360_vm14, %v341_v1, %v376_v2 }
 0x14f   :  { %472 = vmatmul.f32.gmra.mxu1 %v392_v3 }
 0x151   :  { %v343_v6 = vpop.f32.mrf.mxu0 }
 0x152   :  { %v344_v7 = vadd.f32 %v3281_v48, %v343_v6 }
 0x154   :  { %vm361_vm15 = vcmp.ge.f32.partialorder %v344_v7, 0.0  ;;  %v377_v8 = vmul.f32 0.2, %v344_v7 }
 0x156   :  { %v393_v9 = vsel %vm361_vm15, %v344_v7, %v377_v8 }
 0x157   :  { %475 = vmatmul.f32.gmra.mxu1 %v393_v9 }
 0x15c   :  { %v431_v13 = vpop.f32.mrf.mxu1 }
 0x15d   :  { %v432_v14 = vadd.f32 %v3374_v12, %v431_v13 }
 0x15f   :  { %v495_v48 = vmul.f32 0.2, %v432_v14  ;;  %vm479_vm0 = vcmp.ge.f32.partialorder %v432_v14, 0.0 }
 0x161   :  { %v3380_v16 = vsel %vm479_vm0, %v432_v14, %v495_v48  ;;  %v3438_v48 = vld [vmem:[#allocation11 + $0x78] sm:$0xff] }
 0x162   :  { %681 = vmatmul.f32.vlgmr.msra.gmra.mxu3 %v3380_v16  ;;  %893 = vmatpush.msrb.mxu0 %v3438_v48 }
 0x163   :  { %1313 = vmatpush.msrb.mxu3 %v3438_v48 }
 0x164   :  { %v434_v17 = vpop.f32.mrf.mxu1 }
 0x165   :  { %v435_v18 = vadd.f32 %v3374_v12, %v434_v17  ;;  %v3442_v17 = vld [vmem:[#allocation11 + $0x70] sm:$0xff] }
 0x166   :  { %894 = vmatpush.msrb.mxu0 %v3442_v17  ;;  %1314 = vmatpush.msrb.mxu3 %v3442_v17 }
 0x167   :  { %v496_v19 = vmul.f32 0.2, %v435_v18  ;;  %vm480_vm1 = vcmp.ge.f32.partialorder %v435_v18, 0.0 }
 0x169   :  { %v3387_v21 = vsel %vm480_vm1, %v435_v18, %v496_v19  ;;  %v3448_v19 = vld [vmem:[#allocation11 + $0x68] sm:$0xff] }
 0x16a   :  { %684 = vmatmul.f32.gmra.mxu3 %v3387_v21  ;;  %895 = vmatpush.msrb.mxu0 %v3448_v19 }
 0x16b   :  { %1315 = vmatpush.msrb.mxu3 %v3448_v19 }
 0x16c   :  { %v437_v22 = vpop.f32.mrf.mxu1  ;;  %896 = vmatpush.msrb.mxu0 %v3452_v20 }
 0x16d   :  { %v438_v25 = vadd.f32 %v3374_v12, %v437_v22  ;;  %1316 = vmatpush.msrb.mxu3 %v3452_v20 }
 0x16f   :  { %v497_v26 = vmul.f32 0.2, %v438_v25  ;;  %vm481_vm2 = vcmp.ge.f32.partialorder %v438_v25, 0.0 }
 0x171   :  { %v3394_v30 = vsel %vm481_vm2, %v438_v25, %v497_v26  ;;  %v3457_v26 = vld [vmem:[#allocation11 + $0x58] sm:$0xff] }
 0x172   :  { %687 = vmatmul.f32.gmra.mxu3 %v3394_v30  ;;  %897 = vmatpush.msrb.mxu0 %v3457_v26 }
 0x173   :  { %1317 = vmatpush.msrb.mxu3 %v3457_v26 }
 0x174   :  { %v440_v33 = vpop.f32.mrf.mxu1 }
 0x175   :  { %v441_v34 = vadd.f32 %v3374_v12, %v440_v33  ;;  %v3461_v33 = vld [vmem:[#allocation11 + $0x50] sm:$0xff] }
 0x176   :  { %898 = vmatpush.msrb.mxu0 %v3461_v33  ;;  %1318 = vmatpush.msrb.mxu3 %v3461_v33 }
 0x177   :  { %v498_v35 = vmul.f32 0.2, %v441_v34  ;;  %vm482_vm3 = vcmp.ge.f32.partialorder %v441_v34, 0.0 }
 0x179   :  { %v3401_v39 = vsel %vm482_vm3, %v441_v34, %v498_v35  ;;  %v3467_v35 = vld [vmem:[#allocation11 + $0x48] sm:$0xff] }
 0x17a   :  { %4351 = vst [vmem:[#allocation35_spill] sm:$0xff] %v3401_v39  ;;  %690 = vmatmul.f32.gmra.mxu3 %v3401_v39  ;;  %899 = vmatpush.msrb.mxu0 %v3467_v35  ;;  %v530_v39 = vld [vmem:[#allocation16 + $0x18] sm:$0xff] }
 0x17b   :  { %1319 = vmatpush.msrb.mxu3 %v3467_v35 }
 0x17c   :  { %v443_v40 = vpop.f32.mrf.mxu1  ;;  %900 = vmatpush.msrb.mxu0 %v3472_v37 }
 0x17d   :  { %v444_v43 = vadd.f32 %v3374_v12, %v443_v40  ;;  %v3474_v40 = vld [vmem:[#allocation11 + $0x38] sm:$0xff]  ;;  %1320 = vmatpush.msrb.mxu3 %v3472_v37 }
 0x17e   :  { %901 = vmatpush.msrb.mxu0 %v3474_v40 }
 0x17f   :  { %v499_v44 = vmul.f32 0.2, %v444_v43  ;;  %vm483_vm4 = vcmp.ge.f32.partialorder %v444_v43, 0.0  ;;  %1321 = vmatpush.msrb.mxu3 %v3474_v40 }
 0x180   :  { %902 = vmatpush.msrb.mxu0 %v3479_v46 }
 0x181   :  { %v3408_v50 = vsel %vm483_vm4, %v444_v43, %v499_v44  ;;  %1322 = vmatpush.msrb.mxu3 %v3479_v46 }
 0x182   :  { %4352 = vst [vmem:[#allocation36_spill] sm:$0xff] %v3408_v50  ;;  %693 = vmatmul.f32.gmra.mxu3 %v3408_v50  ;;  %v534_v50 = vld [vmem:[#allocation16 + $0x38] sm:$0xff] }
 0x184   :  { %v446_v51 = vpop.f32.mrf.mxu1 }
 0x185   :  { %v447_v52 = vadd.f32 %v3374_v12, %v446_v51 }
 0x187   :  { %v500_v54 = vmul.f32 0.2, %v447_v52  ;;  %vm484_vm5 = vcmp.ge.f32.partialorder %v447_v52, 0.0 }
 0x189   :  { %v3415_v58 = vsel %vm484_vm5, %v447_v52, %v500_v54  ;;  %v3483_v52 = vld [vmem:[#allocation11 + $0x28] sm:$0xff] }
 0x18a   :  { %4353 = vst [vmem:[#allocation37_spill] sm:$0xff] %v3415_v58  ;;  %696 = vmatmul.f32.gmra.mxu3 %v3415_v58  ;;  %903 = vmatpush.msrb.mxu0 %v3483_v52 }
 0x18b   :  { %1323 = vmatpush.msrb.mxu3 %v3483_v52 }
 0x18c   :  { %v449_v59 = vpop.f32.mrf.mxu1  ;;  %904 = vmatpush.msrb.mxu0 %v3489_v56 }
 0x18d   :  { %v450_v60 = vadd.f32 %v3374_v12, %v449_v59  ;;  %1324 = vmatpush.msrb.mxu3 %v3489_v56 }
 0x18f   :  { %v501_v61 = vmul.f32 0.2, %v450_v60  ;;  %vm485_vm6 = vcmp.ge.f32.partialorder %v450_v60, 0.0 }
 0x191   :  { %v3422_v63 = vsel %vm485_vm6, %v450_v60, %v501_v61  ;;  %v3497_v61 = vld [vmem:[#allocation11 + $0x18] sm:$0xff] }
 0x192   :  { %4354 = vst [vmem:[#allocation38_spill] sm:$0xff] %v3422_v63  ;;  %699 = vmatmul.f32.gmra.mxu3 %v3422_v63  ;;  %905 = vmatpush.msrb.mxu0 %v3497_v61  ;;  %v537_v63 = vld [vmem:[#allocation16 + $0x50] sm:$0xff] }
 0x193   :  { %1325 = vmatpush.msrb.mxu3 %v3497_v61 }
 0x194   :  { %v452_v0 = vpop.f32.mrf.mxu1 }
 0x195   :  { %v453_v1 = vadd.f32 %v3374_v12, %v452_v0  ;;  %v3501_v0 = vld [vmem:[#allocation11 + $0x10] sm:$0xff] }
 0x196   :  { %906 = vmatpush.msrb.mxu0 %v3501_v0  ;;  %1326 = vmatpush.msrb.mxu3 %v3501_v0 }
 0x197   :  { %v502_v2 = vmul.f32 0.2, %v453_v1  ;;  %vm486_vm7 = vcmp.ge.f32.partialorder %v453_v1, 0.0 }
 0x199   :  { %v3426_v3 = vsel %vm486_vm7, %v453_v1, %v502_v2  ;;  %v3505_v1 = vld [vmem:[#allocation11 + $0x8] sm:$0xff] }
 0x19a   :  { %4355 = vst [vmem:[#allocation39_spill] sm:$0xff] %v3426_v3  ;;  %702 = vmatmul.f32.gmra.mxu3 %v3426_v3  ;;  %907 = vmatpush.msrb.mxu0 %v3505_v1  ;;  %v539_v3 = vld [vmem:[#allocation16 + $0x60] sm:$0xff] }
 0x19b   :  { %1327 = vmatpush.msrb.mxu3 %v3505_v1 }
 0x19c   :  { %v455_v4 = vpop.f32.mrf.mxu1 }
 0x19d   :  { %v456_v5 = vadd.f32 %v3374_v12, %v455_v4  ;;  %v3509_v4 = vld [vmem:[#allocation11] sm:$0xff] }
 0x19e   :  { %908 = vmatpush.msrb.mxu0 %v3509_v4  ;;  %1328 = vmatpush.msrb.mxu3 %v3509_v4 }
 0x19f   :  { %v503_v6 = vmul.f32 0.2, %v456_v5  ;;  %vm487_vm8 = vcmp.ge.f32.partialorder %v456_v5, 0.0 }
 0x1a1   :  { %v3430_v7 = vsel %vm487_vm8, %v456_v5, %v503_v6 }
 0x1a2   :  { %4356 = vst [vmem:[#allocation40_spill] sm:$0xff] %v3430_v7  ;;  %705 = vmatmul.f32.gmra.mxu3 %v3430_v7  ;;  %v540_v7 = vld [vmem:[#allocation16 + $0x68] sm:$0xff] }
 0x1a4   :  { %v458_v8 = vpop.f32.mrf.mxu1 }
 0x1a5   :  { %v459_v9 = vadd.f32 %v3374_v12, %v458_v8 }
 0x1a7   :  { %v504_v10 = vmul.f32 0.2, %v459_v9  ;;  %vm488_vm9 = vcmp.ge.f32.partialorder %v459_v9, 0.0 }
 0x1a9   :  { %v3434_v11 = vsel %vm488_vm9, %v459_v9, %v504_v10 }
 0x1aa   :  { %4357 = vst [vmem:[#allocation41_spill] sm:$0xff] %v3434_v11  ;;  %708 = vmatmul.f32.gmra.mxu3 %v3434_v11 }
 0x1ac   :  { %v461_v13 = vpop.f32.mrf.mxu1 }
 0x1ad   :  { %v462_v14 = vadd.f32 %v3374_v12, %v461_v13 }
 0x1af   :  { %v505_v15 = vmul.f32 0.2, %v462_v14  ;;  %vm489_vm10 = vcmp.ge.f32.partialorder %v462_v14, 0.0 }
 0x1b1   :  { %v3446_v18 = vsel %vm489_vm10, %v462_v14, %v505_v15 }
 0x1b2   :  { %4358 = vst [vmem:[#allocation42_spill] sm:$0xff] %v3446_v18  ;;  %711 = vmatmul.f32.gmra.mxu3 %v3446_v18 }
 0x1b4   :  { %v464_v22 = vpop.f32.mrf.mxu1 }
 0x1b5   :  { %v465_v25 = vadd.f32 %v3374_v12, %v464_v22  ;;  %v3528_v22 = vld [vmem:[%s4280_s10] ss:$0 sm:$0xff] }
 0x1b7   :  { %v506_v29 = vmul.f32 0.2, %v465_v25  ;;  %vm490_vm11 = vcmp.ge.f32.partialorder %v465_v25, 0.0 }
 0x1b9   :  { %v3465_v34 = vsel %vm490_vm11, %v465_v25, %v506_v29 }
 0x1ba   :  { %4359 = vst [vmem:[#allocation43_spill] sm:$0xff] %v3465_v34  ;;  %714 = vmatmul.f32.gmra.mxu3 %v3465_v34 }
 0x1bc   :  { %v467_v43 = vpop.f32.mrf.mxu1 }
 0x1bd   :  { %v468_v44 = vadd.f32 %v3374_v12, %v467_v43  ;;  %v781_v43 = vpop.permute.xlu0 %780 }
 0x1bf   :  { %v507_v51 = vmul.f32 0.2, %v468_v44  ;;  %vm491_vm12 = vcmp.ge.f32.partialorder %v468_v44, 0.0 }
 0x1c1   :  { %v3487_v54 = vsel %vm491_vm12, %v468_v44, %v507_v51 }
 0x1c2   :  { %4360 = vst [vmem:[#allocation44_spill] sm:$0xff] %v3487_v54  ;;  %717 = vmatmul.f32.gmra.mxu3 %v3487_v54 }
 0x1c4   :  { %v470_v59 = vpop.f32.mrf.mxu1 }
 0x1c5   :  { %v471_v60 = vadd.f32 %v3374_v12, %v470_v59 }
 0x1c7   :  { %v508_v62 = vmul.f32 0.2, %v471_v60  ;;  %vm492_vm13 = vcmp.ge.f32.partialorder %v471_v60, 0.0 }
 0x1c9   :  { %v3507_v2 = vsel %vm492_vm13, %v471_v60, %v508_v62 }
 0x1ca   :  { %4361 = vst [vmem:[#allocation45_spill] sm:$0xff] %v3507_v2  ;;  %720 = vmatmul.f32.gmra.mxu3 %v3507_v2 }
 0x1cc   :  { %v473_v5 = vpop.f32.mrf.mxu1 }
 0x1cd   :  { %v474_v6 = vadd.f32 %v3374_v12, %v473_v5  ;;  %v786_v5 = vpop.permute.xlu0 %785 }
 0x1cf   :  { %v509_v8 = vmul.f32 0.2, %v474_v6  ;;  %vm493_vm14 = vcmp.ge.f32.partialorder %v474_v6, 0.0 }
 0x1d1   :  { %v3518_v9 = vsel %vm493_vm14, %v474_v6, %v509_v8 }
 0x1d2   :  { %4362 = vst [vmem:[#allocation46_spill] sm:$0xff] %v3518_v9  ;;  %723 = vmatmul.f32.gmra.mxu3 %v3518_v9 }
 0x1d4   :  { %v476_v10 = vpop.f32.mrf.mxu1 }
 0x1d5   :  { %v477_v13 = vadd.f32 %v3374_v12, %v476_v10 }
 0x1d7   :  { %v510_v14 = vmul.f32 0.2, %v477_v13  ;;  %vm494_vm15 = vcmp.ge.f32.partialorder %v477_v13, 0.0 }
 0x1d9   :  { %v3522_v15 = vsel %vm494_vm15, %v477_v13, %v510_v14  ;;  %v791_v14 = vpop.permute.xlu1 %790 }
 0x1da   :  { %4363 = vst [vmem:[#allocation47_spill] sm:$0xff] %v3522_v15  ;;  %726 = vmatmul.f32.gmra.mxu3 %v3522_v15  ;;  %v801_v15 = vpop.permute.xlu2 %800 }
 0x1e5   :  { %v682_v25 = vpop.f32.mrf.mxu3 }
 0x1e6   :  { %v683_v29 = vadd.f32 %v3528_v22, %v682_v25 }
 0x1e8   :  { %vm730_vm0 = vcmp.ge.f32.partialorder %v683_v29, 0.0  ;;  %v746_v44 = vmul.f32 0.2, %v683_v29 }
 0x1ea   :  { %v762_v51 = vsel %vm730_vm0, %v683_v29, %v746_v44 }
 0x1eb   :  { %v3531_v59 = vmul.f32 %v781_v43, %v762_v51 }
 0x1ed   :  { %v685_v12 = vpop.f32.mrf.mxu3  ;;  %909 = vmatmul.f32.vlgmr.msrb.gmra.mxu0 %v3531_v59 }
 0x1ee   :  { %v686_v60 = vadd.f32 %v3528_v22, %v685_v12 }
 0x1f0   :  { %v747_v62 = vmul.f32 0.2, %v686_v60  ;;  %vm731_vm1 = vcmp.ge.f32.partialorder %v686_v60, 0.0 }
 0x1f2   :  { %v763_v6 = vsel %vm731_vm1, %v686_v60, %v747_v62  ;;  %v796_v60 = vpop.permute.xlu1 %795 }
 0x1f3   :  { %v3535_v8 = vmul.f32 %v786_v5, %v763_v6 }
 0x1f5   :  { %v688_v10 = vpop.f32.mrf.mxu3  ;;  %912 = vmatmul.f32.gmra.mxu0 %v3535_v8 }
 0x1f6   :  { %v689_v13 = vadd.f32 %v3528_v22, %v688_v10 }
 0x1f8   :  { %v748_v25 = vmul.f32 0.2, %v689_v13  ;;  %vm732_vm2 = vcmp.ge.f32.partialorder %v689_v13, 0.0 }
 0x1fa   :  { %v764_v29 = vsel %vm732_vm2, %v689_v13, %v748_v25 }
 0x1fb   :  { %v3539_v43 = vmul.f32 %v791_v14, %v764_v29 }
 0x1fd   :  { %4364 = vst [vmem:[#allocation48_spill] sm:$0xff] %v3539_v43  ;;  %v691_v44 = vpop.f32.mrf.mxu3  ;;  %915 = vmatmul.f32.gmra.mxu0 %v3539_v43  ;;  %v527_v43 = vld [vmem:[#allocation16] sm:$0xff] }
 0x1fe   :  { %v692_v51 = vadd.f32 %v3528_v22, %v691_v44 }
 0x200   :  { %v749_v12 = vmul.f32 0.2, %v692_v51  ;;  %vm733_vm3 = vcmp.ge.f32.partialorder %v692_v51, 0.0 }
 0x202   :  { %v765_v62 = vsel %vm733_vm3, %v692_v51, %v749_v12  ;;  %v806_v51 = vpop.permute.xlu2 %805 }
 0x203   :  { %v3543_v5 = vmul.f32 %v796_v60, %v765_v62 }
 0x205   :  { %4365 = vst [vmem:[#allocation49_spill] sm:$0xff] %v3543_v5  ;;  %v694_v6 = vpop.f32.mrf.mxu3  ;;  %918 = vmatmul.f32.gmra.mxu0 %v3543_v5  ;;  %v533_v5 = vld [vmem:[#allocation16 + $0x30] sm:$0xff] }
 0x206   :  { %v695_v10 = vadd.f32 %v3528_v22, %v694_v6 }
 0x208   :  { %v750_v13 = vmul.f32 0.2, %v695_v10  ;;  %vm734_vm4 = vcmp.ge.f32.partialorder %v695_v10, 0.0 }
 0x20a   :  { %v766_v14 = vsel %vm734_vm4, %v695_v10, %v750_v13 }
 0x20b   :  { %v3547_v25 = vmul.f32 %v801_v15, %v766_v14  ;;  %v811_v15 = vpop.permute.xlu0 %810 }
 0x20d   :  { %4366 = vst [vmem:[#allocation50_spill] sm:$0xff] %v3547_v25  ;;  %v697_v29 = vpop.f32.mrf.mxu3  ;;  %921 = vmatmul.f32.gmra.mxu0 %v3547_v25  ;;  %v535_v25 = vld [vmem:[#allocation16 + $0x40] sm:$0xff] }
 0x20e   :  { %v698_v44 = vadd.f32 %v3528_v22, %v697_v29 }
 0x210   :  { %v751_v9 = vmul.f32 0.2, %v698_v44  ;;  %vm735_vm5 = vcmp.ge.f32.partialorder %v698_v44, 0.0 }
 0x212   :  { %v767_v12 = vsel %vm735_vm5, %v698_v44, %v751_v9  ;;  %v816_v9 = vpop.permute.xlu1 %815 }
 0x213   :  { %v3551_v60 = vmul.f32 %v806_v51, %v767_v12 }
 0x215   :  { %4367 = vst [vmem:[#allocation51_spill] sm:$0xff] %v3551_v60  ;;  %v700_v62 = vpop.f32.mrf.mxu3  ;;  %924 = vmatmul.f32.gmra.mxu0 %v3551_v60  ;;  %v536_v60 = vld [vmem:[#allocation16 + $0x48] sm:$0xff] }
 0x216   :  { %v701_v6 = vadd.f32 %v3528_v22, %v700_v62 }
 0x218   :  { %v752_v2 = vmul.f32 0.2, %v701_v6  ;;  %vm736_vm6 = vcmp.ge.f32.partialorder %v701_v6, 0.0 }
 0x21a   :  { %v768_v10 = vsel %vm736_vm6, %v701_v6, %v752_v2  ;;  %v821_v6 = vpop.permute.xlu2 %820 }
 0x21b   :  { %v3555_v13 = vmul.f32 %v811_v15, %v768_v10 }
 0x21d   :  { %4368 = vst [vmem:[#allocation52_spill] sm:$0xff] %v3555_v13  ;;  %v703_v14 = vpop.f32.mrf.mxu3  ;;  %927 = vmatmul.f32.gmra.mxu0 %v3555_v13  ;;  %v538_v13 = vld [vmem:[#allocation16 + $0x58] sm:$0xff] }
 0x21e   :  { %v704_v29 = vadd.f32 %v3528_v22, %v703_v14 }
 0x220   :  { %v753_v54 = vmul.f32 0.2, %v704_v29  ;;  %vm737_vm7 = vcmp.ge.f32.partialorder %v704_v29, 0.0 }
 0x222   :  { %v769_v44 = vsel %vm737_vm7, %v704_v29, %v753_v54  ;;  %v826_v29 = vpop.permute.xlu0 %825 }
 0x223   :  { %v3559_v51 = vmul.f32 %v816_v9, %v769_v44 }
 0x225   :  { %4369 = vst [vmem:[#allocation53_spill] sm:$0xff] %v3559_v51  ;;  %v706_v12 = vpop.f32.mrf.mxu3  ;;  %930 = vmatmul.f32.gmra.mxu0 %v3559_v51 }
 0x226   :  { %v707_v62 = vadd.f32 %v3528_v22, %v706_v12 }
 0x228   :  { %vm738_vm8 = vcmp.ge.f32.partialorder %v707_v62, 0.0  ;;  %v754_v2 = vmul.f32 0.2, %v707_v62 }
 0x22a   :  { %v770_v15 = vsel %vm738_vm8, %v707_v62, %v754_v2  ;;  %v831_v2 = vpop.permute.xlu1 %830 }
 0x22b   :  { %v3563_v10 = vmul.f32 %v821_v6, %v770_v15 }
 0x22d   :  { %4370 = vst [vmem:[#allocation54_spill] sm:$0xff] %v3563_v10  ;;  %v709_v34 = vpop.f32.mrf.mxu3  ;;  %933 = vmatmul.f32.gmra.mxu0 %v3563_v10  ;;  %v541_v10 = vld [vmem:[#allocation16 + $0x70] sm:$0xff] }
 0x22e   :  { %v710_v14 = vadd.f32 %v3528_v22, %v709_v34 }
 0x230   :  { %vm739_vm9 = vcmp.ge.f32.partialorder %v710_v14, 0.0  ;;  %v755_v54 = vmul.f32 0.2, %v710_v14 }
 0x232   :  { %v771_v9 = vsel %vm739_vm9, %v710_v14, %v755_v54  ;;  %v836_v54 = vpop.permute.xlu2 %835 }
 0x233   :  { %v3567_v44 = vmul.f32 %v826_v29, %v771_v9 }
 0x235   :  { %4371 = vst [vmem:[#allocation55_spill] sm:$0xff] %v3567_v44  ;;  %v712_v18 = vpop.f32.mrf.mxu3  ;;  %936 = vmatmul.f32.gmra.mxu0 %v3567_v44 }
 0x236   :  { %v713_v12 = vadd.f32 %v3528_v22, %v712_v18 }
 0x238   :  { %vm740_vm10 = vcmp.ge.f32.partialorder %v713_v12, 0.0  ;;  %v756_v62 = vmul.f32 0.2, %v713_v12 }
 0x23a   :  { %v772_v6 = vsel %vm740_vm10, %v713_v12, %v756_v62  ;;  %v841_v62 = vpop.permute.xlu0 %840 }
 0x23b   :  { %v3571_v15 = vmul.f32 %v831_v2, %v772_v6 }
 0x23d   :  { %4372 = vst [vmem:[#allocation56_spill] sm:$0xff] %v3571_v15  ;;  %v715_v11 = vpop.f32.mrf.mxu3  ;;  %939 = vmatmul.f32.gmra.mxu0 %v3571_v15 }
 0x23e   :  { %v716_v34 = vadd.f32 %v3528_v22, %v715_v11 }
 0x240   :  { %vm741_vm11 = vcmp.ge.f32.partialorder %v716_v34, 0.0  ;;  %v757_v14 = vmul.f32 0.2, %v716_v34 }
 0x242   :  { %v773_v29 = vsel %vm741_vm11, %v716_v34, %v757_v14  ;;  %v846_v14 = vpop.permute.xlu1 %845 }
 0x243   :  { %v3575_v9 = vmul.f32 %v836_v54, %v773_v29 }
 0x245   :  { %4373 = vst [vmem:[#allocation57_spill] sm:$0xff] %v3575_v9  ;;  %v718_v44 = vpop.f32.mrf.mxu3  ;;  %942 = vmatmul.f32.gmra.mxu0 %v3575_v9 }
 0x246   :  { %v719_v18 = vadd.f32 %v3528_v22, %v718_v44 }
 0x248   :  { %vm742_vm12 = vcmp.ge.f32.partialorder %v719_v18, 0.0  ;;  %v758_v12 = vmul.f32 0.2, %v719_v18 }
 0x24a   :  { %v774_v2 = vsel %vm742_vm12, %v719_v18, %v758_v12  ;;  %v851_v12 = vpop.permute.xlu2 %850 }
 0x24b   :  { %v3579_v6 = vmul.f32 %v841_v62, %v774_v2 }
 0x24d   :  { %4374 = vst [vmem:[#allocation58_spill] sm:$0xff] %v3579_v6  ;;  %v721_v15 = vpop.f32.mrf.mxu3  ;;  %945 = vmatmul.f32.gmra.mxu0 %v3579_v6 }
 0x24e   :  { %v722_v11 = vadd.f32 %v3528_v22, %v721_v15 }
 0x250   :  { %vm743_vm13 = vcmp.ge.f32.partialorder %v722_v11, 0.0  ;;  %v759_v34 = vmul.f32 0.2, %v722_v11 }
 0x252   :  { %v775_v54 = vsel %vm743_vm13, %v722_v11, %v759_v34  ;;  %v856_v34 = vpop.permute.xlu0 %855 }
 0x253   :  { %v3583_v29 = vmul.f32 %v846_v14, %v775_v54 }
 0x255   :  { %4375 = vst [vmem:[#allocation59_spill] sm:$0xff] %v3583_v29  ;;  %v724_v9 = vpop.f32.mrf.mxu3  ;;  %948 = vmatmul.f32.gmra.mxu0 %v3583_v29 }
 0x256   :  { %v725_v44 = vadd.f32 %v3528_v22, %v724_v9 }
 0x258   :  { %vm744_vm14 = vcmp.ge.f32.partialorder %v725_v44, 0.0  ;;  %v760_v18 = vmul.f32 0.2, %v725_v44 }
 0x25a   :  { %v776_v62 = vsel %vm744_vm14, %v725_v44, %v760_v18 }
 0x25b   :  { %v3587_v2 = vmul.f32 %v851_v12, %v776_v62 }
 0x25d   :  { %4376 = vst [vmem:[#allocation60_spill] sm:$0xff] %v3587_v2  ;;  %v727_v6 = vpop.f32.mrf.mxu3  ;;  %951 = vmatmul.f32.gmra.mxu0 %v3587_v2 }
 0x25e   :  { %v728_v15 = vadd.f32 %v3528_v22, %v727_v6 }
 0x260   :  { %vm745_vm15 = vcmp.ge.f32.partialorder %v728_v15, 0.0  ;;  %v761_v11 = vmul.f32 0.2, %v728_v15 }
 0x262   :  { %v777_v14 = vsel %vm745_vm15, %v728_v15, %v761_v11 }
 0x263   :  { %v3591_v54 = vmul.f32 %v856_v34, %v777_v14 }
 0x265   :  { %4377 = vst [vmem:[#allocation61_spill] sm:$0xff] %v3591_v54  ;;  %954 = vmatmul.f32.gmra.mxu0 %v3591_v54  ;;  %v542_v54 = vld [vmem:[#allocation16 + $0x78] sm:$0xff] }
 0x266   :  { %547 = vmatpush.msra.mxu2 %v542_v54  ;;  %v532_v54 = vld [vmem:[#allocation16 + $0x28] sm:$0xff] }
 0x268   :  { %548 = vmatpush.msra.mxu2 %v541_v10 }
 0x26a   :  { %v3594_v9 = vpop.f32.mrf.mxu0  ;;  %549 = vmatpush.msra.mxu2 %v540_v7  ;;  %v531_v7 = vld [vmem:[#allocation16 + $0x20] sm:$0xff] }
 0x26c   :  { %550 = vmatpush.msra.mxu2 %v539_v3  ;;  %v529_v3 = vld [vmem:[#allocation16 + $0x10] sm:$0xff] }
 0x26e   :  { %551 = vmatpush.msra.mxu2 %v538_v13  ;;  %v3614_v13 = vld [vmem:[#allocation13] ss:$0 sm:$0xff] }
 0x270   :  { %552 = vmatpush.msra.mxu2 %v537_v63  ;;  %v528_v63 = vld [vmem:[#allocation16 + $0x8] sm:$0xff] }
 0x272   :  { %v3596_v29 = vpop.f32.mrf.mxu0  ;;  %553 = vmatpush.msra.mxu2 %v536_v60 }
 0x274   :  { %554 = vmatpush.msra.mxu2 %v535_v25 }
 0x276   :  { %555 = vmatpush.msra.mxu2 %v534_v50 }
 0x278   :  { %556 = vmatpush.msra.mxu2 %v533_v5 }
 0x27a   :  { %v3598_v44 = vpop.f32.mrf.mxu0  ;;  %557 = vmatpush.msra.mxu2 %v532_v54  ;;  %v2634_v54 = vld [vmem:[%s4349_s30] sm:$0xff] }
 0x27c   :  { %558 = vmatpush.msra.mxu2 %v531_v7 }
 0x27e   :  { %559 = vmatpush.msra.mxu2 %v530_v39 }
 0x280   :  { %560 = vmatpush.msra.mxu2 %v529_v3 }
 0x282   :  { %v3600_v18 = vpop.f32.mrf.mxu0  ;;  %561 = vmatpush.msra.mxu2 %v528_v63 }
 0x284   :  { %562 = vmatpush.msra.mxu2 %v527_v43  ;;  %v3627_v43 = vld [vmem:[#allocation2 + $0x8] sm:$0xff] }
 0x285   :  { %563 = vmatmul.f32.vlgmr.msra.gmra.mxu2 %v2634_v54  ;;  %1186 = vadd.xlane.f32.xlu2 %v3627_v43 }
 0x286   :  { %1071 = vmatpush.msrb.mxu2 %v3293_v23 }
 0x288   :  { %1072 = vmatpush.msrb.mxu2 %v3295_v24  ;;  %v2635_v24 = vld [vmem:[%s4349_s30 + $0x8] sm:$0xff] }
 0x28a   :  { %v3602_v12 = vpop.f32.mrf.mxu0  ;;  %1073 = vmatpush.msrb.mxu2 %v3299_v27 }
 0x28c   :  { %1074 = vmatpush.msrb.mxu2 %v3302_v28 }
 0x28d   :  { %566 = vmatmul.f32.gmra.mxu2 %v2635_v24 }
 0x28e   :  { %1075 = vmatpush.msrb.mxu2 %v3306_v31 }
 0x290   :  { %1076 = vmatpush.msrb.mxu2 %v3308_v32  ;;  %v2636_v32 = vld [vmem:[%s4349_s30 + $0x10] sm:$0xff] }
 0x292   :  { %v3604_v62 = vpop.f32.mrf.mxu0  ;;  %1077 = vmatpush.msrb.mxu2 %v3312_v36 }
 0x294   :  { %1078 = vmatpush.msrb.mxu2 %v3318_v38 }
 0x295   :  { %569 = vmatmul.f32.gmra.mxu2 %v2636_v32  ;;  %v2662_v32 = vld [vmem:[%s4349_s30 + $0x60] sm:$0xff] }
 0x296   :  { %1079 = vmatpush.msrb.mxu2 %v3322_v41 }
 0x298   :  { %1080 = vmatpush.msrb.mxu2 %v3324_v42  ;;  %v2637_v42 = vld [vmem:[%s4349_s30 + $0x18] sm:$0xff] }
 0x29a   :  { %v3606_v6 = vpop.f32.mrf.mxu0  ;;  %1081 = vmatpush.msrb.mxu2 %v3328_v45 }
 0x29c   :  { %1082 = vmatpush.msrb.mxu2 %v3334_v47 }
 0x29d   :  { %572 = vmatmul.f32.gmra.mxu2 %v2637_v42 }
 0x29e   :  { %1083 = vmatpush.msrb.mxu2 %v3336_v49  ;;  %v2638_v49 = vld [vmem:[%s4349_s30 + $0x20] sm:$0xff] }
 0x2a0   :  { %1084 = vmatpush.msrb.mxu2 %v3341_v53 }
 0x2a2   :  { %v3608_v2 = vpop.f32.mrf.mxu0  ;;  %1085 = vmatpush.msrb.mxu2 %v3344_v55  ;;  %v3694_v55 = vld [vmem:[#allocation14 + $0x78] sm:$0xff] }
 0x2a4   :  { %1086 = vmatpush.msrb.mxu2 %v3350_v57  ;;  %v3698_v57 = vld [vmem:[#allocation14 + $0x70] sm:$0xff] }
 0x2a5   :  { %575 = vmatmul.f32.gmra.mxu2 %v2638_v49 }
 0x2a6   :  { %1733 = vmatpush.msra.mxu2 %v3438_v48  ;;  %v2641_v48 = vld [vmem:[%s4349_s30 + $0x28] sm:$0xff] }
 0x2a8   :  { %1734 = vmatpush.msra.mxu2 %v3442_v17  ;;  %v3705_v17 = vld [vmem:[#allocation14 + $0x68] sm:$0xff] }
 0x2aa   :  { %v3610_v15 = vpop.f32.mrf.mxu0  ;;  %1735 = vmatpush.msra.mxu2 %v3448_v19  ;;  %v880_v19 = vld [vmem:[#allocation2 + $0x30] sm:$0xff] }
 0x2ac   :  { %1736 = vmatpush.msra.mxu2 %v3452_v20  ;;  %v3714_v20 = vld [vmem:[#allocation14 + $0x58] sm:$0xff] }
 0x2ad   :  { %578 = vmatmul.f32.gmra.mxu2 %v2641_v48 }
 0x2ae   :  { %1737 = vmatpush.msra.mxu2 %v3457_v26  ;;  %v2646_v26 = vld [vmem:[%s4349_s30 + $0x30] sm:$0xff] }
 0x2b0   :  { %1738 = vmatpush.msra.mxu2 %v3461_v33  ;;  %v3729_v33 = vld [vmem:[#allocation14 + $0x40] sm:$0xff] }
 0x2b2   :  { %v3612_v11 = vpop.f32.mrf.mxu0  ;;  %1739 = vmatpush.msra.mxu2 %v3467_v35  ;;  %v881_v35 = vld [vmem:[#allocation2 + $0x38] sm:$0xff] }
 0x2b4   :  { %1740 = vmatpush.msra.mxu2 %v3472_v37  ;;  %v3734_v37 = vld [vmem:[#allocation14 + $0x38] sm:$0xff] }
 0x2b5   :  { %581 = vmatmul.f32.gmra.mxu2 %v2646_v26 }
 0x2b6   :  { %1741 = vmatpush.msra.mxu2 %v3474_v40  ;;  %v2651_v40 = vld [vmem:[%s4349_s30 + $0x38] sm:$0xff] }
 0x2b8   :  { %1742 = vmatpush.msra.mxu2 %v3479_v46  ;;  %v3749_v46 = vld [vmem:[#allocation14 + $0x20] sm:$0xff] }
 0x2ba   :  { %v940_v34 = vpop.f32.mrf.mxu0  ;;  %1743 = vmatpush.msra.mxu2 %v3483_v52  ;;  %v882_v52 = vld [vmem:[#allocation2 + $0x40] sm:$0xff] }
 0x2bc   :  { %1744 = vmatpush.msra.mxu2 %v3489_v56  ;;  %v3754_v56 = vld [vmem:[#allocation14 + $0x18] sm:$0xff] }
 0x2bd   :  { %584 = vmatmul.f32.gmra.mxu2 %v2651_v40 }
 0x2be   :  { %1745 = vmatpush.msra.mxu2 %v3497_v61  ;;  %v2656_v61 = vld [vmem:[%s4349_s30 + $0x40] sm:$0xff] }
 0x2c0   :  { %1746 = vmatpush.msra.mxu2 %v3501_v0  ;;  %v3768_v0 = vld [vmem:[#allocation14] sm:$0xff] }
 0x2c2   :  { %v943_v14 = vpop.f32.mrf.mxu0  ;;  %1747 = vmatpush.msra.mxu2 %v3505_v1  ;;  %v883_v1 = vld [vmem:[#allocation2 + $0x48] sm:$0xff] }
 0x2c4   :  { %1748 = vmatpush.msra.mxu2 %v3509_v4  ;;  %v2659_v4 = vld [vmem:[%s4349_s30 + $0x48] sm:$0xff] }
 0x2c5   :  { %587 = vmatmul.f32.gmra.mxu2 %v2656_v61 }
 0x2ca   :  { %v946_v51 = vpop.f32.mrf.mxu0 }
 0x2cb   :  { %v947_v39 = vadd.f32 %v3614_v13, %v946_v51  ;;  %v941_v51 = vadd.f32 %v3614_v13, %v940_v34  ;;  %v935_v34 = vadd.f32 %v3614_v13, %v3610_v15  ;;  %v929_v15 = vadd.f32 %v3614_v13, %v3606_v6 }
 0x2cc   :  { %v923_v6 = vadd.f32 %v3614_v13, %v3602_v12  ;;  %v917_v12 = vadd.f32 %v3614_v13, %v3598_v44  ;;  %v911_v44 = vadd.f32 %v3614_v13, %v3594_v9 }
 0x2cd   :  { %v986_v54 = vmul.f32 0.2, %v947_v39  ;;  %vm970_vm3 = vcmp.ge.f32.partialorder %v947_v39, 0.0  ;;  %vm968_vm5 = vcmp.ge.f32.partialorder %v941_v51, 0.0  ;;  %v982_v31 = vmul.f32 0.2, %v935_v34  ;;  %590 = vmatmul.f32.gmra.mxu2 %v2659_v4 }
 0x2ce   :  { %vm966_vm7 = vcmp.ge.f32.partialorder %v935_v34, 0.0  ;;  %vm964_vm9 = vcmp.ge.f32.partialorder %v929_v15, 0.0  ;;  %v978_v41 = vmul.f32 0.2, %v923_v6  ;;  %vm962_vm11 = vcmp.ge.f32.partialorder %v923_v6, 0.0 }
 0x2cf   :  { %v1002_v27 = vsel %vm970_vm3, %v947_v39, %v986_v54  ;;  %v998_v36 = vsel %vm966_vm7, %v935_v34, %v982_v31  ;;  %vm960_vm13 = vcmp.ge.f32.partialorder %v917_v12, 0.0  ;;  %v3679_v34 = vld [vmem:[#allocation2 + $0x20] sm:$0xff]  ;;  %vm958_vm15 = vcmp.ge.f32.partialorder %v911_v44, 0.0  ;;  %v2660_v31 = vld [vmem:[%s4349_s30 + $0x50] sm:$0xff] }
 0x2d0   :  { %v994_v45 = vsel %vm962_vm11, %v923_v6, %v978_v41  ;;  %v887_v6 = vld [vmem:[#allocation2 + $0x68] sm:$0xff] }
 0x2d2   :  { %v949_v58 = vpop.f32.mrf.mxu0 }
 0x2d3   :  { %v950_v50 = vadd.f32 %v3614_v13, %v949_v58  ;;  %v944_v58 = vadd.f32 %v3614_v13, %v943_v14  ;;  %v938_v14 = vadd.f32 %v3614_v13, %v3612_v11  ;;  %v932_v11 = vadd.f32 %v3614_v13, %v3608_v2 }
 0x2d4   :  { %v926_v2 = vadd.f32 %v3614_v13, %v3604_v62  ;;  %v920_v62 = vadd.f32 %v3614_v13, %v3600_v18  ;;  %v914_v18 = vadd.f32 %v3614_v13, %v3596_v29 }
 0x2d5   :  { %vm971_vm2 = vcmp.ge.f32.partialorder %v950_v50, 0.0  ;;  %vm969_vm4 = vcmp.ge.f32.partialorder %v944_v58, 0.0  ;;  %vm967_vm6 = vcmp.ge.f32.partialorder %v938_v14, 0.0  ;;  %vm965_vm8 = vcmp.ge.f32.partialorder %v932_v11, 0.0  ;;  %593 = vmatmul.f32.gmra.mxu2 %v2660_v31 }
 0x2d6   :  { %vm963_vm10 = vcmp.ge.f32.partialorder %v926_v2, 0.0  ;;  %vm961_vm12 = vcmp.ge.f32.partialorder %v920_v62, 0.0  ;;  %v975_v24 = vmul.f32 0.2, %v914_v18  ;;  %vm959_vm14 = vcmp.ge.f32.partialorder %v914_v18, 0.0 }
 0x2d8   :  { %v991_v9 = vsel %vm959_vm14, %v914_v18, %v975_v24 }
 0x2da   :  { %v952_v10 = vpop.f32.mrf.mxu0 }
 0x2db   :  { %v953_v60 = vadd.f32 %v3614_v13, %v952_v10  ;;  %v3624_v10 = vld [vmem:[#allocation2] sm:$0xff] }
 0x2dc   :  { %1184 = vadd.xlane.f32.xlu1 %v3624_v10 }
 0x2dd   :  { %v988_v3 = vmul.f32 0.2, %v953_v60  ;;  %vm972_vm1 = vcmp.ge.f32.partialorder %v953_v60, 0.0 }
 0x2df   :  { %v1004_v23 = vsel %vm972_vm1, %v953_v60, %v988_v3  ;;  %v984_v60 = vmul.f32 0.2, %v941_v51  ;;  %v3645_v3 = vld [vmem:[#allocation2 + $0x10] sm:$0xff] }
 0x2e0   :  { %1188 = vadd.xlane.f32.xlu0 %v3645_v3 }
 0x2e1   :  { %v1000_v39 = vsel %vm968_vm5, %v941_v51, %v984_v60  ;;  %v979_v51 = vmul.f32 0.2, %v926_v2  ;;  %v3690_v60 = vld [vmem:[#allocation2 + $0x28] sm:$0xff] }
 0x2e2   :  { %v955_v25 = vpop.f32.mrf.mxu0 }
 0x2e3   :  { %v956_v5 = vadd.f32 %v3614_v13, %v955_v25  ;;  %v987_v25 = vmul.f32 0.2, %v950_v50 }
 0x2e4   :  { %1192 = vadd.xlane.f32.xlu1 %v3679_v34 }
 0x2e5   :  { %vm973_vm0 = vcmp.ge.f32.partialorder %v956_v5, 0.0  ;;  %v989_v7 = vmul.f32 0.2, %v956_v5 }
 0x2e7   :  { %v1005_v63 = vsel %vm973_vm0, %v956_v5, %v989_v7  ;;  %v1003_v5 = vsel %vm971_vm2, %v950_v50, %v987_v25  ;;  %v985_v7 = vmul.f32 0.2, %v944_v58  ;;  %v983_v50 = vmul.f32 0.2, %v938_v14 }
 0x2e8   :  { %1006 = vmatpush.msrb.mxu1 %v1005_v63  ;;  %v981_v63 = vmul.f32 0.2, %v932_v11  ;;  %v980_v25 = vmul.f32 0.2, %v929_v15  ;;  %1196 = vadd.xlane.f32.xlu0 %v880_v19 }
 0x2e9   :  { %v1001_v28 = vsel %vm969_vm4, %v944_v58, %v985_v7  ;;  %v999_v58 = vsel %vm967_vm6, %v938_v14, %v983_v50  ;;  %v995_v14 = vsel %vm963_vm10, %v926_v2, %v979_v51  ;;  %v976_v7 = vmul.f32 0.2, %v917_v12  ;;  %v3745_v50 = vld [vmem:[#allocation14 + $0x28] sm:$0xff]  ;;  %v885_v2 = vld [vmem:[#allocation2 + $0x58] sm:$0xff] }
 0x2ea   :  { %1007 = vmatpush.msrb.mxu1 %v1004_v23  ;;  %v997_v38 = vsel %vm965_vm8, %v932_v11, %v981_v63  ;;  %v3663_v23 = vld [vmem:[#allocation2 + $0x18] sm:$0xff]  ;;  %v996_v54 = vsel %vm964_vm9, %v929_v15, %v980_v25  ;;  %v3765_v15 = vld [vmem:[#allocation14 + $0x8] sm:$0xff]  ;;  %v886_v63 = vld [vmem:[#allocation2 + $0x60] sm:$0xff] }
 0x2eb   :  { %1190 = vadd.xlane.f32.xlu2 %v3663_v23  ;;  %v992_v47 = vsel %vm960_vm13, %v917_v12, %v976_v7  ;;  %v3718_v11 = vld [vmem:[#allocation14 + $0x50] sm:$0xff] }
 0x2ec   :  { %1008 = vmatpush.msrb.mxu1 %v1003_v5  ;;  %v977_v5 = vmul.f32 0.2, %v920_v62  ;;  %1198 = vadd.xlane.f32.xlu1 %v881_v35  ;;  %v888_v25 = vld [vmem:[#allocation2 + $0x70] sm:$0xff]  ;;  %v2665_v51 = vld [vmem:[%s4349_s30 + $0x78] sm:$0xff] }
 0x2ee   :  { %1009 = vmatpush.msrb.mxu1 %v1002_v27  ;;  %v993_v29 = vsel %vm961_vm12, %v920_v62, %v977_v5  ;;  %v974_v27 = vmul.f32 0.2, %v911_v44  ;;  %v2664_v62 = vld [vmem:[%s4349_s30 + $0x70] sm:$0xff] }
 0x2f0   :  { %1010 = vmatpush.msrb.mxu1 %v1001_v28  ;;  %v990_v53 = vsel %vm958_vm15, %v911_v44, %v974_v27  ;;  %v3738_v28 = vld [vmem:[#allocation14 + $0x30] sm:$0xff]  ;;  %1202 = vadd.xlane.f32.xlu0 %v883_v1 }
 0x2f2   :  { %1011 = vmatpush.msrb.mxu1 %v1000_v39  ;;  %v884_v39 = vld [vmem:[#allocation2 + $0x50] sm:$0xff] }
 0x2f3   :  { %1194 = vadd.xlane.f32.xlu2 %v3690_v60 }
 0x2f4   :  { %1012 = vmatpush.msrb.mxu1 %v999_v58  ;;  %1204 = vadd.xlane.f32.xlu1 %v884_v39  ;;  %v2661_v58 = vld [vmem:[%s4349_s30 + $0x58] sm:$0xff] }
 0x2f5   :  { %596 = vmatmul.f32.gmra.mxu2 %v2661_v58 }
 0x2f6   :  { %1013 = vmatpush.msrb.mxu1 %v998_v36  ;;  %v2663_v36 = vld [vmem:[%s4349_s30 + $0x68] sm:$0xff] }
 0x2f8   :  { %1014 = vmatpush.msrb.mxu1 %v997_v38  ;;  %1208 = vadd.xlane.f32.xlu0 %v886_v63  ;;  %v889_v38 = vld [vmem:[#allocation2 + $0x78] sm:$0xff] }
 0x2fa   :  { %1015 = vmatpush.msrb.mxu1 %v996_v54 }
 0x2fb   :  { %1200 = vadd.xlane.f32.xlu2 %v882_v52 }
 0x2fc   :  { %1016 = vmatpush.msrb.mxu1 %v995_v14  ;;  %1210 = vadd.xlane.f32.xlu1 %v887_v6 }
 0x2fd   :  { %599 = vmatmul.f32.gmra.mxu2 %v2662_v32 }
 0x2fe   :  { %1017 = vmatpush.msrb.mxu1 %v994_v45 }
 0x300   :  { %1018 = vmatpush.msrb.mxu1 %v993_v29  ;;  %1214 = vadd.xlane.f32.xlu0 %v889_v38 }
 0x302   :  { %1019 = vmatpush.msrb.mxu1 %v992_v47 }
 0x303   :  { %1206 = vadd.xlane.f32.xlu2 %v885_v2 }
 0x304   :  { %1020 = vmatpush.msrb.mxu1 %v991_v9 }
 0x305   :  { %602 = vmatmul.f32.gmra.mxu2 %v2663_v36 }
 0x306   :  { %1021 = vmatpush.msrb.mxu1 %v990_v53 }
 0x307   :  { %1022 = vmatmul.f32.vlgmr.msrb.gmra.mxu1 %v3624_v10  ;;  %v3709_v10 = vld [vmem:[#allocation14 + $0x60] sm:$0xff] }
 0x308   :  { %1491 = vmatpush.msra.mxu1 %v3694_v55 }
 0x30a   :  { %1492 = vmatpush.msra.mxu1 %v3698_v57 }
 0x30b   :  { %1212 = vadd.xlane.f32.xlu2 %v888_v25 }
 0x30c   :  { %1493 = vmatpush.msra.mxu1 %v3705_v17 }
 0x30d   :  { %605 = vmatmul.f32.gmra.mxu2 %v2664_v62 }
 0x30e   :  { %1494 = vmatpush.msra.mxu1 %v3709_v10 }
 0x30f   :  { %1025 = vmatmul.f32.gmra.mxu1 %v3627_v43  ;;  %v3725_v43 = vld [vmem:[#allocation14 + $0x48] sm:$0xff] }
 0x310   :  { %1495 = vmatpush.msra.mxu1 %v3714_v20 }
 0x312   :  { %1496 = vmatpush.msra.mxu1 %v3718_v11 }
 0x314   :  { %1497 = vmatpush.msra.mxu1 %v3725_v43 }
 0x315   :  { %608 = vmatmul.f32.gmra.mxu2 %v2665_v51 }
 0x316   :  { %1498 = vmatpush.msra.mxu1 %v3729_v33 }
 0x317   :  { %1028 = vmatmul.f32.gmra.mxu1 %v3645_v3  ;;  %v3758_v3 = vld [vmem:[#allocation14 + $0x10] sm:$0xff] }
 0x318   :  { %1499 = vmatpush.msra.mxu1 %v3734_v37 }
 0x31a   :  { %1500 = vmatpush.msra.mxu1 %v3738_v28 }
 0x31c   :  { %1501 = vmatpush.msra.mxu1 %v3745_v50 }
 0x31e   :  { %1502 = vmatpush.msra.mxu1 %v3749_v46 }
 0x31f   :  { %1031 = vmatmul.f32.gmra.mxu1 %v3663_v23  ;;  %v3794_v23 = vpop.f32.mrf.mxu2 }
 0x320   :  { %1503 = vmatpush.msra.mxu1 %v3754_v56  ;;  %4378 = vst [vmem:[#allocation62_spill] sm:$0xff] %v3794_v23 }
 0x322   :  { %1504 = vmatpush.msra.mxu1 %v3758_v3 }
 0x324   :  { %1505 = vmatpush.msra.mxu1 %v3765_v15 }
 0x326   :  { %1506 = vmatpush.msra.mxu1 %v3768_v0 }
 0x327   :  { %1034 = vmatmul.f32.gmra.mxu1 %v3679_v34  ;;  %v3796_v12 = vpop.f32.mrf.mxu2 }
 0x328   :  { %4379 = vst [vmem:[#allocation63_spill] sm:$0xff] %v3796_v12 }
 0x32f   :  { %1037 = vmatmul.f32.gmra.mxu1 %v3690_v60  ;;  %v3798_v54 = vpop.f32.mrf.mxu2 }
 0x330   :  { %4380 = vst [vmem:[#allocation64_spill] sm:$0xff] %v3798_v54 }
 0x337   :  { %1040 = vmatmul.f32.gmra.mxu1 %v880_v19  ;;  %v3800_v18 = vpop.f32.mrf.mxu2 }
 0x338   :  { %4381 = vst [vmem:[#allocation65_spill] sm:$0xff] %v3800_v18  ;;  %v4414_v18 = vld [vmem:[#allocation43_spill] sm:$0xff] }
 0x33f   :  { %1043 = vmatmul.f32.gmra.mxu1 %v881_v35  ;;  %v3802_v5 = vpop.f32.mrf.mxu2 }
 0x340   :  { %4382 = vst [vmem:[#allocation66_spill] sm:$0xff] %v3802_v5 }
 0x347   :  { %1046 = vmatmul.f32.gmra.mxu1 %v882_v52  ;;  %v3804_v44 = vpop.f32.mrf.mxu2 }
 0x348   :  { %4383 = vst [vmem:[#allocation67_spill] sm:$0xff] %v3804_v44 }
 0x34f   :  { %1049 = vmatmul.f32.gmra.mxu1 %v883_v1  ;;  %v3806_v29 = vpop.f32.mrf.mxu2  ;;  %v1185_v32 = vpop.xlane.xlu1 %1184 }
 0x350   :  { %4384 = vst [vmem:[#allocation68_spill] sm:$0xff] %v3806_v29  ;;  %vm1216_vm1 = vcmp.gt.f32.partialorder %v1185_v32, 0.0 }
 0x357   :  { %1052 = vmatmul.f32.gmra.mxu1 %v884_v39  ;;  %v3808_v34 = vpop.f32.mrf.mxu2 }
 0x358   :  { %4385 = vst [vmem:[#allocation69_spill] sm:$0xff] %v3808_v34 }
 0x35f   :  { %1055 = vmatmul.f32.gmra.mxu1 %v885_v2  ;;  %v3810_v27 = vpop.f32.mrf.mxu2 }
 0x360   :  { %4386 = vst [vmem:[#allocation70_spill] sm:$0xff] %v3810_v27 }
 0x367   :  { %1058 = vmatmul.f32.gmra.mxu1 %v886_v63  ;;  %v3812_v49 = vpop.f32.mrf.mxu2 }
 0x368   :  { %4387 = vst [vmem:[#allocation71_spill] sm:$0xff] %v3812_v49 }
 0x36f   :  { %1061 = vmatmul.f32.gmra.mxu1 %v887_v6  ;;  %v3814_v48 = vpop.f32.mrf.mxu2 }
 0x370   :  { %4388 = vst [vmem:[#allocation72_spill] sm:$0xff] %v3814_v48 }
 0x377   :  { %1064 = vmatmul.f32.gmra.mxu1 %v888_v25 }
 0x378   :  { %v3816_v26 = vpop.f32.mrf.mxu2 }
 0x379   :  { %4389 = vst [vmem:[#allocation73_spill] sm:$0xff] %v3816_v26 }
 0x37f   :  { %1067 = vmatmul.f32.gmra.mxu1 %v889_v38 }
 0x380   :  { %v3818_v40 = vpop.f32.mrf.mxu2 }
 0x381   :  { %4390 = vst [vmem:[#allocation74_spill] sm:$0xff] %v3818_v40 }
 0x384   :  { %v1023_v41 = vpop.f32.mrf.mxu1 }
 0x385   :  { %1087 = vmatmul.f32.vlgmr.msrb.gmra.mxu2 %v1023_v41  ;;  %v1187_v41 = vpop.xlane.xlu2 %1186 }
 0x386   :  { %vm1217_vm3 = vcmp.gt.f32.partialorder %v1187_v41, 0.0 }
 0x388   :  { %v3820_v61 = vpop.f32.mrf.mxu2 }
 0x389   :  { %4391 = vst [vmem:[#allocation75_spill] sm:$0xff] %v3820_v61 }
 0x38c   :  { %v1026_v14 = vpop.f32.mrf.mxu1 }
 0x38d   :  { %1090 = vmatmul.f32.gmra.mxu2 %v1026_v14 }
 0x390   :  { %v3822_v39 = vpop.f32.mrf.mxu2 }
 0x391   :  { %4392 = vst [vmem:[#allocation76_spill] sm:$0xff] %v3822_v39 }
 0x394   :  { %v1029_v42 = vpop.f32.mrf.mxu1 }
 0x395   :  { %1093 = vmatmul.f32.gmra.mxu2 %v1029_v42 }
 0x398   :  { %v3824_v2 = vpop.f32.mrf.mxu2 }
 0x399   :  { %4393 = vst [vmem:[#allocation77_spill] sm:$0xff] %v3824_v2  ;;  %v4427_v2 = vld [vmem:[#allocation61_spill] sm:$0xff] }
 0x39c   :  { %v1032_v45 = vpop.f32.mrf.mxu1 }
 0x39d   :  { %1096 = vmatmul.f32.gmra.mxu2 %v1032_v45 }
 0x3a4   :  { %v1035_v7 = vpop.f32.mrf.mxu1 }
 0x3a5   :  { %1099 = vmatmul.f32.gmra.mxu2 %v1035_v7 }
 0x3ac   :  { %v1038_v24 = vpop.f32.mrf.mxu1 }
 0x3ad   :  { %1102 = vmatmul.f32.gmra.mxu2 %v1038_v24 }
 0x3b4   :  { %v1041_v47 = vpop.f32.mrf.mxu1 }
 0x3b5   :  { %1105 = vmatmul.f32.gmra.mxu2 %v1041_v47 }
 0x3bc   :  { %v1044_v9 = vpop.f32.mrf.mxu1 }
 0x3bd   :  { %1108 = vmatmul.f32.gmra.mxu2 %v1044_v9 }
 0x3c4   :  { %v1047_v53 = vpop.f32.mrf.mxu1 }
 0x3c5   :  { %1111 = vmatmul.f32.gmra.mxu2 %v1047_v53 }
 0x3cc   :  { %v1050_v60 = vpop.f32.mrf.mxu1 }
 0x3cd   :  { %1114 = vmatmul.f32.gmra.mxu2 %v1050_v60 }
 0x3d4   :  { %v1053_v19 = vpop.f32.mrf.mxu1 }
 0x3d5   :  { %1117 = vmatmul.f32.gmra.mxu2 %v1053_v19 }
 0x3dc   :  { %v1056_v35 = vpop.f32.mrf.mxu1 }
 0x3dd   :  { %1120 = vmatmul.f32.gmra.mxu2 %v1056_v35  ;;  %v4394_v35 = vld [vmem:[#allocation48_spill] sm:$0xff] }
 0x3e4   :  { %v1059_v52 = vpop.f32.mrf.mxu1 }
 0x3e5   :  { %1123 = vmatmul.f32.gmra.mxu2 %v1059_v52 }
 0x3ec   :  { %v1062_v1 = vpop.f32.mrf.mxu1 }
 0x3ed   :  { %1126 = vmatmul.f32.gmra.mxu2 %v1062_v1 }
 0x3f4   :  { %v1065_v4 = vpop.f32.mrf.mxu1 }
 0x3f5   :  { %1129 = vmatmul.f32.gmra.mxu2 %v1065_v4 }
 0x3fc   :  { %v1068_v31 = vpop.f32.mrf.mxu1 }
 0x3fd   :  { %1132 = vmatmul.f32.gmra.mxu2 %v1068_v31 }
 0x408   :  { %v1088_v58 = vpop.f32.mrf.mxu2 }
 0x409   :  { %v1089_v63 = vadd.f32 %v3528_v22, %v1088_v58  ;;  %v4395_v58 = vld [vmem:[#allocation35_spill] sm:$0xff] }
 0x40b   :  { %vm1136_vm0 = vcmp.ge.f32.partialorder %v1089_v63, 0.0  ;;  %v1152_v6 = vmul.f32 0.2, %v1089_v63 }
 0x40d   :  { %v1168_v36 = vsel %vm1136_vm0, %v1089_v63, %v1152_v6  ;;  %v4396_v6 = vld [vmem:[#allocation49_spill] sm:$0xff] }
 0x40e   :  { %v1232_v25 = vadd.f32 %v1168_v36, %v3380_v16 }
 0x410   :  { %v1091_v62 = vpop.f32.mrf.mxu2  ;;  %v3829_v38 = vsel %vm1216_vm1, %v1232_v25, %v3531_v59  ;;  %v1189_v59 = vpop.xlane.xlu0 %1188 }
 0x411   :  { %v1092_v51 = vadd.f32 %v3528_v22, %v1091_v62  ;;  %1329 = vmatmul.f32.vlgmr.msrb.gmra.mxu3 %v3829_v38  ;;  %vm1218_vm5 = vcmp.gt.f32.partialorder %v1189_v59, 0.0  ;;  %v1193_v62 = vpop.xlane.xlu1 %1192 }
 0x412   :  { %vm1220_vm9 = vcmp.gt.f32.partialorder %v1193_v62, 0.0 }
 0x413   :  { %vm1137_vm2 = vcmp.ge.f32.partialorder %v1092_v51, 0.0  ;;  %v1153_v14 = vmul.f32 0.2, %v1092_v51 }
 0x415   :  { %v1169_v42 = vsel %vm1137_vm2, %v1092_v51, %v1153_v14  ;;  %v4397_v14 = vld [vmem:[#allocation36_spill] sm:$0xff] }
 0x416   :  { %v1233_v45 = vadd.f32 %v1169_v42, %v3387_v21 }
 0x418   :  { %v1094_v7 = vpop.f32.mrf.mxu2  ;;  %v3835_v24 = vsel %vm1217_vm3, %v1233_v45, %v3535_v8  ;;  %v1191_v8 = vpop.xlane.xlu2 %1190 }
 0x419   :  { %v1095_v47 = vadd.f32 %v3528_v22, %v1094_v7  ;;  %1332 = vmatmul.f32.gmra.mxu3 %v3835_v24  ;;  %vm1219_vm7 = vcmp.gt.f32.partialorder %v1191_v8, 0.0  ;;  %v4398_v7 = vld [vmem:[#allocation50_spill] sm:$0xff]  ;;  %v4400_v8 = vld [vmem:[#allocation51_spill] sm:$0xff] }
 0x41b   :  { %vm1138_vm4 = vcmp.ge.f32.partialorder %v1095_v47, 0.0  ;;  %v1154_v9 = vmul.f32 0.2, %v1095_v47 }
 0x41d   :  { %v1170_v53 = vsel %vm1138_vm4, %v1095_v47, %v1154_v9 }
 0x41e   :  { %v1234_v60 = vadd.f32 %v1170_v53, %v3394_v30 }
 0x420   :  { %v1097_v19 = vpop.f32.mrf.mxu2  ;;  %v3841_v52 = vsel %vm1218_vm5, %v1234_v60, %v4394_v35  ;;  %v1195_v9 = vpop.xlane.xlu2 %1194 }
 0x421   :  { %v1098_v1 = vadd.f32 %v3528_v22, %v1097_v19  ;;  %1335 = vmatmul.f32.gmra.mxu3 %v3841_v52  ;;  %vm1221_vm11 = vcmp.gt.f32.partialorder %v1195_v9, 0.0  ;;  %v4399_v19 = vld [vmem:[#allocation37_spill] sm:$0xff] }
 0x423   :  { %vm1139_vm6 = vcmp.ge.f32.partialorder %v1098_v1, 0.0  ;;  %v1155_v4 = vmul.f32 0.2, %v1098_v1 }
 0x425   :  { %v1171_v31 = vsel %vm1139_vm6, %v1098_v1, %v1155_v4 }
 0x426   :  { %v1235_v63 = vadd.f32 %v1171_v31, %v4395_v58 }
 0x428   :  { %v1100_v32 = vpop.f32.mrf.mxu2  ;;  %v3847_v36 = vsel %vm1219_vm7, %v1235_v63, %v4396_v6  ;;  %v1197_v63 = vpop.xlane.xlu0 %1196 }
 0x429   :  { %v1101_v25 = vadd.f32 %v3528_v22, %v1100_v32  ;;  %1338 = vmatmul.f32.gmra.mxu3 %v3847_v36  ;;  %vm1222_vm13 = vcmp.gt.f32.partialorder %v1197_v63, 0.0  ;;  %v1201_v63 = vpop.xlane.xlu2 %1200 }
 0x42a   :  { %vm1224_vm1 = vcmp.gt.f32.partialorder %v1201_v63, 0.0 }
 0x42b   :  { %vm1140_vm8 = vcmp.ge.f32.partialorder %v1101_v25, 0.0  ;;  %v1156_v51 = vmul.f32 0.2, %v1101_v25 }
 0x42d   :  { %v1172_v41 = vsel %vm1140_vm8, %v1101_v25, %v1156_v51  ;;  %v4401_v25 = vld [vmem:[#allocation38_spill] sm:$0xff] }
 0x42e   :  { %v1236_v42 = vadd.f32 %v1172_v41, %v4397_v14  ;;  %v4402_v41 = vld [vmem:[#allocation52_spill] sm:$0xff] }
 0x430   :  { %v1103_v45 = vpop.f32.mrf.mxu2  ;;  %v3853_v47 = vsel %vm1220_vm9, %v1236_v42, %v4398_v7  ;;  %v1199_v7 = vpop.xlane.xlu1 %1198 }
 0x431   :  { %v1104_v59 = vadd.f32 %v3528_v22, %v1103_v45  ;;  %1341 = vmatmul.f32.gmra.mxu3 %v3853_v47  ;;  %vm1223_vm15 = vcmp.gt.f32.partialorder %v1199_v7, 0.0  ;;  %v4406_v7 = vld [vmem:[#allocation54_spill] sm:$0xff] }
 0x433   :  { %vm1141_vm10 = vcmp.ge.f32.partialorder %v1104_v59, 0.0  ;;  %v1157_v53 = vmul.f32 0.2, %v1104_v59 }
 0x435   :  { %v1173_v60 = vsel %vm1141_vm10, %v1104_v59, %v1157_v53  ;;  %v4403_v53 = vld [vmem:[#allocation39_spill] sm:$0xff] }
 0x436   :  { %v1237_v35 = vadd.f32 %v1173_v60, %v4399_v19 }
 0x438   :  { %v1106_v1 = vpop.f32.mrf.mxu2  ;;  %v3859_v4 = vsel %vm1221_vm11, %v1237_v35, %v4400_v8 }
 0x439   :  { %v1107_v31 = vadd.f32 %v3528_v22, %v1106_v1  ;;  %1344 = vmatmul.f32.gmra.mxu3 %v3859_v4  ;;  %v4404_v1 = vld [vmem:[#allocation53_spill] sm:$0xff] }
 0x43b   :  { %vm1142_vm12 = vcmp.ge.f32.partialorder %v1107_v31, 0.0  ;;  %v1158_v32 = vmul.f32 0.2, %v1107_v31 }
 0x43d   :  { %v1174_v6 = vsel %vm1142_vm12, %v1107_v31, %v1158_v32 }
 0x43e   :  { %v1238_v62 = vadd.f32 %v1174_v6, %v4401_v25 }
 0x440   :  { %v1109_v51 = vpop.f32.mrf.mxu2  ;;  %v3865_v42 = vsel %vm1222_vm13, %v1238_v62, %v4402_v41  ;;  %v4405_v62 = vld [vmem:[#allocation40_spill] sm:$0xff] }
 0x441   :  { %v1110_v45 = vadd.f32 %v3528_v22, %v1109_v51  ;;  %1347 = vmatmul.f32.gmra.mxu3 %v3865_v42 }
 0x443   :  { %vm1143_vm14 = vcmp.ge.f32.partialorder %v1110_v45, 0.0  ;;  %v1159_v59 = vmul.f32 0.2, %v1110_v45 }
 0x445   :  { %v1175_v9 = vsel %vm1143_vm14, %v1110_v45, %v1159_v59 }
 0x446   :  { %v1239_v60 = vadd.f32 %v1175_v9, %v4403_v53  ;;  %v1203_v9 = vpop.xlane.xlu0 %1202 }
 0x447   :  { %vm1225_vm3 = vcmp.gt.f32.partialorder %v1203_v9, 0.0 }
 0x448   :  { %v1112_v35 = vpop.f32.mrf.mxu2  ;;  %v3871_v8 = vsel %vm1223_vm15, %v1239_v60, %v4404_v1  ;;  %v4408_v1 = vld [vmem:[#allocation41_spill] sm:$0xff] }
 0x449   :  { %v1113_v31 = vadd.f32 %v3528_v22, %v1112_v35  ;;  %1350 = vmatmul.f32.gmra.mxu3 %v3871_v8 }
 0x44b   :  { %vm1144_vm0 = vcmp.ge.f32.partialorder %v1113_v31, 0.0  ;;  %v1160_v32 = vmul.f32 0.2, %v1113_v31 }
 0x44d   :  { %v1176_v6 = vsel %vm1144_vm0, %v1113_v31, %v1160_v32  ;;  %v4409_v31 = vld [vmem:[#allocation55_spill] sm:$0xff]  ;;  %v3888_v32 = vld [vmem:[%s4280_s10] ss:$0 sm:$0xff] }
 0x44e   :  { %v1240_v51 = vadd.f32 %v1176_v6, %v4405_v62  ;;  %v1205_v6 = vpop.xlane.xlu1 %1204 }
 0x44f   :  { %vm1226_vm5 = vcmp.gt.f32.partialorder %v1205_v6, 0.0 }
 0x450   :  { %v1115_v41 = vpop.f32.mrf.mxu2  ;;  %v3877_v45 = vsel %vm1224_vm1, %v1240_v51, %v4406_v7  ;;  %v4411_v7 = vld [vmem:[#allocation42_spill] sm:$0xff] }
 0x451   :  { %4407 = vst [vmem:[#allocation48_spill] sm:$0xff] %v3877_v45  ;;  %v1116_v59 = vadd.f32 %v3528_v22, %v1115_v41  ;;  %1353 = vmatmul.f32.gmra.mxu3 %v3877_v45 }
 0x453   :  { %vm1145_vm2 = vcmp.ge.f32.partialorder %v1116_v59, 0.0  ;;  %v1161_v60 = vmul.f32 0.2, %v1116_v59 }
 0x455   :  { %v1177_v35 = vsel %vm1145_vm2, %v1116_v59, %v1161_v60  ;;  %v4412_v60 = vld [vmem:[#allocation56_spill] sm:$0xff] }
 0x456   :  { %v1241_v23 = vadd.f32 %v1177_v35, %v4408_v1 }
 0x458   :  { %v1118_v12 = vpop.f32.mrf.mxu2  ;;  %v3883_v63 = vsel %vm1225_vm3, %v1241_v23, %v4409_v31  ;;  %v1207_v31 = vpop.xlane.xlu2 %1206 }
 0x459   :  { %4410 = vst [vmem:[#allocation35_spill] sm:$0xff] %v3883_v63  ;;  %v1119_v22 = vadd.f32 %v3888_v32, %v1118_v12  ;;  %1356 = vmatmul.f32.gmra.mxu3 %v3883_v63  ;;  %vm1227_vm7 = vcmp.gt.f32.partialorder %v1207_v31, 0.0  ;;  %v3942_v63 = vld [vmem:[#allocation2 + $0x88] sm:$0xff] }
 0x45a   :  { %1606 = vadd.xlane.f32.xlu2 %v3942_v63 }
 0x45b   :  { %vm1146_vm4 = vcmp.ge.f32.partialorder %v1119_v22, 0.0  ;;  %v1162_v51 = vmul.f32 0.2, %v1119_v22 }
 0x45d   :  { %v1178_v41 = vsel %vm1146_vm4, %v1119_v22, %v1162_v51  ;;  %v4415_v22 = vld [vmem:[#allocation57_spill] sm:$0xff] }
 0x45e   :  { %v1242_v59 = vadd.f32 %v1178_v41, %v4411_v7  ;;  %v1209_v41 = vpop.xlane.xlu0 %1208 }
 0x45f   :  { %vm1228_vm9 = vcmp.gt.f32.partialorder %v1209_v41, 0.0 }
 0x460   :  { %v1121_v9 = vpop.f32.mrf.mxu2  ;;  %v3894_v23 = vsel %vm1226_vm5, %v1242_v59, %v4412_v60  ;;  %v4417_v60 = vld [vmem:[#allocation44_spill] sm:$0xff] }
 0x461   :  { %4413 = vst [vmem:[#allocation49_spill] sm:$0xff] %v3894_v23  ;;  %v1122_v35 = vadd.f32 %v3888_v32, %v1121_v9  ;;  %1359 = vmatmul.f32.gmra.mxu3 %v3894_v23 }
 0x463   :  { %vm1147_vm6 = vcmp.ge.f32.partialorder %v1122_v35, 0.0  ;;  %v1163_v12 = vmul.f32 0.2, %v1122_v35 }
 0x465   :  { %v1179_v54 = vsel %vm1147_vm6, %v1122_v35, %v1163_v12  ;;  %v4418_v35 = vld [vmem:[#allocation58_spill] sm:$0xff] }
 0x466   :  { %v1243_v5 = vadd.f32 %v1179_v54, %v4414_v18 }
 0x468   :  { %v1124_v44 = vpop.f32.mrf.mxu2  ;;  %v3900_v6 = vsel %vm1227_vm7, %v1243_v5, %v4415_v22  ;;  %v1211_v5 = vpop.xlane.xlu1 %1210  ;;  %v4420_v22 = vld [vmem:[#allocation45_spill] sm:$0xff] }
 0x469   :  { %4416 = vst [vmem:[#allocation36_spill] sm:$0xff] %v3900_v6  ;;  %v1125_v51 = vadd.f32 %v3888_v32, %v1124_v44  ;;  %1362 = vmatmul.f32.gmra.mxu3 %v3900_v6  ;;  %vm1229_vm11 = vcmp.gt.f32.partialorder %v1211_v5, 0.0  ;;  %v3939_v6 = vld [vmem:[#allocation2 + $0x80] sm:$0xff] }
 0x46a   :  { %1604 = vadd.xlane.f32.xlu1 %v3939_v6 }
 0x46b   :  { %vm1148_vm8 = vcmp.ge.f32.partialorder %v1125_v51, 0.0  ;;  %v1164_v59 = vmul.f32 0.2, %v1125_v51 }
 0x46d   :  { %v1180_v9 = vsel %vm1148_vm8, %v1125_v51, %v1164_v59  ;;  %v4421_v51 = vld [vmem:[#allocation59_spill] sm:$0xff] }
 0x46e   :  { %v1244_v29 = vadd.f32 %v1180_v9, %v4417_v60 }
 0x470   :  { %v1127_v34 = vpop.f32.mrf.mxu2  ;;  %v3906_v31 = vsel %vm1228_vm9, %v1244_v29, %v4418_v35  ;;  %v1213_v29 = vpop.xlane.xlu2 %1212  ;;  %v4423_v35 = vld [vmem:[#allocation46_spill] sm:$0xff] }
 0x471   :  { %4419 = vst [vmem:[#allocation50_spill] sm:$0xff] %v3906_v31  ;;  %v1128_v54 = vadd.f32 %v3888_v32, %v1127_v34  ;;  %1365 = vmatmul.f32.gmra.mxu3 %v3906_v31  ;;  %vm1230_vm13 = vcmp.gt.f32.partialorder %v1213_v29, 0.0 }
 0x473   :  { %vm1149_vm10 = vcmp.ge.f32.partialorder %v1128_v54, 0.0  ;;  %v1165_v44 = vmul.f32 0.2, %v1128_v54 }
 0x475   :  { %v1181_v12 = vsel %vm1149_vm10, %v1128_v54, %v1165_v44  ;;  %v4424_v54 = vld [vmem:[#allocation60_spill] sm:$0xff] }
 0x476   :  { %v1245_v27 = vadd.f32 %v1181_v12, %v4420_v22 }
 0x478   :  { %v1130_v49 = vpop.f32.mrf.mxu2  ;;  %v3912_v41 = vsel %vm1229_vm11, %v1245_v27, %v4421_v51  ;;  %v1215_v27 = vpop.xlane.xlu0 %1214  ;;  %v4426_v51 = vld [vmem:[#allocation47_spill] sm:$0xff] }
 0x479   :  { %4422 = vst [vmem:[#allocation37_spill] sm:$0xff] %v3912_v41  ;;  %v1131_v59 = vadd.f32 %v3888_v32, %v1130_v49  ;;  %1368 = vmatmul.f32.gmra.mxu3 %v3912_v41  ;;  %vm1231_vm15 = vcmp.gt.f32.partialorder %v1215_v27, 0.0 }
 0x47b   :  { %vm1150_vm12 = vcmp.ge.f32.partialorder %v1131_v59, 0.0  ;;  %v1166_v34 = vmul.f32 0.2, %v1131_v59 }
 0x47d   :  { %v1182_v9 = vsel %vm1150_vm12, %v1131_v59, %v1166_v34 }
 0x47e   :  { %v1246_v48 = vadd.f32 %v1182_v9, %v4423_v35 }
 0x480   :  { %v1133_v26 = vpop.f32.mrf.mxu2  ;;  %v3918_v5 = vsel %vm1230_vm13, %v1246_v48, %v4424_v54 }
 0x481   :  { %4425 = vst [vmem:[#allocation51_spill] sm:$0xff] %v3918_v5  ;;  %v1134_v44 = vadd.f32 %v3888_v32, %v1133_v26  ;;  %1371 = vmatmul.f32.gmra.mxu3 %v3918_v5 }
 0x483   :  { %vm1151_vm14 = vcmp.ge.f32.partialorder %v1134_v44, 0.0  ;;  %v1167_v49 = vmul.f32 0.2, %v1134_v44 }
 0x485   :  { %v1183_v12 = vsel %vm1151_vm14, %v1134_v44, %v1167_v49 }
 0x486   :  { %v1247_v40 = vadd.f32 %v1183_v12, %v4426_v51 }
 0x488   :  { %v3924_v59 = vsel %vm1231_vm15, %v1247_v40, %v4427_v2 }
 0x489   :  { %4428 = vst [vmem:[#allocation38_spill] sm:$0xff] %v3924_v59  ;;  %1374 = vmatmul.f32.gmra.mxu3 %v3924_v59 }
 0x494   :  { %v3927_v29 = vpop.f32.mrf.mxu3 }
 0x49c   :  { %v3929_v48 = vpop.f32.mrf.mxu3 }
 0x4a4   :  { %v3931_v34 = vpop.f32.mrf.mxu3 }
 0x4ac   :  { %v3933_v26 = vpop.f32.mrf.mxu3 }
 0x4b4   :  { %v1342_v9 = vpop.f32.mrf.mxu3 }
 0x4bc   :  { %v1345_v54 = vpop.f32.mrf.mxu3 }
 0x4c4   :  { %v1348_v61 = vpop.f32.mrf.mxu3 }
 0x4cc   :  { %v1351_v44 = vpop.f32.mrf.mxu3 }
 0x4d4   :  { %v1354_v27 = vpop.f32.mrf.mxu3 }
 0x4dc   :  { %v1357_v49 = vpop.f32.mrf.mxu3 }
 0x4e4   :  { %v1360_v12 = vpop.f32.mrf.mxu3 }
 0x4ec   :  { %v1363_v39 = vpop.f32.mrf.mxu3 }
 0x4ed   :  { %v1364_v18 = vadd.f32 %v3614_v13, %v1363_v39 }
 0x4ef   :  { %v1405_v39 = vmul.f32 0.2, %v1364_v18  ;;  %vm1389_vm4 = vcmp.ge.f32.partialorder %v1364_v18, 0.0 }
 0x4f1   :  { %v1421_v62 = vsel %vm1389_vm4, %v1364_v18, %v1405_v39  ;;  %v1343_v18 = vadd.f32 %v3614_v13, %v1342_v9  ;;  %v1334_v9 = vadd.f32 %v3614_v13, %v3929_v48 }
 0x4f3   :  { %vm1382_vm11 = vcmp.ge.f32.partialorder %v1343_v18, 0.0  ;;  %vm1379_vm14 = vcmp.ge.f32.partialorder %v1334_v9, 0.0 }
 0x4f4   :  { %v1366_v40 = vpop.f32.mrf.mxu3 }
 0x4f5   :  { %v1367_v22 = vadd.f32 %v3614_v13, %v1366_v40 }
 0x4f7   :  { %v1406_v40 = vmul.f32 0.2, %v1367_v22  ;;  %vm1390_vm3 = vcmp.ge.f32.partialorder %v1367_v22, 0.0 }
 0x4fc   :  { %v1369_v2 = vpop.f32.mrf.mxu3 }
 0x4fd   :  { %v1370_v35 = vadd.f32 %v3614_v13, %v1369_v2  ;;  %v1358_v2 = vadd.f32 %v3614_v13, %v1357_v49 }
 0x4ff   :  { %v1407_v7 = vmul.f32 0.2, %v1370_v35  ;;  %vm1391_vm2 = vcmp.ge.f32.partialorder %v1370_v35, 0.0  ;;  %vm1387_vm6 = vcmp.ge.f32.partialorder %v1358_v2, 0.0 }
 0x501   :  { %v1423_v1 = vsel %vm1391_vm2, %v1370_v35, %v1407_v7  ;;  %v1349_v7 = vadd.f32 %v3614_v13, %v1348_v61 }
 0x503   :  { %v1400_v49 = vmul.f32 0.2, %v1349_v7  ;;  %vm1384_vm9 = vcmp.ge.f32.partialorder %v1349_v7, 0.0 }
 0x504   :  { %v1372_v51 = vpop.f32.mrf.mxu3 }
 0x505   :  { %v1373_v59 = vadd.f32 %v3614_v13, %v1372_v51 }
 0x507   :  { %v1408_v60 = vmul.f32 0.2, %v1373_v59  ;;  %vm1392_vm1 = vcmp.ge.f32.partialorder %v1373_v59, 0.0 }
 0x509   :  { %v1424_v51 = vsel %vm1392_vm1, %v1373_v59, %v1408_v60  ;;  %v3950_v60 = vld [vmem:[#allocation2 + $0x90] sm:$0xff] }
 0x50a   :  { %1608 = vadd.xlane.f32.xlu0 %v3950_v60 }
 0x50c   :  { %v1375_v5 = vpop.f32.mrf.mxu3 }
 0x50d   :  { %v1376_v41 = vadd.f32 %v3614_v13, %v1375_v5  ;;  %v1361_v5 = vadd.f32 %v3614_v13, %v1360_v12  ;;  %v1403_v12 = vmul.f32 0.2, %v1358_v2 }
 0x50f   :  { %v1409_v31 = vmul.f32 0.2, %v1376_v41  ;;  %vm1393_vm0 = vcmp.ge.f32.partialorder %v1376_v41, 0.0  ;;  %v1404_v45 = vmul.f32 0.2, %v1361_v5  ;;  %vm1388_vm5 = vcmp.ge.f32.partialorder %v1361_v5, 0.0 }
 0x510   :  { %v1419_v59 = vsel %vm1387_vm6, %v1358_v2, %v1403_v12  ;;  %v1301_v12 = vld [vmem:[#allocation2 + $0xa0] sm:$0xff] }
 0x511   :  { %v1425_v23 = vsel %vm1393_vm0, %v1376_v41, %v1409_v31  ;;  %v1355_v31 = vadd.f32 %v3614_v13, %v1354_v27  ;;  %v1422_v41 = vsel %vm1390_vm3, %v1367_v22, %v1406_v40  ;;  %v1346_v22 = vadd.f32 %v3614_v13, %v1345_v54  ;;  %1612 = vadd.xlane.f32.xlu2 %v1301_v12 }
 0x512   :  { %1426 = vmatpush.msra.mxu0 %v1425_v23  ;;  %v1352_v23 = vadd.f32 %v3614_v13, %v1351_v44  ;;  %v1337_v54 = vadd.f32 %v3614_v13, %v3931_v34  ;;  %v1398_v40 = vmul.f32 0.2, %v1343_v18  ;;  %v1395_v34 = vmul.f32 0.2, %v1334_v9 }
 0x513   :  { %v1402_v35 = vmul.f32 0.2, %v1355_v31  ;;  %vm1386_vm7 = vcmp.ge.f32.partialorder %v1355_v31, 0.0  ;;  %vm1383_vm10 = vcmp.ge.f32.partialorder %v1346_v22, 0.0 }
 0x514   :  { %1427 = vmatpush.msra.mxu0 %v1424_v51  ;;  %v1401_v27 = vmul.f32 0.2, %v1352_v23  ;;  %vm1385_vm8 = vcmp.ge.f32.partialorder %v1352_v23, 0.0  ;;  %v1416_v51 = vsel %vm1384_vm9, %v1349_v7, %v1400_v49  ;;  %vm1380_vm13 = vcmp.ge.f32.partialorder %v1337_v54, 0.0 }
 0x515   :  { %v1418_v44 = vsel %vm1386_vm7, %v1355_v31, %v1402_v35  ;;  %v1414_v31 = vsel %vm1382_vm11, %v1343_v18, %v1398_v40  ;;  %v1411_v48 = vsel %vm1379_vm14, %v1334_v9, %v1395_v34 }
 0x516   :  { %1428 = vmatpush.msra.mxu0 %v1423_v1  ;;  %v1420_v1 = vsel %vm1388_vm5, %v1361_v5, %v1404_v45  ;;  %v1417_v61 = vsel %vm1385_vm8, %v1352_v23, %v1401_v27  ;;  %v1399_v45 = vmul.f32 0.2, %v1346_v22  ;;  %v1300_v5 = vld [vmem:[#allocation2 + $0x98] sm:$0xff] }
 0x517   :  { %1610 = vadd.xlane.f32.xlu1 %v1300_v5 }
 0x518   :  { %1429 = vmatpush.msra.mxu0 %v1422_v41  ;;  %v1415_v2 = vsel %vm1383_vm10, %v1346_v22, %v1399_v45  ;;  %v1396_v41 = vmul.f32 0.2, %v1337_v54  ;;  %v1605_v45 = vpop.xlane.xlu1 %1604 }
 0x519   :  { %vm1636_vm1 = vcmp.gt.f32.partialorder %v1605_v45, 0.0 }
 0x51a   :  { %1430 = vmatpush.msra.mxu0 %v1421_v62  ;;  %v1340_v62 = vadd.f32 %v3614_v13, %v3933_v26  ;;  %v1331_v26 = vadd.f32 %v3614_v13, %v3927_v29  ;;  %v1412_v7 = vsel %vm1380_vm13, %v1337_v54, %v1396_v41  ;;  %v1302_v13 = vld [vmem:[#allocation2 + $0xa8] sm:$0xff]  ;;  %v1303_v29 = vld [vmem:[#allocation2 + $0xb0] sm:$0xff] }
 0x51b   :  { %1614 = vadd.xlane.f32.xlu0 %v1302_v13 }
 0x51c   :  { %1431 = vmatpush.msra.mxu0 %v1420_v1  ;;  %v1397_v39 = vmul.f32 0.2, %v1340_v62  ;;  %vm1381_vm12 = vcmp.ge.f32.partialorder %v1340_v62, 0.0  ;;  %v1394_v1 = vmul.f32 0.2, %v1331_v26  ;;  %vm1378_vm15 = vcmp.ge.f32.partialorder %v1331_v26, 0.0 }
 0x51e   :  { %1432 = vmatpush.msra.mxu0 %v1419_v59  ;;  %v1413_v23 = vsel %vm1381_vm12, %v1340_v62, %v1397_v39  ;;  %v1410_v35 = vsel %vm1378_vm15, %v1331_v26, %v1394_v1  ;;  %v1607_v39 = vpop.xlane.xlu2 %1606 }
 0x51f   :  { %1616 = vadd.xlane.f32.xlu1 %v1303_v29  ;;  %vm1637_vm3 = vcmp.gt.f32.partialorder %v1607_v39, 0.0 }
 0x520   :  { %1433 = vmatpush.msra.mxu0 %v1418_v44 }
 0x522   :  { %1434 = vmatpush.msra.mxu0 %v1417_v61 }
 0x524   :  { %1435 = vmatpush.msra.mxu0 %v1416_v51 }
 0x526   :  { %1436 = vmatpush.msra.mxu0 %v1415_v2 }
 0x528   :  { %1437 = vmatpush.msra.mxu0 %v1414_v31 }
 0x52a   :  { %1438 = vmatpush.msra.mxu0 %v1413_v23 }
 0x52c   :  { %1439 = vmatpush.msra.mxu0 %v1412_v7 }
 0x52e   :  { %1440 = vmatpush.msra.mxu0 %v1411_v48 }
 0x530   :  { %1441 = vmatpush.msra.mxu0 %v1410_v35 }
 0x531   :  { %1442 = vmatmul.f32.vlgmr.msra.gmra.mxu0 %v3939_v6 }
 0x532   :  { %1911 = vmatpush.msrb.mxu0 %v3694_v55  ;;  %v1304_v55 = vld [vmem:[#allocation2 + $0xb8] sm:$0xff] }
 0x533   :  { %1618 = vadd.xlane.f32.xlu2 %v1304_v55 }
 0x534   :  { %1912 = vmatpush.msrb.mxu0 %v3698_v57  ;;  %v1305_v57 = vld [vmem:[#allocation2 + $0xc0] sm:$0xff] }
 0x535   :  { %1620 = vadd.xlane.f32.xlu0 %v1305_v57 }
 0x536   :  { %1913 = vmatpush.msrb.mxu0 %v3705_v17  ;;  %v1306_v17 = vld [vmem:[#allocation2 + $0xc8] sm:$0xff] }
 0x537   :  { %1622 = vadd.xlane.f32.xlu1 %v1306_v17 }
 0x538   :  { %1914 = vmatpush.msrb.mxu0 %v3709_v10  ;;  %v1307_v10 = vld [vmem:[#allocation2 + $0xd0] sm:$0xff] }
 0x539   :  { %1445 = vmatmul.f32.gmra.mxu0 %v3942_v63 }
 0x53a   :  { %1915 = vmatpush.msrb.mxu0 %v3714_v20  ;;  %v1308_v20 = vld [vmem:[#allocation2 + $0xd8] sm:$0xff] }
 0x53b   :  { %1624 = vadd.xlane.f32.xlu2 %v1307_v10 }
 0x53c   :  { %1916 = vmatpush.msrb.mxu0 %v3718_v11  ;;  %v1309_v11 = vld [vmem:[#allocation2 + $0xe0] sm:$0xff] }
 0x53d   :  { %1626 = vadd.xlane.f32.xlu0 %v1308_v20 }
 0x53e   :  { %1917 = vmatpush.msrb.mxu0 %v3725_v43  ;;  %v1310_v43 = vld [vmem:[#allocation2 + $0xe8] sm:$0xff] }
 0x53f   :  { %1628 = vadd.xlane.f32.xlu1 %v1309_v11 }
 0x540   :  { %1918 = vmatpush.msrb.mxu0 %v3729_v33  ;;  %v1311_v33 = vld [vmem:[#allocation2 + $0xf0] sm:$0xff] }
 0x541   :  { %1448 = vmatmul.f32.gmra.mxu0 %v3950_v60 }
 0x542   :  { %1919 = vmatpush.msrb.mxu0 %v3734_v37  ;;  %v1312_v37 = vld [vmem:[#allocation2 + $0xf8] sm:$0xff] }
 0x543   :  { %1630 = vadd.xlane.f32.xlu2 %v1310_v43 }
 0x544   :  { %1920 = vmatpush.msrb.mxu0 %v3738_v28 }
 0x545   :  { %1632 = vadd.xlane.f32.xlu0 %v1311_v33 }
 0x546   :  { %1921 = vmatpush.msrb.mxu0 %v3745_v50 }
 0x547   :  { %1634 = vadd.xlane.f32.xlu1 %v1312_v37 }
 0x548   :  { %1922 = vmatpush.msrb.mxu0 %v3749_v46 }
 0x549   :  { %1451 = vmatmul.f32.gmra.mxu0 %v1300_v5 }
 0x54a   :  { %1923 = vmatpush.msrb.mxu0 %v3754_v56 }
 0x54c   :  { %1924 = vmatpush.msrb.mxu0 %v3758_v3 }
 0x54e   :  { %1925 = vmatpush.msrb.mxu0 %v3765_v15 }
 0x550   :  { %1926 = vmatpush.msrb.mxu0 %v3768_v0 }
 0x551   :  { %1454 = vmatmul.f32.gmra.mxu0 %v1301_v12 }
 0x559   :  { %1457 = vmatmul.f32.gmra.mxu0 %v1302_v13 }
 0x561   :  { %1460 = vmatmul.f32.gmra.mxu0 %v1303_v29 }
 0x569   :  { %1463 = vmatmul.f32.gmra.mxu0 %v1304_v55 }
 0x571   :  { %1466 = vmatmul.f32.gmra.mxu0 %v1305_v57 }
 0x579   :  { %1469 = vmatmul.f32.gmra.mxu0 %v1306_v17 }
 0x581   :  { %1472 = vmatmul.f32.gmra.mxu0 %v1307_v10 }
 0x589   :  { %1475 = vmatmul.f32.gmra.mxu0 %v1308_v20 }
 0x591   :  { %1478 = vmatmul.f32.gmra.mxu0 %v1309_v11 }
 0x599   :  { %1481 = vmatmul.f32.gmra.mxu0 %v1310_v43 }
 0x5a1   :  { %1484 = vmatmul.f32.gmra.mxu0 %v1311_v33 }
 0x5a9   :  { %1487 = vmatmul.f32.gmra.mxu0 %v1312_v37 }
 0x5ae   :  { %v1443_v28 = vpop.f32.mrf.mxu0 }
 0x5af   :  { %1507 = vmatmul.f32.vlgmr.msra.gmra.mxu1 %v1443_v28 }
 0x5b6   :  { %v1446_v50 = vpop.f32.mrf.mxu0 }
 0x5b7   :  { %1510 = vmatmul.f32.gmra.mxu1 %v1446_v50 }
 0x5be   :  { %v1449_v46 = vpop.f32.mrf.mxu0 }
 0x5bf   :  { %1513 = vmatmul.f32.gmra.mxu1 %v1449_v46 }
 0x5c6   :  { %v1452_v56 = vpop.f32.mrf.mxu0 }
 0x5c7   :  { %1516 = vmatmul.f32.gmra.mxu1 %v1452_v56 }
 0x5ce   :  { %v1455_v3 = vpop.f32.mrf.mxu0 }
 0x5cf   :  { %1519 = vmatmul.f32.gmra.mxu1 %v1455_v3 }
 0x5d6   :  { %v1458_v15 = vpop.f32.mrf.mxu0 }
 0x5d7   :  { %1522 = vmatmul.f32.gmra.mxu1 %v1458_v15 }
 0x5de   :  { %v1461_v0 = vpop.f32.mrf.mxu0 }
 0x5df   :  { %1525 = vmatmul.f32.gmra.mxu1 %v1461_v0 }
 0x5e6   :  { %v1464_v63 = vpop.f32.mrf.mxu0 }
 0x5e7   :  { %1528 = vmatmul.f32.gmra.mxu1 %v1464_v63 }
 0x5ee   :  { %v1467_v6 = vpop.f32.mrf.mxu0 }
 0x5ef   :  { %1531 = vmatmul.f32.gmra.mxu1 %v1467_v6 }
 0x5f6   :  { %v1470_v60 = vpop.f32.mrf.mxu0 }
 0x5f7   :  { %1534 = vmatmul.f32.gmra.mxu1 %v1470_v60 }
 0x5fe   :  { %v1473_v22 = vpop.f32.mrf.mxu0 }
 0x5ff   :  { %1537 = vmatmul.f32.gmra.mxu1 %v1473_v22 }
 0x606   :  { %v1476_v59 = vpop.f32.mrf.mxu0 }
 0x607   :  { %1540 = vmatmul.f32.gmra.mxu1 %v1476_v59 }
 0x60e   :  { %v1479_v27 = vpop.f32.mrf.mxu0 }
 0x60f   :  { %1543 = vmatmul.f32.gmra.mxu1 %v1479_v27 }
 0x616   :  { %v1482_v18 = vpop.f32.mrf.mxu0 }
 0x617   :  { %1546 = vmatmul.f32.gmra.mxu1 %v1482_v18 }
 0x61e   :  { %v1485_v44 = vpop.f32.mrf.mxu0 }
 0x61f   :  { %1549 = vmatmul.f32.gmra.mxu1 %v1485_v44 }
 0x626   :  { %v1488_v49 = vpop.f32.mrf.mxu0 }
 0x627   :  { %1552 = vmatmul.f32.gmra.mxu1 %v1488_v49 }
 0x62c   :  { %v1508_v62 = vpop.f32.mrf.mxu1 }
 0x62d   :  { %v1509_v61 = vadd.f32 %v3888_v32, %v1508_v62 }
 0x62f   :  { %vm1556_vm0 = vcmp.ge.f32.partialorder %v1509_v61, 0.0  ;;  %v1572_v5 = vmul.f32 0.2, %v1509_v61 }
 0x631   :  { %v1588_v54 = vsel %vm1556_vm0, %v1509_v61, %v1572_v5 }
 0x632   :  { %v1652_v51 = vadd.f32 %v1588_v54, %v3380_v16 }
 0x634   :  { %v3986_v40 = vsel %vm1636_vm1, %v1652_v51, %v3829_v38  ;;  %v1511_v9 = vpop.f32.mrf.mxu1  ;;  %v1609_v38 = vpop.xlane.xlu0 %1608 }
 0x635   :  { %v1512_v2 = vadd.f32 %v3888_v32, %v1511_v9  ;;  %1749 = vmatmul.f32.vlgmr.msra.gmra.mxu2 %v3986_v40  ;;  %vm1638_vm5 = vcmp.gt.f32.partialorder %v1609_v38, 0.0 }
 0x637   :  { %vm1557_vm2 = vcmp.ge.f32.partialorder %v1512_v2, 0.0  ;;  %v1573_v26 = vmul.f32 0.2, %v1512_v2 }
 0x639   :  { %v1589_v31 = vsel %vm1557_vm2, %v1512_v2, %v1573_v26  ;;  %v4429_v2 = vld [vmem:[#allocation40_spill] sm:$0xff] }
 0x63a   :  { %v1653_v41 = vadd.f32 %v1589_v31, %v3387_v21  ;;  %v4430_v31 = vld [vmem:[#allocation48_spill] sm:$0xff] }
 0x63c   :  { %v1514_v23 = vpop.f32.mrf.mxu1  ;;  %v3992_v34 = vsel %vm1637_vm3, %v1653_v41, %v3835_v24  ;;  %v1611_v24 = vpop.xlane.xlu1 %1610 }
 0x63d   :  { %v1515_v12 = vadd.f32 %v3888_v32, %v1514_v23  ;;  %1752 = vmatmul.f32.gmra.mxu2 %v3992_v34  ;;  %vm1639_vm7 = vcmp.gt.f32.partialorder %v1611_v24, 0.0 }
 0x63f   :  { %vm1558_vm4 = vcmp.ge.f32.partialorder %v1515_v12, 0.0  ;;  %v1574_v7 = vmul.f32 0.2, %v1515_v12 }
 0x641   :  { %v1590_v1 = vsel %vm1558_vm4, %v1515_v12, %v1574_v7  ;;  %v4431_v7 = vld [vmem:[#allocation41_spill] sm:$0xff] }
 0x642   :  { %v1654_v48 = vadd.f32 %v1590_v1, %v3394_v30 }
 0x644   :  { %v1517_v35 = vpop.f32.mrf.mxu1  ;;  %v3998_v13 = vsel %vm1638_vm5, %v1654_v48, %v3841_v52  ;;  %v1613_v52 = vpop.xlane.xlu2 %1612 }
 0x645   :  { %v1518_v29 = vadd.f32 %v3888_v32, %v1517_v35  ;;  %1755 = vmatmul.f32.gmra.mxu2 %v3998_v13  ;;  %vm1640_vm9 = vcmp.gt.f32.partialorder %v1613_v52, 0.0  ;;  %v4432_v35 = vld [vmem:[#allocation35_spill] sm:$0xff] }
 0x647   :  { %vm1559_vm6 = vcmp.ge.f32.partialorder %v1518_v29, 0.0  ;;  %v1575_v55 = vmul.f32 0.2, %v1518_v29 }
 0x649   :  { %v1591_v57 = vsel %vm1559_vm6, %v1518_v29, %v1575_v55 }
 0x64a   :  { %v1655_v17 = vadd.f32 %v1591_v57, %v4395_v58 }
 0x64c   :  { %v1520_v10 = vpop.f32.mrf.mxu1  ;;  %v4004_v20 = vsel %vm1639_vm7, %v1655_v17, %v3847_v36  ;;  %v1615_v36 = vpop.xlane.xlu0 %1614 }
 0x64d   :  { %v1521_v11 = vadd.f32 %v3888_v32, %v1520_v10  ;;  %1758 = vmatmul.f32.gmra.mxu2 %v4004_v20  ;;  %vm1641_vm11 = vcmp.gt.f32.partialorder %v1615_v36, 0.0  ;;  %v4433_v10 = vld [vmem:[#allocation42_spill] sm:$0xff] }
 0x64f   :  { %vm1560_vm8 = vcmp.ge.f32.partialorder %v1521_v11, 0.0  ;;  %v1576_v43 = vmul.f32 0.2, %v1521_v11 }
 0x651   :  { %v1592_v33 = vsel %vm1560_vm8, %v1521_v11, %v1576_v43  ;;  %v4434_v43 = vld [vmem:[#allocation49_spill] sm:$0xff] }
 0x652   :  { %v1656_v37 = vadd.f32 %v1592_v33, %v4397_v14 }
 0x654   :  { %v1523_v28 = vpop.f32.mrf.mxu1  ;;  %v4010_v50 = vsel %vm1640_vm9, %v1656_v37, %v3853_v47  ;;  %v1617_v47 = vpop.xlane.xlu1 %1616 }
 0x655   :  { %v1524_v46 = vadd.f32 %v3888_v32, %v1523_v28  ;;  %1761 = vmatmul.f32.gmra.mxu2 %v4010_v50  ;;  %vm1642_vm13 = vcmp.gt.f32.partialorder %v1617_v47, 0.0 }
 0x657   :  { %vm1561_vm10 = vcmp.ge.f32.partialorder %v1524_v46, 0.0  ;;  %v1577_v56 = vmul.f32 0.2, %v1524_v46 }
 0x659   :  { %v1593_v3 = vsel %vm1561_vm10, %v1524_v46, %v1577_v56  ;;  %v4435_v56 = vld [vmem:[#allocation43_spill] sm:$0xff] }
 0x65a   :  { %v1657_v15 = vadd.f32 %v1593_v3, %v4399_v19 }
 0x65c   :  { %v1526_v0 = vpop.f32.mrf.mxu1  ;;  %v4016_v63 = vsel %vm1641_vm11, %v1657_v15, %v3859_v4  ;;  %v1619_v4 = vpop.xlane.xlu2 %1618 }
 0x65d   :  { %v1527_v6 = vadd.f32 %v3888_v32, %v1526_v0  ;;  %1764 = vmatmul.f32.gmra.mxu2 %v4016_v63  ;;  %vm1643_vm15 = vcmp.gt.f32.partialorder %v1619_v4, 0.0  ;;  %v4436_v0 = vld [vmem:[#allocation36_spill] sm:$0xff] }
 0x65f   :  { %vm1562_vm12 = vcmp.ge.f32.partialorder %v1527_v6, 0.0  ;;  %v1578_v60 = vmul.f32 0.2, %v1527_v6 }
 0x661   :  { %v1594_v22 = vsel %vm1562_vm12, %v1527_v6, %v1578_v60 }
 0x662   :  { %v1658_v59 = vadd.f32 %v1594_v22, %v4401_v25 }
 0x664   :  { %v1529_v27 = vpop.f32.mrf.mxu1  ;;  %v4022_v18 = vsel %vm1642_vm13, %v1658_v59, %v3865_v42  ;;  %v1621_v42 = vpop.xlane.xlu0 %1620 }
 0x665   :  { %v1530_v44 = vadd.f32 %v3888_v32, %v1529_v27  ;;  %1767 = vmatmul.f32.gmra.mxu2 %v4022_v18  ;;  %vm1644_vm1 = vcmp.gt.f32.partialorder %v1621_v42, 0.0  ;;  %v1625_v55 = vpop.xlane.xlu2 %1624  ;;  %v4437_v27 = vld [vmem:[#allocation44_spill] sm:$0xff] }
 0x666   :  { %vm1646_vm5 = vcmp.gt.f32.partialorder %v1625_v55, 0.0 }
 0x667   :  { %vm1563_vm14 = vcmp.ge.f32.partialorder %v1530_v44, 0.0  ;;  %v1579_v49 = vmul.f32 0.2, %v1530_v44 }
 0x669   :  { %v1595_v62 = vsel %vm1563_vm14, %v1530_v44, %v1579_v49  ;;  %v4438_v49 = vld [vmem:[#allocation50_spill] sm:$0xff] }
 0x66a   :  { %v1659_v61 = vadd.f32 %v1595_v62, %v4403_v53 }
 0x66c   :  { %v1532_v45 = vpop.f32.mrf.mxu1  ;;  %v4028_v5 = vsel %vm1643_vm15, %v1659_v61, %v3871_v8  ;;  %v1623_v8 = vpop.xlane.xlu1 %1622 }
 0x66d   :  { %v1533_v54 = vadd.f32 %v3888_v32, %v1532_v45  ;;  %1770 = vmatmul.f32.gmra.mxu2 %v4028_v5  ;;  %vm1645_vm3 = vcmp.gt.f32.partialorder %v1623_v8, 0.0  ;;  %v1627_v28 = vpop.xlane.xlu0 %1626  ;;  %v1631_v45 = vpop.xlane.xlu2 %1630 }
 0x66e   :  { %vm1647_vm7 = vcmp.gt.f32.partialorder %v1627_v28, 0.0  ;;  %vm1649_vm11 = vcmp.gt.f32.partialorder %v1631_v45, 0.0  ;;  %v4444_v28 = vld [vmem:[#allocation38_spill] sm:$0xff] }
 0x66f   :  { %vm1564_vm0 = vcmp.ge.f32.partialorder %v1533_v54, 0.0  ;;  %v1580_v51 = vmul.f32 0.2, %v1533_v54 }
 0x671   :  { %v1596_v9 = vsel %vm1564_vm0, %v1533_v54, %v1580_v51  ;;  %v4439_v51 = vld [vmem:[#allocation45_spill] sm:$0xff] }
 0x672   :  { %v1660_v39 = vadd.f32 %v1596_v9, %v4429_v2 }
 0x674   :  { %v1535_v26 = vpop.f32.mrf.mxu1  ;;  %v4034_v41 = vsel %vm1644_vm1, %v1660_v39, %v4430_v31  ;;  %v1629_v60 = vpop.xlane.xlu1 %1628 }
 0x675   :  { %v1536_v23 = vadd.f32 %v3888_v32, %v1535_v26  ;;  %1773 = vmatmul.f32.gmra.mxu2 %v4034_v41  ;;  %vm1648_vm9 = vcmp.gt.f32.partialorder %v1629_v60, 0.0  ;;  %v4440_v26 = vld [vmem:[#allocation37_spill] sm:$0xff]  ;;  %v1633_v8 = vpop.xlane.xlu0 %1632 }
 0x676   :  { %vm1650_vm13 = vcmp.gt.f32.partialorder %v1633_v8, 0.0 }
 0x677   :  { %vm1565_vm2 = vcmp.ge.f32.partialorder %v1536_v23, 0.0  ;;  %v1581_v12 = vmul.f32 0.2, %v1536_v23 }
 0x679   :  { %v1597_v38 = vsel %vm1565_vm2, %v1536_v23, %v1581_v12 }
 0x67a   :  { %v1661_v1 = vadd.f32 %v1597_v38, %v4431_v7 }
 0x67c   :  { %v1538_v48 = vpop.f32.mrf.mxu1  ;;  %v4040_v29 = vsel %vm1645_vm3, %v1661_v1, %v4432_v35  ;;  %v4441_v1 = vld [vmem:[#allocation46_spill] sm:$0xff] }
 0x67d   :  { %v1539_v24 = vadd.f32 %v3888_v32, %v1538_v48  ;;  %1776 = vmatmul.f32.gmra.mxu2 %v4040_v29 }
 0x67f   :  { %vm1566_vm4 = vcmp.ge.f32.partialorder %v1539_v24, 0.0  ;;  %v1582_v57 = vmul.f32 0.2, %v1539_v24 }
 0x681   :  { %v1598_v17 = vsel %vm1566_vm4, %v1539_v24, %v1582_v57  ;;  %v4442_v24 = vld [vmem:[#allocation51_spill] sm:$0xff] }
 0x682   :  { %v1662_v11 = vadd.f32 %v1598_v17, %v4433_v10  ;;  %v1635_v17 = vpop.xlane.xlu1 %1634 }
 0x683   :  { %vm1651_vm15 = vcmp.gt.f32.partialorder %v1635_v17, 0.0  ;;  %v4096_v17 = vld [vmem:[#allocation2 + $0x108] sm:$0xff] }
 0x684   :  { %v1541_v52 = vpop.f32.mrf.mxu1  ;;  %v4046_v33 = vsel %vm1646_vm5, %v1662_v11, %v4434_v43  ;;  %v4443_v43 = vld [vmem:[#allocation47_spill] sm:$0xff]  ;;  %2026 = vadd.xlane.f32.xlu0 %v4096_v17 }
 0x685   :  { %v1542_v37 = vadd.f32 %v3888_v32, %v1541_v52  ;;  %1779 = vmatmul.f32.gmra.mxu2 %v4046_v33 }
 0x687   :  { %vm1567_vm6 = vcmp.ge.f32.partialorder %v1542_v37, 0.0  ;;  %v1583_v46 = vmul.f32 0.2, %v1542_v37 }
 0x689   :  { %v1599_v36 = vsel %vm1567_vm6, %v1542_v37, %v1583_v46 }
 0x68a   :  { %v1663_v3 = vadd.f32 %v1599_v36, %v4435_v56 }
 0x68c   :  { %v1544_v15 = vpop.f32.mrf.mxu1  ;;  %v4052_v6 = vsel %vm1647_vm7, %v1663_v3, %v4436_v0 }
 0x68d   :  { %v1545_v47 = vadd.f32 %v3888_v32, %v1544_v15  ;;  %1782 = vmatmul.f32.gmra.mxu2 %v4052_v6 }
 0x68f   :  { %vm1568_vm8 = vcmp.ge.f32.partialorder %v1545_v47, 0.0  ;;  %v1584_v22 = vmul.f32 0.2, %v1545_v47 }
 0x691   :  { %v1600_v59 = vsel %vm1568_vm8, %v1545_v47, %v1584_v22 }
 0x692   :  { %v1664_v44 = vadd.f32 %v1600_v59, %v4437_v27 }
 0x694   :  { %v1547_v4 = vpop.f32.mrf.mxu1  ;;  %v4058_v62 = vsel %vm1648_vm9, %v1664_v44, %v4438_v49 }
 0x695   :  { %v1548_v61 = vadd.f32 %v3888_v32, %v1547_v4  ;;  %1785 = vmatmul.f32.gmra.mxu2 %v4058_v62 }
 0x697   :  { %vm1569_vm10 = vcmp.ge.f32.partialorder %v1548_v61, 0.0  ;;  %v1585_v54 = vmul.f32 0.2, %v1548_v61 }
 0x699   :  { %v1601_v42 = vsel %vm1569_vm10, %v1548_v61, %v1585_v54 }
 0x69a   :  { %v1665_v9 = vadd.f32 %v1601_v42, %v4439_v51  ;;  %v4087_v42 = vld [vmem:[#allocation13] ss:$0 sm:$0xff] }
 0x69c   :  { %v1550_v39 = vpop.f32.mrf.mxu1  ;;  %v4064_v31 = vsel %vm1649_vm11, %v1665_v9, %v4440_v26 }
 0x69d   :  { %v1551_v23 = vadd.f32 %v3888_v32, %v1550_v39  ;;  %1788 = vmatmul.f32.gmra.mxu2 %v4064_v31 }
 0x69f   :  { %vm1570_vm12 = vcmp.ge.f32.partialorder %v1551_v23, 0.0  ;;  %v1586_v12 = vmul.f32 0.2, %v1551_v23 }
 0x6a1   :  { %v1602_v38 = vsel %vm1570_vm12, %v1551_v23, %v1586_v12 }
 0x6a2   :  { %v1666_v48 = vadd.f32 %v1602_v38, %v4441_v1 }
 0x6a4   :  { %v1553_v35 = vpop.f32.mrf.mxu1  ;;  %v4070_v55 = vsel %vm1650_vm13, %v1666_v48, %v4442_v24  ;;  %v4093_v48 = vld [vmem:[#allocation2 + $0x100] sm:$0xff] }
 0x6a5   :  { %v1554_v57 = vadd.f32 %v3888_v32, %v1553_v35  ;;  %1791 = vmatmul.f32.gmra.mxu2 %v4070_v55  ;;  %2024 = vadd.xlane.f32.xlu2 %v4093_v48 }
 0x6a7   :  { %vm1571_vm14 = vcmp.ge.f32.partialorder %v1554_v57, 0.0  ;;  %v1587_v11 = vmul.f32 0.2, %v1554_v57 }
 0x6a9   :  { %v1603_v52 = vsel %vm1571_vm14, %v1554_v57, %v1587_v11 }
 0x6aa   :  { %v1667_v37 = vadd.f32 %v1603_v52, %v4443_v43 }
 0x6ac   :  { %v4076_v46 = vsel %vm1651_vm15, %v1667_v37, %v4444_v28 }
 0x6ad   :  { %1794 = vmatmul.f32.gmra.mxu2 %v4076_v46 }
 0x6b8   :  { %v4079_v36 = vpop.f32.mrf.mxu2 }
 0x6c0   :  { %v4081_v3 = vpop.f32.mrf.mxu2 }
 0x6c8   :  { %v4083_v15 = vpop.f32.mrf.mxu2 }
 0x6d0   :  { %v4085_v32 = vpop.f32.mrf.mxu2 }
 0x6d8   :  { %v1762_v0 = vpop.f32.mrf.mxu2 }
 0x6e0   :  { %v1765_v47 = vpop.f32.mrf.mxu2 }
 0x6e8   :  { %v1768_v60 = vpop.f32.mrf.mxu2 }
 0x6f0   :  { %v1771_v22 = vpop.f32.mrf.mxu2 }
 0x6f8   :  { %v1774_v59 = vpop.f32.mrf.mxu2 }
 0x700   :  { %v1777_v44 = vpop.f32.mrf.mxu2 }
 0x701   :  { %v1778_v28 = vadd.f32 %v4087_v42, %v1777_v44  ;;  %v1769_v44 = vadd.f32 %v4087_v42, %v1768_v60 }
 0x703   :  { %vm1807_vm6 = vcmp.ge.f32.partialorder %v1778_v28, 0.0  ;;  %vm1804_vm9 = vcmp.ge.f32.partialorder %v1769_v44, 0.0 }
 0x708   :  { %v1780_v4 = vpop.f32.mrf.mxu2 }
 0x709   :  { %v1781_v11 = vadd.f32 %v4087_v42, %v1780_v4 }
 0x70b   :  { %vm1808_vm5 = vcmp.ge.f32.partialorder %v1781_v11, 0.0 }
 0x710   :  { %v1783_v49 = vpop.f32.mrf.mxu2 }
 0x711   :  { %v1784_v35 = vadd.f32 %v4087_v42, %v1783_v49 }
 0x713   :  { %vm1809_vm4 = vcmp.ge.f32.partialorder %v1784_v35, 0.0 }
 0x718   :  { %v1786_v61 = vpop.f32.mrf.mxu2 }
 0x719   :  { %v1787_v8 = vadd.f32 %v4087_v42, %v1786_v61  ;;  %v1825_v61 = vmul.f32 0.2, %v1784_v35 }
 0x71b   :  { %v1826_v52 = vmul.f32 0.2, %v1787_v8  ;;  %vm1810_vm3 = vcmp.ge.f32.partialorder %v1787_v8, 0.0  ;;  %v1841_v4 = vsel %vm1809_vm4, %v1784_v35, %v1825_v61  ;;  %v1820_v35 = vmul.f32 0.2, %v1769_v44 }
 0x720   :  { %v1789_v45 = vpop.f32.mrf.mxu2 }
 0x721   :  { %v1790_v26 = vadd.f32 %v4087_v42, %v1789_v45  ;;  %v1775_v45 = vadd.f32 %v4087_v42, %v1774_v59  ;;  %v1766_v59 = vadd.f32 %v4087_v42, %v1765_v47  ;;  %v1757_v47 = vadd.f32 %v4087_v42, %v4083_v15 }
 0x723   :  { %v1827_v24 = vmul.f32 0.2, %v1790_v26  ;;  %vm1811_vm2 = vcmp.ge.f32.partialorder %v1790_v26, 0.0  ;;  %vm1806_vm7 = vcmp.ge.f32.partialorder %v1775_v45, 0.0  ;;  %vm1803_vm10 = vcmp.ge.f32.partialorder %v1766_v59, 0.0 }
 0x724   :  { %vm1800_vm13 = vcmp.ge.f32.partialorder %v1757_v47, 0.0 }
 0x725   :  { %v1843_v49 = vsel %vm1811_vm2, %v1790_v26, %v1827_v24 }
 0x728   :  { %v1792_v54 = vpop.f32.mrf.mxu2 }
 0x729   :  { %v1793_v9 = vadd.f32 %v4087_v42, %v1792_v54  ;;  %v1824_v54 = vmul.f32 0.2, %v1781_v11 }
 0x72b   :  { %v1828_v12 = vmul.f32 0.2, %v1793_v9  ;;  %vm1812_vm1 = vcmp.ge.f32.partialorder %v1793_v9, 0.0  ;;  %v1840_v26 = vsel %vm1808_vm5, %v1781_v11, %v1824_v54  ;;  %v1720_v11 = vld [vmem:[#allocation2 + $0x118] sm:$0xff] }
 0x72c   :  { %2030 = vadd.xlane.f32.xlu2 %v1720_v11 }
 0x72d   :  { %v1844_v37 = vsel %vm1812_vm1, %v1793_v9, %v1828_v12  ;;  %v1822_v9 = vmul.f32 0.2, %v1775_v45 }
 0x72f   :  { %v1838_v24 = vsel %vm1806_vm7, %v1775_v45, %v1822_v9 }
 0x730   :  { %v1795_v39 = vpop.f32.mrf.mxu2 }
 0x731   :  { %v1796_v23 = vadd.f32 %v4087_v42, %v1795_v39  ;;  %v1842_v39 = vsel %vm1810_vm3, %v1787_v8, %v1826_v52  ;;  %v1760_v52 = vadd.f32 %v4087_v42, %v4085_v32  ;;  %v1751_v32 = vadd.f32 %v4087_v42, %v4079_v36  ;;  %v1722_v36 = vld [vmem:[#allocation2 + $0x128] sm:$0xff] }
 0x733   :  { %vm1813_vm0 = vcmp.ge.f32.partialorder %v1796_v23, 0.0  ;;  %v1829_v38 = vmul.f32 0.2, %v1796_v23  ;;  %v1817_v45 = vmul.f32 0.2, %v1760_v52  ;;  %vm1801_vm12 = vcmp.ge.f32.partialorder %v1760_v52, 0.0 }
 0x734   :  { %vm1798_vm15 = vcmp.ge.f32.partialorder %v1751_v32, 0.0 }
 0x735   :  { %v1845_v57 = vsel %vm1813_vm0, %v1796_v23, %v1829_v38  ;;  %v1772_v23 = vadd.f32 %v4087_v42, %v1771_v22  ;;  %v1823_v38 = vmul.f32 0.2, %v1778_v28  ;;  %v1763_v22 = vadd.f32 %v4087_v42, %v1762_v0 }
 0x736   :  { %1846 = vmatpush.msra.mxu3 %v1845_v57  ;;  %v1719_v57 = vld [vmem:[#allocation2 + $0x110] sm:$0xff]  ;;  %v1754_v0 = vadd.f32 %v4087_v42, %v4081_v3 }
 0x737   :  { %2028 = vadd.xlane.f32.xlu1 %v1719_v57  ;;  %v1839_v12 = vsel %vm1807_vm6, %v1778_v28, %v1823_v38  ;;  %v1821_v8 = vmul.f32 0.2, %v1772_v23  ;;  %vm1805_vm8 = vcmp.ge.f32.partialorder %v1772_v23, 0.0  ;;  %v1836_v28 = vsel %vm1804_vm9, %v1769_v44, %v1820_v35  ;;  %v1721_v38 = vld [vmem:[#allocation2 + $0x120] sm:$0xff]  ;;  %v1723_v42 = vld [vmem:[#allocation2 + $0x130] sm:$0xff] }
 0x738   :  { %1847 = vmatpush.msra.mxu3 %v1844_v37  ;;  %v1819_v37 = vmul.f32 0.2, %v1766_v59  ;;  %v1818_v61 = vmul.f32 0.2, %v1763_v22  ;;  %vm1802_vm11 = vcmp.ge.f32.partialorder %v1763_v22, 0.0  ;;  %vm1799_vm14 = vcmp.ge.f32.partialorder %v1754_v0, 0.0  ;;  %2032 = vadd.xlane.f32.xlu0 %v1721_v38 }
 0x739   :  { %v1837_v60 = vsel %vm1805_vm8, %v1772_v23, %v1821_v8  ;;  %v1833_v23 = vsel %vm1801_vm12, %v1760_v52, %v1817_v45  ;;  %v1815_v15 = vmul.f32 0.2, %v1754_v0  ;;  %v1814_v44 = vmul.f32 0.2, %v1751_v32  ;;  %2036 = vadd.xlane.f32.xlu2 %v1723_v42  ;;  %v1727_v8 = vld [vmem:[#allocation2 + $0x150] sm:$0xff] }
 0x73a   :  { %1848 = vmatpush.msra.mxu3 %v1843_v49  ;;  %v1835_v49 = vsel %vm1803_vm10, %v1766_v59, %v1819_v37  ;;  %v1834_v54 = vsel %vm1802_vm11, %v1763_v22, %v1818_v61  ;;  %v1725_v59 = vld [vmem:[#allocation2 + $0x140] sm:$0xff] }
 0x73b   :  { %v1831_v3 = vsel %vm1799_vm14, %v1754_v0, %v1815_v15  ;;  %v1830_v9 = vsel %vm1798_vm15, %v1751_v32, %v1814_v44  ;;  %v1729_v22 = vld [vmem:[#allocation2 + $0x160] sm:$0xff]  ;;  %v2166_v32 = vld [vmem:[#allocation17 + $0x70] sm:$0xff] }
 0x73c   :  { %1849 = vmatpush.msra.mxu3 %v1842_v39  ;;  %v1816_v39 = vmul.f32 0.2, %v1757_v47  ;;  %v2160_v44 = vld [vmem:[#allocation17 + $0x40] sm:$0xff] }
 0x73e   :  { %1850 = vmatpush.msra.mxu3 %v1841_v4  ;;  %v1832_v4 = vsel %vm1800_vm13, %v1757_v47, %v1816_v39  ;;  %v2164_v39 = vld [vmem:[#allocation17 + $0x60] sm:$0xff] }
 0x73f   :  { %2034 = vadd.xlane.f32.xlu1 %v1722_v36 }
 0x740   :  { %1851 = vmatpush.msra.mxu3 %v1840_v26  ;;  %v1724_v26 = vld [vmem:[#allocation2 + $0x138] sm:$0xff] }
 0x741   :  { %2038 = vadd.xlane.f32.xlu0 %v1724_v26 }
 0x742   :  { %1852 = vmatpush.msra.mxu3 %v1839_v12  ;;  %v1726_v12 = vld [vmem:[#allocation2 + $0x148] sm:$0xff] }
 0x743   :  { %2042 = vadd.xlane.f32.xlu2 %v1726_v12 }
 0x744   :  { %1853 = vmatpush.msra.mxu3 %v1838_v24  ;;  %v1732_v24 = vld [vmem:[#allocation2 + $0x178] sm:$0xff] }
 0x746   :  { %1854 = vmatpush.msra.mxu3 %v1837_v60 }
 0x747   :  { %2040 = vadd.xlane.f32.xlu1 %v1725_v59 }
 0x748   :  { %1855 = vmatpush.msra.mxu3 %v1836_v28 }
 0x749   :  { %2044 = vadd.xlane.f32.xlu0 %v1727_v8 }
 0x74a   :  { %1856 = vmatpush.msra.mxu3 %v1835_v49  ;;  %v2167_v49 = vld [vmem:[#allocation17 + $0x78] sm:$0xff] }
 0x74b   :  { %2048 = vadd.xlane.f32.xlu2 %v1729_v22  ;;  %2168 = vmatpush.msrb.mxu1 %v2167_v49 }
 0x74c   :  { %1857 = vmatpush.msra.mxu3 %v1834_v54  ;;  %v2165_v54 = vld [vmem:[#allocation17 + $0x68] sm:$0xff] }
 0x74d   :  { %2169 = vmatpush.msrb.mxu1 %v2166_v32 }
 0x74e   :  { %1858 = vmatpush.msra.mxu3 %v1833_v23  ;;  %v2163_v23 = vld [vmem:[#allocation17 + $0x58] sm:$0xff] }
 0x74f   :  { %2170 = vmatpush.msrb.mxu1 %v2165_v54 }
 0x750   :  { %1859 = vmatpush.msra.mxu3 %v1832_v4  ;;  %v2161_v4 = vld [vmem:[#allocation17 + $0x48] sm:$0xff] }
 0x751   :  { %2171 = vmatpush.msrb.mxu1 %v2164_v39 }
 0x752   :  { %1860 = vmatpush.msra.mxu3 %v1831_v3  ;;  %v2159_v3 = vld [vmem:[#allocation17 + $0x38] sm:$0xff] }
 0x753   :  { %2054 = vadd.xlane.f32.xlu2 %v1732_v24  ;;  %2172 = vmatpush.msrb.mxu1 %v2163_v23 }
 0x754   :  { %1861 = vmatpush.msra.mxu3 %v1830_v9 }
 0x755   :  { %1862 = vmatmul.f32.vlgmr.msra.gmra.mxu3 %v4093_v48  ;;  %v1728_v48 = vld [vmem:[#allocation2 + $0x158] sm:$0xff] }
 0x756   :  { %2046 = vadd.xlane.f32.xlu1 %v1728_v48 }
 0x75d   :  { %1865 = vmatmul.f32.gmra.mxu3 %v4096_v17  ;;  %v1730_v17 = vld [vmem:[#allocation2 + $0x168] sm:$0xff] }
 0x75e   :  { %2050 = vadd.xlane.f32.xlu0 %v1730_v17 }
 0x765   :  { %1868 = vmatmul.f32.gmra.mxu3 %v1719_v57  ;;  %v1731_v57 = vld [vmem:[#allocation2 + $0x170] sm:$0xff] }
 0x766   :  { %2052 = vadd.xlane.f32.xlu1 %v1731_v57 }
 0x76d   :  { %1871 = vmatmul.f32.gmra.mxu3 %v1720_v11 }
 0x775   :  { %1874 = vmatmul.f32.gmra.mxu3 %v1721_v38  ;;  %v2162_v38 = vld [vmem:[#allocation17 + $0x50] sm:$0xff] }
 0x776   :  { %2173 = vmatpush.msrb.mxu1 %v2162_v38 }
 0x778   :  { %2174 = vmatpush.msrb.mxu1 %v2161_v4 }
 0x77a   :  { %2175 = vmatpush.msrb.mxu1 %v2160_v44 }
 0x77c   :  { %2176 = vmatpush.msrb.mxu1 %v2159_v3 }
 0x77d   :  { %1877 = vmatmul.f32.gmra.mxu3 %v1722_v36  ;;  %v2158_v36 = vld [vmem:[#allocation17 + $0x30] sm:$0xff] }
 0x77e   :  { %2177 = vmatpush.msrb.mxu1 %v2158_v36 }
 0x785   :  { %1880 = vmatmul.f32.gmra.mxu3 %v1723_v42  ;;  %v2157_v42 = vld [vmem:[#allocation17 + $0x28] sm:$0xff] }
 0x786   :  { %2178 = vmatpush.msrb.mxu1 %v2157_v42 }
 0x78d   :  { %1883 = vmatmul.f32.gmra.mxu3 %v1724_v26  ;;  %v2156_v26 = vld [vmem:[#allocation17 + $0x20] sm:$0xff] }
 0x78e   :  { %2179 = vmatpush.msrb.mxu1 %v2156_v26 }
 0x795   :  { %1886 = vmatmul.f32.gmra.mxu3 %v1725_v59  ;;  %v2155_v59 = vld [vmem:[#allocation17 + $0x18] sm:$0xff] }
 0x796   :  { %2180 = vmatpush.msrb.mxu1 %v2155_v59 }
 0x79d   :  { %1889 = vmatmul.f32.gmra.mxu3 %v1726_v12 }
 0x7a5   :  { %1892 = vmatmul.f32.gmra.mxu3 %v1727_v8  ;;  %v2154_v8 = vld [vmem:[#allocation17 + $0x10] sm:$0xff] }
 0x7a6   :  { %2181 = vmatpush.msrb.mxu1 %v2154_v8 }
 0x7ad   :  { %1895 = vmatmul.f32.gmra.mxu3 %v1728_v48  ;;  %v2153_v48 = vld [vmem:[#allocation17 + $0x8] sm:$0xff] }
 0x7ae   :  { %2182 = vmatpush.msrb.mxu1 %v2153_v48 }
 0x7b5   :  { %1898 = vmatmul.f32.gmra.mxu3 %v1729_v22  ;;  %v2152_v22 = vld [vmem:[#allocation17] sm:$0xff] }
 0x7b6   :  { %2183 = vmatpush.msrb.mxu1 %v2152_v22 }
 0x7bd   :  { %1901 = vmatmul.f32.gmra.mxu3 %v1730_v17 }
 0x7c5   :  { %1904 = vmatmul.f32.gmra.mxu3 %v1731_v57 }
 0x7cd   :  { %1907 = vmatmul.f32.gmra.mxu3 %v1732_v24 }
 0x7d8   :  { %v1863_v35 = vpop.f32.mrf.mxu3 }
 0x7d9   :  { %1927 = vmatmul.f32.vlgmr.msrb.gmra.mxu0 %v1863_v35 }
 0x7e0   :  { %v1866_v52 = vpop.f32.mrf.mxu3 }
 0x7e1   :  { %1930 = vmatmul.f32.gmra.mxu0 %v1866_v52  ;;  %v4120_v52 = vld [vmem:[%s4280_s10] ss:$0 sm:$0xff] }
 0x7e8   :  { %v1869_v60 = vpop.f32.mrf.mxu3 }
 0x7e9   :  { %1933 = vmatmul.f32.gmra.mxu0 %v1869_v60 }
 0x7f0   :  { %v1872_v37 = vpop.f32.mrf.mxu3 }
 0x7f1   :  { %1936 = vmatmul.f32.gmra.mxu0 %v1872_v37  ;;  %v2025_v37 = vpop.xlane.xlu2 %2024 }
 0x7f2   :  { %vm2056_vm1 = vcmp.gt.f32.partialorder %v2025_v37, 0.0 }
 0x7f8   :  { %v1875_v11 = vpop.f32.mrf.mxu3 }
 0x7f9   :  { %1939 = vmatmul.f32.gmra.mxu0 %v1875_v11 }
 0x800   :  { %v1878_v47 = vpop.f32.mrf.mxu3 }
 0x801   :  { %1942 = vmatmul.f32.gmra.mxu0 %v1878_v47 }
 0x808   :  { %v1881_v28 = vpop.f32.mrf.mxu3 }
 0x809   :  { %1945 = vmatmul.f32.gmra.mxu0 %v1881_v28 }
 0x810   :  { %v1884_v61 = vpop.f32.mrf.mxu3 }
 0x811   :  { %1948 = vmatmul.f32.gmra.mxu0 %v1884_v61 }
 0x818   :  { %v1887_v0 = vpop.f32.mrf.mxu3 }
 0x819   :  { %1951 = vmatmul.f32.gmra.mxu0 %v1887_v0 }
 0x820   :  { %v1890_v45 = vpop.f32.mrf.mxu3 }
 0x821   :  { %1954 = vmatmul.f32.gmra.mxu0 %v1890_v45  ;;  %v2027_v45 = vpop.xlane.xlu0 %2026 }
 0x822   :  { %vm2057_vm3 = vcmp.gt.f32.partialorder %v2027_v45, 0.0 }
 0x828   :  { %v1893_v15 = vpop.f32.mrf.mxu3 }
 0x829   :  { %1957 = vmatmul.f32.gmra.mxu0 %v1893_v15 }
 0x830   :  { %v1896_v9 = vpop.f32.mrf.mxu3 }
 0x831   :  { %1960 = vmatmul.f32.gmra.mxu0 %v1896_v9 }
 0x838   :  { %v1899_v12 = vpop.f32.mrf.mxu3 }
 0x839   :  { %1963 = vmatmul.f32.gmra.mxu0 %v1899_v12 }
 0x840   :  { %v1902_v17 = vpop.f32.mrf.mxu3 }
 0x841   :  { %1966 = vmatmul.f32.gmra.mxu0 %v1902_v17 }
 0x848   :  { %v1905_v57 = vpop.f32.mrf.mxu3 }
 0x849   :  { %1969 = vmatmul.f32.gmra.mxu0 %v1905_v57 }
 0x850   :  { %v1908_v24 = vpop.f32.mrf.mxu3 }
 0x851   :  { %1972 = vmatmul.f32.gmra.mxu0 %v1908_v24 }
 0x856   :  { %v1928_v35 = vpop.f32.mrf.mxu0 }
 0x857   :  { %v1929_v60 = vadd.f32 %v4120_v52, %v1928_v35 }
 0x859   :  { %vm1976_vm0 = vcmp.ge.f32.partialorder %v1929_v60, 0.0  ;;  %v1992_v11 = vmul.f32 0.2, %v1929_v60 }
 0x85b   :  { %v2008_v47 = vsel %vm1976_vm0, %v1929_v60, %v1992_v11 }
 0x85c   :  { %v2072_v28 = vadd.f32 %v2008_v47, %v3380_v16  ;;  %v2029_v16 = vpop.xlane.xlu1 %2028 }
 0x85d   :  { %vm2058_vm5 = vcmp.gt.f32.partialorder %v2029_v16, 0.0 }
 0x85e   :  { %v2120_v61 = vsel %vm2056_vm1, %v2072_v28, %v3986_v40  ;;  %v1931_v0 = vpop.f32.mrf.mxu0 }
 0x85f   :  { %2136 = vst [vmem:[#allocation22] sm:$0xff] %v2120_v61  ;;  %v1932_v49 = vadd.f32 %v4120_v52, %v1931_v0  ;;  %2184 = vmatmul.f32.vlgmr.msrb.gmra.mxu1 %v2120_v61 }
 0x861   :  { %vm1977_vm2 = vcmp.ge.f32.partialorder %v1932_v49, 0.0  ;;  %v1993_v32 = vmul.f32 0.2, %v1932_v49 }
 0x863   :  { %v2009_v54 = vsel %vm1977_vm2, %v1932_v49, %v1993_v32 }
 0x864   :  { %v2073_v39 = vadd.f32 %v2009_v54, %v3387_v21  ;;  %v2031_v21 = vpop.xlane.xlu2 %2030 }
 0x865   :  { %vm2059_vm7 = vcmp.gt.f32.partialorder %v2031_v21, 0.0 }
 0x866   :  { %v1934_v23 = vpop.f32.mrf.mxu0  ;;  %v2121_v15 = vsel %vm2057_vm3, %v2073_v39, %v3992_v34 }
 0x867   :  { %v1935_v38 = vadd.f32 %v4120_v52, %v1934_v23  ;;  %2137 = vst [vmem:[#allocation22 + $0x8] sm:$0xff] %v2121_v15  ;;  %2187 = vmatmul.f32.gmra.mxu1 %v2121_v15 }
 0x869   :  { %vm1978_vm4 = vcmp.ge.f32.partialorder %v1935_v38, 0.0  ;;  %v1994_v40 = vmul.f32 0.2, %v1935_v38 }
 0x86b   :  { %v2010_v4 = vsel %vm1978_vm4, %v1935_v38, %v1994_v40 }
 0x86c   :  { %v2074_v44 = vadd.f32 %v2010_v4, %v3394_v30  ;;  %v2033_v30 = vpop.xlane.xlu0 %2032 }
 0x86d   :  { %vm2060_vm9 = vcmp.gt.f32.partialorder %v2033_v30, 0.0 }
 0x86e   :  { %v1937_v3 = vpop.f32.mrf.mxu0  ;;  %v2122_v9 = vsel %vm2058_vm5, %v2074_v44, %v3998_v13 }
 0x86f   :  { %v1938_v36 = vadd.f32 %v4120_v52, %v1937_v3  ;;  %2138 = vst [vmem:[#allocation22 + $0x10] sm:$0xff] %v2122_v9  ;;  %2190 = vmatmul.f32.gmra.mxu1 %v2122_v9 }
 0x871   :  { %vm1979_vm6 = vcmp.ge.f32.partialorder %v1938_v36, 0.0  ;;  %v1995_v34 = vmul.f32 0.2, %v1938_v36 }
 0x873   :  { %v2011_v42 = vsel %vm1979_vm6, %v1938_v36, %v1995_v34 }
 0x874   :  { %v2075_v26 = vadd.f32 %v2011_v42, %v4395_v58  ;;  %v2035_v58 = vpop.xlane.xlu1 %2034 }
 0x875   :  { %vm2061_vm11 = vcmp.gt.f32.partialorder %v2035_v58, 0.0 }
 0x876   :  { %v1940_v59 = vpop.f32.mrf.mxu0  ;;  %v2123_v12 = vsel %vm2059_vm7, %v2075_v26, %v4004_v20 }
 0x877   :  { %v1941_v8 = vadd.f32 %v4120_v52, %v1940_v59  ;;  %2139 = vst [vmem:[#allocation22 + $0x18] sm:$0xff] %v2123_v12  ;;  %2193 = vmatmul.f32.gmra.mxu1 %v2123_v12 }
 0x879   :  { %vm1980_vm8 = vcmp.ge.f32.partialorder %v1941_v8, 0.0  ;;  %v1996_v13 = vmul.f32 0.2, %v1941_v8 }
 0x87b   :  { %v2012_v48 = vsel %vm1980_vm8, %v1941_v8, %v1996_v13 }
 0x87c   :  { %v2076_v22 = vadd.f32 %v2012_v48, %v4397_v14  ;;  %v2037_v14 = vpop.xlane.xlu2 %2036 }
 0x87d   :  { %vm2062_vm13 = vcmp.gt.f32.partialorder %v2037_v14, 0.0 }
 0x87e   :  { %v1943_v17 = vpop.f32.mrf.mxu0  ;;  %v2124_v57 = vsel %vm2060_vm9, %v2076_v22, %v4010_v50 }
 0x87f   :  { %v1944_v24 = vadd.f32 %v4120_v52, %v1943_v17  ;;  %2140 = vst [vmem:[#allocation22 + $0x20] sm:$0xff] %v2124_v57  ;;  %2196 = vmatmul.f32.gmra.mxu1 %v2124_v57 }
 0x881   :  { %vm1981_vm10 = vcmp.ge.f32.partialorder %v1944_v24, 0.0  ;;  %v1997_v20 = vmul.f32 0.2, %v1944_v24 }
 0x883   :  { %v2013_v35 = vsel %vm1981_vm10, %v1944_v24, %v1997_v20 }
 0x884   :  { %v2077_v60 = vadd.f32 %v2013_v35, %v4399_v19  ;;  %v2039_v19 = vpop.xlane.xlu0 %2038 }
 0x885   :  { %vm2063_vm15 = vcmp.gt.f32.partialorder %v2039_v19, 0.0 }
 0x886   :  { %v1946_v37 = vpop.f32.mrf.mxu0  ;;  %v2125_v11 = vsel %vm2061_vm11, %v2077_v60, %v4016_v63 }
 0x887   :  { %v1947_v47 = vadd.f32 %v4120_v52, %v1946_v37  ;;  %2141 = vst [vmem:[#allocation22 + $0x28] sm:$0xff] %v2125_v11  ;;  %2199 = vmatmul.f32.gmra.mxu1 %v2125_v11 }
 0x889   :  { %vm1982_vm12 = vcmp.ge.f32.partialorder %v1947_v47, 0.0  ;;  %v1998_v50 = vmul.f32 0.2, %v1947_v47 }
 0x88b   :  { %v2014_v28 = vsel %vm1982_vm12, %v1947_v47, %v1998_v50 }
 0x88c   :  { %v2078_v61 = vadd.f32 %v2014_v28, %v4401_v25  ;;  %v2041_v25 = vpop.xlane.xlu1 %2040 }
 0x88d   :  { %vm2064_vm1 = vcmp.gt.f32.partialorder %v2041_v25, 0.0 }
 0x88e   :  { %v1949_v0 = vpop.f32.mrf.mxu0  ;;  %v2126_v49 = vsel %vm2062_vm13, %v2078_v61, %v4022_v18 }
 0x88f   :  { %v1950_v45 = vadd.f32 %v4120_v52, %v1949_v0  ;;  %2142 = vst [vmem:[#allocation22 + $0x30] sm:$0xff] %v2126_v49  ;;  %2202 = vmatmul.f32.gmra.mxu1 %v2126_v49 }
 0x891   :  { %vm1983_vm14 = vcmp.ge.f32.partialorder %v1950_v45, 0.0  ;;  %v1999_v63 = vmul.f32 0.2, %v1950_v45 }
 0x893   :  { %v2015_v32 = vsel %vm1983_vm14, %v1950_v45, %v1999_v63 }
 0x894   :  { %v2079_v54 = vadd.f32 %v2015_v32, %v4403_v53  ;;  %v2043_v53 = vpop.xlane.xlu2 %2042 }
 0x895   :  { %vm2065_vm3 = vcmp.gt.f32.partialorder %v2043_v53, 0.0 }
 0x896   :  { %v1952_v39 = vpop.f32.mrf.mxu0  ;;  %v2127_v23 = vsel %vm2063_vm15, %v2079_v54, %v4028_v5 }
 0x897   :  { %v1953_v15 = vadd.f32 %v4120_v52, %v1952_v39  ;;  %2143 = vst [vmem:[#allocation22 + $0x38] sm:$0xff] %v2127_v23  ;;  %2205 = vmatmul.f32.gmra.mxu1 %v2127_v23 }
 0x899   :  { %vm1984_vm0 = vcmp.ge.f32.partialorder %v1953_v15, 0.0  ;;  %v2000_v18 = vmul.f32 0.2, %v1953_v15 }
 0x89b   :  { %v2016_v38 = vsel %vm1984_vm0, %v1953_v15, %v2000_v18 }
 0x89c   :  { %v2080_v16 = vadd.f32 %v2016_v38, %v4429_v2  ;;  %v2045_v2 = vpop.xlane.xlu0 %2044 }
 0x89d   :  { %vm2066_vm5 = vcmp.gt.f32.partialorder %v2045_v2, 0.0  ;;  %v4448_v2 = vld [vmem:[#allocation74_spill] sm:$0xff] }
 0x89e   :  { %v1955_v40 = vpop.f32.mrf.mxu0  ;;  %v2128_v4 = vsel %vm2064_vm1, %v2080_v16, %v4034_v41 }
 0x89f   :  { %v1956_v44 = vadd.f32 %v4120_v52, %v1955_v40  ;;  %2144 = vst [vmem:[#allocation22 + $0x40] sm:$0xff] %v2128_v4  ;;  %2208 = vmatmul.f32.gmra.mxu1 %v2128_v4  ;;  %v4183_v4 = vld [vmem:[%s4283_s13] ss:$0 sm:$0xff] }
 0x8a1   :  { %vm1985_vm2 = vcmp.ge.f32.partialorder %v1956_v44, 0.0  ;;  %v2001_v5 = vmul.f32 0.2, %v1956_v44 }
 0x8a3   :  { %v2017_v3 = vsel %vm1985_vm2, %v1956_v44, %v2001_v5  ;;  %v4445_v44 = vld [vmem:[#allocation76_spill] sm:$0xff]  ;;  %v4446_v5 = vld [vmem:[#allocation75_spill] sm:$0xff] }
 0x8a4   :  { %v2081_v9 = vadd.f32 %v2017_v3, %v4431_v7  ;;  %v2047_v7 = vpop.xlane.xlu1 %2046  ;;  %v607_v53 = vadd.f32 %v4183_v4, %v4445_v44  ;;  %v604_v3 = vadd.f32 %v4183_v4, %v4446_v5 }
 0x8a5   :  { %vm2067_vm7 = vcmp.gt.f32.partialorder %v2047_v7, 0.0 }
 0x8a6   :  { %v1958_v36 = vpop.f32.mrf.mxu0  ;;  %v2129_v21 = vsel %vm2065_vm3, %v2081_v9, %v4040_v29  ;;  %v4447_v9 = vld [vmem:[#allocation77_spill] sm:$0xff] }
 0x8a7   :  { %v1959_v34 = vadd.f32 %v4120_v52, %v1958_v36  ;;  %2145 = vst [vmem:[#allocation22 + $0x48] sm:$0xff] %v2129_v21  ;;  %2211 = vmatmul.f32.gmra.mxu1 %v2129_v21  ;;  %v610_v36 = vadd.f32 %v4183_v4, %v4447_v9  ;;  %v4459_v9 = vld [vmem:[#allocation63_spill] sm:$0xff] }
 0x8a9   :  { %vm1986_vm4 = vcmp.ge.f32.partialorder %v1959_v34, 0.0  ;;  %v2002_v41 = vmul.f32 0.2, %v1959_v34 }
 0x8ab   :  { %v2018_v42 = vsel %vm1986_vm4, %v1959_v34, %v2002_v41  ;;  %v601_v41 = vadd.f32 %v4183_v4, %v4448_v2  ;;  %v4460_v2 = vld [vmem:[#allocation62_spill] sm:$0xff] }
 0x8ac   :  { %v2082_v26 = vadd.f32 %v2018_v42, %v4433_v10  ;;  %v2049_v10 = vpop.xlane.xlu2 %2048 }
 0x8ad   :  { %vm2068_vm9 = vcmp.gt.f32.partialorder %v2049_v10, 0.0  ;;  %v4451_v10 = vld [vmem:[#allocation71_spill] sm:$0xff] }
 0x8ae   :  { %v1961_v59 = vpop.f32.mrf.mxu0  ;;  %v2130_v12 = vsel %vm2066_vm5, %v2082_v26, %v4046_v33 }
 0x8af   :  { %v1962_v8 = vadd.f32 %v4120_v52, %v1961_v59  ;;  %2146 = vst [vmem:[#allocation22 + $0x50] sm:$0xff] %v2130_v12  ;;  %2214 = vmatmul.f32.gmra.mxu1 %v2130_v12  ;;  %v4449_v59 = vld [vmem:[#allocation73_spill] sm:$0xff] }
 0x8b0   :  { %v598_v12 = vadd.f32 %v4183_v4, %v4449_v59 }
 0x8b1   :  { %vm1987_vm6 = vcmp.ge.f32.partialorder %v1962_v8, 0.0  ;;  %v2003_v29 = vmul.f32 0.2, %v1962_v8 }
 0x8b3   :  { %v2019_v30 = vsel %vm1987_vm6, %v1962_v8, %v2003_v29 }
 0x8b4   :  { %v2083_v13 = vadd.f32 %v2019_v30, %v4435_v56  ;;  %v2051_v56 = vpop.xlane.xlu0 %2050  ;;  %v4450_v30 = vld [vmem:[#allocation72_spill] sm:$0xff] }
 0x8b5   :  { %vm2069_vm11 = vcmp.gt.f32.partialorder %v2051_v56, 0.0 }
 0x8b6   :  { %v1964_v48 = vpop.f32.mrf.mxu0  ;;  %v2131_v22 = vsel %vm2067_vm7, %v2083_v13, %v4052_v6  ;;  %v595_v13 = vadd.f32 %v4183_v4, %v4450_v30 }
 0x8b7   :  { %v1965_v17 = vadd.f32 %v4120_v52, %v1964_v48  ;;  %2147 = vst [vmem:[#allocation22 + $0x58] sm:$0xff] %v2131_v22  ;;  %2217 = vmatmul.f32.gmra.mxu1 %v2131_v22 }
 0x8b9   :  { %vm1988_vm8 = vcmp.ge.f32.partialorder %v1965_v17, 0.0  ;;  %v2004_v33 = vmul.f32 0.2, %v1965_v17 }
 0x8bb   :  { %v2020_v57 = vsel %vm1988_vm8, %v1965_v17, %v2004_v33  ;;  %v592_v33 = vadd.f32 %v4183_v4, %v4451_v10  ;;  %v2302_v10 = vld [vmem:[#allocation20 + $0x28] sm:$0xff] }
 0x8bc   :  { %v2084_v24 = vadd.f32 %v2020_v57, %v4437_v27  ;;  %v2053_v27 = vpop.xlane.xlu1 %2052 }
 0x8bd   :  { %vm2070_vm13 = vcmp.gt.f32.partialorder %v2053_v27, 0.0 }
 0x8be   :  { %v1967_v58 = vpop.f32.mrf.mxu0  ;;  %v2132_v20 = vsel %vm2068_vm9, %v2084_v24, %v4058_v62 }
 0x8bf   :  { %v1968_v35 = vadd.f32 %v4120_v52, %v1967_v58  ;;  %2148 = vst [vmem:[#allocation22 + $0x60] sm:$0xff] %v2132_v20  ;;  %2220 = vmatmul.f32.gmra.mxu1 %v2132_v20  ;;  %v4452_v20 = vld [vmem:[#allocation70_spill] sm:$0xff] }
 0x8c1   :  { %vm1989_vm10 = vcmp.ge.f32.partialorder %v1968_v35, 0.0  ;;  %v2005_v6 = vmul.f32 0.2, %v1968_v35 }
 0x8c3   :  { %v2021_v60 = vsel %vm1989_vm10, %v1968_v35, %v2005_v6  ;;  %v589_v35 = vadd.f32 %v4183_v4, %v4452_v20  ;;  %v2408_v20 = vld [vmem:[#allocation19 + $0x70] sm:$0xff] }
 0x8c4   :  { %v2085_v37 = vadd.f32 %v2021_v60, %v4439_v51  ;;  %v2055_v51 = vpop.xlane.xlu2 %2054 }
 0x8c5   :  { %vm2071_vm15 = vcmp.gt.f32.partialorder %v2055_v51, 0.0 }
 0x8c6   :  { %v1970_v11 = vpop.f32.mrf.mxu0  ;;  %v2133_v47 = vsel %vm2069_vm11, %v2085_v37, %v4064_v31  ;;  %v4453_v37 = vld [vmem:[#allocation69_spill] sm:$0xff] }
 0x8c7   :  { %v1971_v14 = vadd.f32 %v4120_v52, %v1970_v11  ;;  %2149 = vst [vmem:[#allocation22 + $0x68] sm:$0xff] %v2133_v47  ;;  %2223 = vmatmul.f32.gmra.mxu1 %v2133_v47  ;;  %v586_v11 = vadd.f32 %v4183_v4, %v4453_v37  ;;  %v2404_v37 = vld [vmem:[#allocation19 + $0x50] sm:$0xff] }
 0x8c9   :  { %vm1990_vm12 = vcmp.ge.f32.partialorder %v1971_v14, 0.0  ;;  %v2006_v62 = vmul.f32 0.2, %v1971_v14 }
 0x8cb   :  { %v2022_v50 = vsel %vm1990_vm12, %v1971_v14, %v2006_v62  ;;  %v4454_v62 = vld [vmem:[#allocation68_spill] sm:$0xff] }
 0x8cc   :  { %v2086_v28 = vadd.f32 %v2022_v50, %v4441_v1  ;;  %v583_v50 = vadd.f32 %v4183_v4, %v4454_v62  ;;  %v2400_v62 = vld [vmem:[#allocation19 + $0x30] sm:$0xff] }
 0x8ce   :  { %v1973_v61 = vpop.f32.mrf.mxu0  ;;  %v2134_v0 = vsel %vm2070_vm13, %v2086_v28, %v4070_v55 }
 0x8cf   :  { %v1974_v49 = vadd.f32 %v4120_v52, %v1973_v61  ;;  %2150 = vst [vmem:[#allocation22 + $0x70] sm:$0xff] %v2134_v0  ;;  %2226 = vmatmul.f32.gmra.mxu1 %v2134_v0 }
 0x8d1   :  { %vm1991_vm14 = vcmp.ge.f32.partialorder %v1974_v49, 0.0  ;;  %v2007_v31 = vmul.f32 0.2, %v1974_v49 }
 0x8d3   :  { %v2023_v45 = vsel %vm1991_vm14, %v1974_v49, %v2007_v31  ;;  %v4455_v49 = vld [vmem:[#allocation67_spill] sm:$0xff] }
 0x8d4   :  { %v2087_v19 = vadd.f32 %v2023_v45, %v4443_v43  ;;  %v580_v51 = vadd.f32 %v4183_v4, %v4455_v49  ;;  %v2396_v49 = vld [vmem:[#allocation19 + $0x10] sm:$0xff] }
 0x8d6   :  { %v2135_v63 = vsel %vm2071_vm15, %v2087_v19, %v4076_v46 }
 0x8d7   :  { %2151 = vst [vmem:[#allocation22 + $0x78] sm:$0xff] %v2135_v63  ;;  %2229 = vmatmul.f32.gmra.mxu1 %v2135_v63  ;;  %v4456_v63 = vld [vmem:[#allocation66_spill] sm:$0xff] }
 0x8d8   :  { %2561 = dma.vmem_to_hbm [thread:$0]  %s2554_s19, 2048, %s2556_s22, [#allocation4], %s3048_s28, %s3048_s28, %s3049_s4  }
 0x8dc   :  { %v4170_v32 = vpop.f32.mrf.mxu1 }
 0x8e4   :  { %v4172_v1 = vpop.f32.mrf.mxu1 }
 0x8ec   :  { %v4174_v55 = vpop.f32.mrf.mxu1 }
 0x8f4   :  { %v4176_v52 = vpop.f32.mrf.mxu1 }
 0x8fc   :  { %v4178_v54 = vpop.f32.mrf.mxu1 }
 0x904   :  { %v2200_v39 = vpop.f32.mrf.mxu1 }
 0x90c   :  { %v2203_v23 = vpop.f32.mrf.mxu1 }
 0x90d   :  { %v2239_v31 = vadd.f32 %v2203_v23, %v583_v50  ;;  %v4458_v23 = vld [vmem:[#allocation64_spill] sm:$0xff]  ;;  %v2308_v50 = vld [vmem:[#allocation20 + $0x58] sm:$0xff] }
 0x90f   :  { %vm2255_vm9 = vcmp.ge.f32.partialorder %v2239_v31, 0.0 }
 0x914   :  { %v2206_v15 = vpop.f32.mrf.mxu1 }
 0x915   :  { %v2240_v28 = vadd.f32 %v2206_v15, %v586_v11  ;;  %v4457_v15 = vld [vmem:[#allocation65_spill] sm:$0xff]  ;;  %v2307_v11 = vld [vmem:[#allocation20 + $0x50] sm:$0xff] }
 0x917   :  { %vm2256_vm8 = vcmp.ge.f32.partialorder %v2240_v28, 0.0 }
 0x91c   :  { %v2209_v25 = vpop.f32.mrf.mxu1 }
 0x91d   :  { %v2241_v47 = vadd.f32 %v2209_v25, %v589_v35  ;;  %v577_v25 = vadd.f32 %v4183_v4, %v4456_v63  ;;  %v2306_v35 = vld [vmem:[#allocation20 + $0x48] sm:$0xff]  ;;  %v2311_v63 = vld [vmem:[#allocation20 + $0x70] sm:$0xff] }
 0x91f   :  { %v2273_v45 = vmul.f32 0.2, %v2241_v47  ;;  %vm2257_vm7 = vcmp.ge.f32.partialorder %v2241_v47, 0.0 }
 0x921   :  { %v2289_v44 = vsel %vm2257_vm7, %v2241_v47, %v2273_v45  ;;  %v2403_v47 = vld [vmem:[#allocation19 + $0x48] sm:$0xff]  ;;  %v2394_v45 = vld [vmem:[#allocation19] sm:$0xff] }
 0x924   :  { %v2212_v18 = vpop.f32.mrf.mxu1 }
 0x925   :  { %v2242_v56 = vadd.f32 %v2212_v18, %v592_v33  ;;  %v2238_v18 = vadd.f32 %v2200_v39, %v580_v51  ;;  %v2303_v33 = vld [vmem:[#allocation20 + $0x30] sm:$0xff]  ;;  %v2309_v51 = vld [vmem:[#allocation20 + $0x60] sm:$0xff] }
 0x927   :  { %v2274_v61 = vmul.f32 0.2, %v2242_v56  ;;  %vm2258_vm6 = vcmp.ge.f32.partialorder %v2242_v56, 0.0  ;;  %vm2254_vm10 = vcmp.ge.f32.partialorder %v2238_v18, 0.0 }
 0x92c   :  { %v2215_v43 = vpop.f32.mrf.mxu1 }
 0x92d   :  { %v2243_v57 = vadd.f32 %v2215_v43, %v595_v13  ;;  %v2272_v43 = vmul.f32 0.2, %v2240_v28 }
 0x92f   :  { %v2275_v14 = vmul.f32 0.2, %v2243_v57  ;;  %vm2259_vm5 = vcmp.ge.f32.partialorder %v2243_v57, 0.0  ;;  %v2288_v39 = vsel %vm2256_vm8, %v2240_v28, %v2272_v43  ;;  %v2399_v28 = vld [vmem:[#allocation19 + $0x28] sm:$0xff] }
 0x931   :  { %v2291_v19 = vsel %vm2259_vm5, %v2243_v57, %v2275_v14  ;;  %v2304_v57 = vld [vmem:[#allocation20 + $0x38] sm:$0xff]  ;;  %v2402_v14 = vld [vmem:[#allocation19 + $0x40] sm:$0xff] }
 0x934   :  { %v2218_v38 = vpop.f32.mrf.mxu1 }
 0x935   :  { %v2244_v48 = vadd.f32 %v2218_v38, %v598_v12  ;;  %v2290_v38 = vsel %vm2258_vm6, %v2242_v56, %v2274_v61  ;;  %v2407_v56 = vld [vmem:[#allocation19 + $0x68] sm:$0xff]  ;;  %v2398_v61 = vld [vmem:[#allocation19 + $0x20] sm:$0xff] }
 0x937   :  { %v2276_v6 = vmul.f32 0.2, %v2244_v48  ;;  %vm2260_vm4 = vcmp.ge.f32.partialorder %v2244_v48, 0.0 }
 0x939   :  { %v2292_v0 = vsel %vm2260_vm4, %v2244_v48, %v2276_v6  ;;  %v2298_v48 = vld [vmem:[#allocation20 + $0x8] sm:$0xff]  ;;  %v2406_v6 = vld [vmem:[#allocation19 + $0x60] sm:$0xff] }
 0x93c   :  { %v2221_v46 = vpop.f32.mrf.mxu1 }
 0x93d   :  { %v2245_v8 = vadd.f32 %v2221_v46, %v601_v41  ;;  %v574_v46 = vadd.f32 %v4183_v4, %v4457_v15  ;;  %v565_v41 = vadd.f32 %v4183_v4, %v4460_v2 }
 0x93f   :  { %v2277_v24 = vmul.f32 0.2, %v2245_v8  ;;  %vm2261_vm3 = vcmp.ge.f32.partialorder %v2245_v8, 0.0  ;;  %v2236_v5 = vadd.f32 %v4176_v52, %v574_v46  ;;  %v2233_v59 = vadd.f32 %v4170_v32, %v565_v41  ;;  %v2299_v32 = vld [vmem:[#allocation20 + $0x10] sm:$0xff] }
 0x941   :  { %v2293_v27 = vsel %vm2261_vm3, %v2245_v8, %v2277_v24  ;;  %vm2252_vm12 = vcmp.ge.f32.partialorder %v2236_v5, 0.0  ;;  %vm2249_vm15 = vcmp.ge.f32.partialorder %v2233_v59, 0.0  ;;  %v2305_v24 = vld [vmem:[#allocation20 + $0x40] sm:$0xff] }
 0x944   :  { %v2224_v16 = vpop.f32.mrf.mxu1 }
 0x945   :  { %v2246_v42 = vadd.f32 %v2224_v16, %v604_v3  ;;  %v2237_v16 = vadd.f32 %v4178_v54, %v577_v25  ;;  %v2270_v3 = vmul.f32 0.2, %v2238_v18  ;;  %v2312_v25 = vld [vmem:[#allocation20 + $0x78] sm:$0xff] }
 0x947   :  { %v2278_v22 = vmul.f32 0.2, %v2246_v42  ;;  %vm2262_vm2 = vcmp.ge.f32.partialorder %v2246_v42, 0.0  ;;  %vm2253_vm11 = vcmp.ge.f32.partialorder %v2237_v16, 0.0  ;;  %v2286_v52 = vsel %vm2254_vm10, %v2238_v18, %v2270_v3 }
 0x949   :  { %v2294_v60 = vsel %vm2262_vm2, %v2246_v42, %v2278_v22  ;;  %v2300_v22 = vld [vmem:[#allocation20 + $0x18] sm:$0xff] }
 0x94c   :  { %v2227_v40 = vpop.f32.mrf.mxu1 }
 0x94d   :  { %v2247_v21 = vadd.f32 %v2227_v40, %v607_v53  ;;  %v2271_v40 = vmul.f32 0.2, %v2239_v31  ;;  %v571_v53 = vadd.f32 %v4183_v4, %v4458_v23 }
 0x94f   :  { %v2279_v7 = vmul.f32 0.2, %v2247_v21  ;;  %vm2263_vm1 = vcmp.ge.f32.partialorder %v2247_v21, 0.0  ;;  %v2287_v54 = vsel %vm2255_vm9, %v2239_v31, %v2271_v40  ;;  %v2395_v31 = vld [vmem:[#allocation19 + $0x8] sm:$0xff] }
 0x951   :  { %v2295_v58 = vsel %vm2263_vm1, %v2247_v21, %v2279_v7  ;;  %v2235_v21 = vadd.f32 %v4174_v55, %v571_v53 }
 0x953   :  { %v2267_v12 = vmul.f32 0.2, %v2235_v21  ;;  %vm2251_vm13 = vcmp.ge.f32.partialorder %v2235_v21, 0.0 }
 0x954   :  { %v2230_v34 = vpop.f32.mrf.mxu1 }
 0x955   :  { %v2248_v26 = vadd.f32 %v2230_v34, %v610_v36  ;;  %v568_v36 = vadd.f32 %v4183_v4, %v4459_v9  ;;  %v2269_v34 = vmul.f32 0.2, %v2237_v16  ;;  %v2283_v30 = vsel %vm2251_vm13, %v2235_v21, %v2267_v12 }
 0x957   :  { %vm2264_vm0 = vcmp.ge.f32.partialorder %v2248_v26, 0.0  ;;  %v2280_v29 = vmul.f32 0.2, %v2248_v26  ;;  %v2234_v42 = vadd.f32 %v4172_v1, %v568_v36  ;;  %v2285_v8 = vsel %vm2253_vm11, %v2237_v16, %v2269_v34  ;;  %v2297_v1 = vld [vmem:[#allocation20] sm:$0xff] }
 0x959   :  { %v2296_v17 = vsel %vm2264_vm0, %v2248_v26, %v2280_v29  ;;  %v2268_v26 = vmul.f32 0.2, %v2236_v5  ;;  %v2266_v55 = vmul.f32 0.2, %v2234_v42  ;;  %vm2250_vm14 = vcmp.ge.f32.partialorder %v2234_v42, 0.0 }
 0x95a   :  { %2313 = vmatpush.msrb.mxu2 %v2296_v17  ;;  %v2265_v29 = vmul.f32 0.2, %v2233_v59  ;;  %v2301_v17 = vld [vmem:[#allocation20 + $0x20] sm:$0xff] }
 0x95b   :  { %v2284_v7 = vsel %vm2252_vm12, %v2236_v5, %v2268_v26  ;;  %v2282_v4 = vsel %vm2250_vm14, %v2234_v42, %v2266_v55 }
 0x95c   :  { %2314 = vmatpush.msrb.mxu2 %v2295_v58  ;;  %v2281_v13 = vsel %vm2249_vm15, %v2233_v59, %v2265_v29  ;;  %v2409_v58 = vld [vmem:[#allocation19 + $0x78] sm:$0xff] }
 0x95d   :  { %2414 = vmatpush.msrb.mxu3 %v2409_v58 }
 0x95e   :  { %2315 = vmatpush.msrb.mxu2 %v2294_v60  ;;  %v2405_v60 = vld [vmem:[#allocation19 + $0x58] sm:$0xff] }
 0x95f   :  { %2415 = vmatpush.msrb.mxu3 %v2408_v20 }
 0x960   :  { %2316 = vmatpush.msrb.mxu2 %v2293_v27  ;;  %v2401_v27 = vld [vmem:[#allocation19 + $0x38] sm:$0xff] }
 0x961   :  { %2416 = vmatpush.msrb.mxu3 %v2407_v56 }
 0x962   :  { %2317 = vmatpush.msrb.mxu2 %v2292_v0  ;;  %v2397_v0 = vld [vmem:[#allocation19 + $0x18] sm:$0xff] }
 0x963   :  { %2417 = vmatpush.msrb.mxu3 %v2406_v6 }
 0x964   :  { %2318 = vmatpush.msrb.mxu2 %v2291_v19  ;;  %v2310_v19 = vld [vmem:[#allocation20 + $0x68] sm:$0xff] }
 0x965   :  { %2418 = vmatpush.msrb.mxu3 %v2405_v60 }
 0x966   :  { %2319 = vmatpush.msrb.mxu2 %v2290_v38 }
 0x967   :  { %2419 = vmatpush.msrb.mxu3 %v2404_v37 }
 0x968   :  { %2320 = vmatpush.msrb.mxu2 %v2289_v44 }
 0x969   :  { %2420 = vmatpush.msrb.mxu3 %v2403_v47 }
 0x96a   :  { %2321 = vmatpush.msrb.mxu2 %v2288_v39 }
 0x96b   :  { %2421 = vmatpush.msrb.mxu3 %v2402_v14 }
 0x96c   :  { %2322 = vmatpush.msrb.mxu2 %v2287_v54 }
 0x96d   :  { %2422 = vmatpush.msrb.mxu3 %v2401_v27 }
 0x96e   :  { %2323 = vmatpush.msrb.mxu2 %v2286_v52 }
 0x96f   :  { %2423 = vmatpush.msrb.mxu3 %v2400_v62 }
 0x970   :  { %2324 = vmatpush.msrb.mxu2 %v2285_v8 }
 0x971   :  { %2424 = vmatpush.msrb.mxu3 %v2399_v28 }
 0x972   :  { %2325 = vmatpush.msrb.mxu2 %v2284_v7 }
 0x973   :  { %2425 = vmatpush.msrb.mxu3 %v2398_v61 }
 0x974   :  { %2326 = vmatpush.msrb.mxu2 %v2283_v30 }
 0x975   :  { %2426 = vmatpush.msrb.mxu3 %v2397_v0 }
 0x976   :  { %2327 = vmatpush.msrb.mxu2 %v2282_v4 }
 0x977   :  { %2427 = vmatpush.msrb.mxu3 %v2396_v49 }
 0x978   :  { %2328 = vmatpush.msrb.mxu2 %v2281_v13 }
 0x979   :  { %2329 = vmatmul.f32.vlgmr.msrb.gmra.mxu2 %v2297_v1  ;;  %2428 = vmatpush.msrb.mxu3 %v2395_v31  ;;  %v4231_v1 = vld [vmem:[%s4285_s15] ss:$0 sm:$0xff]  ;;  %s3062_s15 = smov [#allocation23]  }
 0x97a   :  { %s2566_s16 = sshll.u32 %s3062_s15, 4  ;;  %s2567_s16 = int_to_ptr.vmem [resolvable:$true] %s2566_s16 }
 0x97b   :  { %2429 = vmatpush.msrb.mxu3 %v2394_v45 }
 0x981   :  { %2332 = vmatmul.f32.gmra.mxu2 %v2298_v48 }
 0x989   :  { %2335 = vmatmul.f32.gmra.mxu2 %v2299_v32 }
 0x991   :  { %2338 = vmatmul.f32.gmra.mxu2 %v2300_v22 }
 0x999   :  { %2341 = vmatmul.f32.gmra.mxu2 %v2301_v17 }
 0x9a1   :  { %2344 = vmatmul.f32.gmra.mxu2 %v2302_v10 }
 0x9a9   :  { %2347 = vmatmul.f32.gmra.mxu2 %v2303_v33 }
 0x9b1   :  { %2350 = vmatmul.f32.gmra.mxu2 %v2304_v57 }
 0x9b9   :  { %2353 = vmatmul.f32.gmra.mxu2 %v2305_v24 }
 0x9c1   :  { %2356 = vmatmul.f32.gmra.mxu2 %v2306_v35 }
 0x9c9   :  { %2359 = vmatmul.f32.gmra.mxu2 %v2307_v11 }
 0x9d1   :  { %2362 = vmatmul.f32.gmra.mxu2 %v2308_v50 }
 0x9d9   :  { %2365 = vmatmul.f32.gmra.mxu2 %v2309_v51 }
 0x9e1   :  { %2368 = vmatmul.f32.gmra.mxu2 %v2310_v19 }
 0x9e9   :  { %2371 = vmatmul.f32.gmra.mxu2 %v2311_v63 }
 0x9f1   :  { %2374 = vmatmul.f32.gmra.mxu2 %v2312_v25 }
 0x9fc   :  { %v2330_v18 = vpop.f32.mrf.mxu2 }
 0x9fd   :  { %2378 = vst [vmem:[#allocation23] sm:$0xff] %v2330_v18  ;;  %2430 = vmatmul.f32.vlgmr.msrb.gmra.mxu3 %v2330_v18 }
 0xa04   :  { %v2333_v43 = vpop.f32.mrf.mxu2 }
 0xa05   :  { %2379 = vst [vmem:[#allocation23 + $0x8] sm:$0xff] %v2333_v43  ;;  %2433 = vmatmul.f32.gmra.mxu3 %v2333_v43 }
 0xa0c   :  { %v2336_v38 = vpop.f32.mrf.mxu2 }
 0xa0d   :  { %2380 = vst [vmem:[#allocation23 + $0x10] sm:$0xff] %v2336_v38  ;;  %2436 = vmatmul.f32.gmra.mxu3 %v2336_v38 }
 0xa14   :  { %v2339_v15 = vpop.f32.mrf.mxu2 }
 0xa15   :  { %2381 = vst [vmem:[#allocation23 + $0x18] sm:$0xff] %v2339_v15  ;;  %2439 = vmatmul.f32.gmra.mxu3 %v2339_v15 }
 0xa1c   :  { %v2342_v46 = vpop.f32.mrf.mxu2 }
 0xa1d   :  { %2382 = vst [vmem:[#allocation23 + $0x20] sm:$0xff] %v2342_v46  ;;  %2442 = vmatmul.f32.gmra.mxu3 %v2342_v46 }
 0xa24   :  { %v2345_v16 = vpop.f32.mrf.mxu2 }
 0xa25   :  { %2383 = vst [vmem:[#allocation23 + $0x28] sm:$0xff] %v2345_v16  ;;  %2445 = vmatmul.f32.gmra.mxu3 %v2345_v16 }
 0xa2c   :  { %v2348_v40 = vpop.f32.mrf.mxu2 }
 0xa2d   :  { %2384 = vst [vmem:[#allocation23 + $0x30] sm:$0xff] %v2348_v40  ;;  %2448 = vmatmul.f32.gmra.mxu3 %v2348_v40 }
 0xa34   :  { %v2351_v44 = vpop.f32.mrf.mxu2 }
 0xa35   :  { %2385 = vst [vmem:[#allocation23 + $0x38] sm:$0xff] %v2351_v44  ;;  %2451 = vmatmul.f32.gmra.mxu3 %v2351_v44 }
 0xa3c   :  { %v2354_v23 = vpop.f32.mrf.mxu2 }
 0xa3d   :  { %2386 = vst [vmem:[#allocation23 + $0x40] sm:$0xff] %v2354_v23  ;;  %2454 = vmatmul.f32.gmra.mxu3 %v2354_v23 }
 0xa44   :  { %v2357_v53 = vpop.f32.mrf.mxu2 }
 0xa45   :  { %2387 = vst [vmem:[#allocation23 + $0x48] sm:$0xff] %v2357_v53  ;;  %2457 = vmatmul.f32.gmra.mxu3 %v2357_v53 }
 0xa4c   :  { %v2360_v5 = vpop.f32.mrf.mxu2 }
 0xa4d   :  { %2388 = vst [vmem:[#allocation23 + $0x50] sm:$0xff] %v2360_v5  ;;  %2460 = vmatmul.f32.gmra.mxu3 %v2360_v5 }
 0xa54   :  { %v2363_v3 = vpop.f32.mrf.mxu2 }
 0xa55   :  { %2389 = vst [vmem:[#allocation23 + $0x58] sm:$0xff] %v2363_v3  ;;  %2463 = vmatmul.f32.gmra.mxu3 %v2363_v3 }
 0xa5c   :  { %v2366_v39 = vpop.f32.mrf.mxu2 }
 0xa5d   :  { %2390 = vst [vmem:[#allocation23 + $0x60] sm:$0xff] %v2366_v39  ;;  %2466 = vmatmul.f32.gmra.mxu3 %v2366_v39 }
 0xa64   :  { %v2369_v9 = vpop.f32.mrf.mxu2 }
 0xa65   :  { %2391 = vst [vmem:[#allocation23 + $0x68] sm:$0xff] %v2369_v9  ;;  %2469 = vmatmul.f32.gmra.mxu3 %v2369_v9 }
 0xa6c   :  { %v2372_v36 = vpop.f32.mrf.mxu2 }
 0xa6d   :  { %2392 = vst [vmem:[#allocation23 + $0x70] sm:$0xff] %v2372_v36  ;;  %2472 = vmatmul.f32.gmra.mxu3 %v2372_v36 }
 0xa74   :  { %v2375_v21 = vpop.f32.mrf.mxu2 }
 0xa75   :  { %2393 = vst [vmem:[#allocation23 + $0x78] sm:$0xff] %v2375_v21  ;;  %2475 = vmatmul.f32.gmra.mxu3 %v2375_v21 }
 0xa76   :  { %2574 = dma.vmem_to_hbm [thread:$0]  %s2567_s16, 2048, %s2569_s7, [#allocation24], %s3048_s28, %s3048_s28, %s3049_s4  }
 0xa80   :  { %v4222_v34 = vpop.f32.mrf.mxu3 }
 0xa81   :  { %v2432_v23 = vadd.f32 %v4231_v1, %v4222_v34  ;;  %v2527_v34 = vld [vmem:[%s4287_s17] sm:$0xff]  ;;  %s3064_s17 = smov [#allocation25]  }
 0xa82   :  { %s2580_s2 = sshll.u32 %s3064_s17, 4  ;;  %s2581_s2 = int_to_ptr.vmem [resolvable:$true] %s2580_s2 }
 0xa83   :  { %v2495_v9 = vmul.f32 0.2, %v2432_v23  ;;  %vm2479_vm15 = vcmp.ge.f32.partialorder %v2432_v23, 0.0 }
 0xa88   :  { %v4224_v54 = vpop.f32.mrf.mxu3 }
 0xa89   :  { %v2435_v16 = vadd.f32 %v4231_v1, %v4224_v54  ;;  %v2511_v54 = vsel %vm2479_vm15, %v2432_v23, %v2495_v9 }
 0xa8b   :  { %v2496_v3 = vmul.f32 0.2, %v2435_v16  ;;  %vm2480_vm14 = vcmp.ge.f32.partialorder %v2435_v16, 0.0 }
 0xa8d   :  { %v2512_v21 = vsel %vm2480_vm14, %v2435_v16, %v2496_v3 }
 0xa90   :  { %v4226_v2 = vpop.f32.mrf.mxu3 }
 0xa91   :  { %v2438_v38 = vadd.f32 %v4231_v1, %v4226_v2 }
 0xa93   :  { %v2497_v53 = vmul.f32 0.2, %v2438_v38  ;;  %vm2481_vm13 = vcmp.ge.f32.partialorder %v2438_v38, 0.0 }
 0xa95   :  { %v2513_v36 = vsel %vm2481_vm13, %v2438_v38, %v2497_v53 }
 0xa98   :  { %v2440_v41 = vpop.f32.mrf.mxu3 }
 0xa99   :  { %v2441_v25 = vadd.f32 %v4231_v1, %v2440_v41 }
 0xa9b   :  { %v2498_v40 = vmul.f32 0.2, %v2441_v25  ;;  %vm2482_vm12 = vcmp.ge.f32.partialorder %v2441_v25, 0.0 }
 0xa9d   :  { %v2514_v39 = vsel %vm2482_vm12, %v2441_v25, %v2498_v40 }
 0xaa0   :  { %v2443_v42 = vpop.f32.mrf.mxu3 }
 0xaa1   :  { %v2444_v45 = vadd.f32 %v4231_v1, %v2443_v42 }
 0xaa3   :  { %v2499_v15 = vmul.f32 0.2, %v2444_v45  ;;  %vm2483_vm11 = vcmp.ge.f32.partialorder %v2444_v45, 0.0 }
 0xaa5   :  { %v2515_v5 = vsel %vm2483_vm11, %v2444_v45, %v2499_v15 }
 0xaa8   :  { %v2446_v26 = vpop.f32.mrf.mxu3 }
 0xaa9   :  { %v2447_v49 = vadd.f32 %v4231_v1, %v2446_v26 }
 0xaab   :  { %v2500_v18 = vmul.f32 0.2, %v2447_v49  ;;  %vm2484_vm10 = vcmp.ge.f32.partialorder %v2447_v49, 0.0 }
 0xaad   :  { %v2516_v44 = vsel %vm2484_vm10, %v2447_v49, %v2500_v18 }
 0xab0   :  { %v2449_v52 = vpop.f32.mrf.mxu3 }
 0xab1   :  { %v2450_v28 = vadd.f32 %v4231_v1, %v2449_v52 }
 0xab3   :  { %v2501_v19 = vmul.f32 0.2, %v2450_v28  ;;  %vm2485_vm9 = vcmp.ge.f32.partialorder %v2450_v28, 0.0 }
 0xab5   :  { %v2517_v46 = vsel %vm2485_vm9, %v2450_v28, %v2501_v19 }
 0xab8   :  { %v2452_v59 = vpop.f32.mrf.mxu3 }
 0xab9   :  { %v2453_v27 = vadd.f32 %v4231_v1, %v2452_v59 }
 0xabb   :  { %v2502_v51 = vmul.f32 0.2, %v2453_v27  ;;  %vm2486_vm8 = vcmp.ge.f32.partialorder %v2453_v27, 0.0 }
 0xabd   :  { %v2518_v43 = vsel %vm2486_vm8, %v2453_v27, %v2502_v51 }
 0xac0   :  { %v2455_v12 = vpop.f32.mrf.mxu3 }
 0xac1   :  { %v2456_v11 = vadd.f32 %v4231_v1, %v2455_v12 }
 0xac3   :  { %v2503_v61 = vmul.f32 0.2, %v2456_v11  ;;  %vm2487_vm7 = vcmp.ge.f32.partialorder %v2456_v11, 0.0 }
 0xac5   :  { %v2519_v63 = vsel %vm2487_vm7, %v2456_v11, %v2503_v61 }
 0xac8   :  { %v2458_v8 = vpop.f32.mrf.mxu3 }
 0xac9   :  { %v2459_v6 = vadd.f32 %v4231_v1, %v2458_v8 }
 0xacb   :  { %v2504_v62 = vmul.f32 0.2, %v2459_v6  ;;  %vm2488_vm6 = vcmp.ge.f32.partialorder %v2459_v6, 0.0 }
 0xacd   :  { %v2520_v31 = vsel %vm2488_vm6, %v2459_v6, %v2504_v62 }
 0xad0   :  { %v2461_v55 = vpop.f32.mrf.mxu3 }
 0xad1   :  { %v2462_v20 = vadd.f32 %v4231_v1, %v2461_v55 }
 0xad3   :  { %v2505_v47 = vmul.f32 0.2, %v2462_v20  ;;  %vm2489_vm5 = vcmp.ge.f32.partialorder %v2462_v20, 0.0 }
 0xad5   :  { %v2521_v0 = vsel %vm2489_vm5, %v2462_v20, %v2505_v47 }
 0xad8   :  { %v2464_v7 = vpop.f32.mrf.mxu3 }
 0xad9   :  { %v2465_v57 = vadd.f32 %v4231_v1, %v2464_v7 }
 0xadb   :  { %v2506_v60 = vmul.f32 0.2, %v2465_v57  ;;  %vm2490_vm4 = vcmp.ge.f32.partialorder %v2465_v57, 0.0 }
 0xadd   :  { %v2522_v50 = vsel %vm2490_vm4, %v2465_v57, %v2506_v60 }
 0xae0   :  { %v2467_v29 = vpop.f32.mrf.mxu3 }
 0xae1   :  { %v2468_v17 = vadd.f32 %v4231_v1, %v2467_v29 }
 0xae3   :  { %v2507_v35 = vmul.f32 0.2, %v2468_v17  ;;  %vm2491_vm3 = vcmp.ge.f32.partialorder %v2468_v17, 0.0 }
 0xae5   :  { %v2523_v14 = vsel %vm2491_vm3, %v2468_v17, %v2507_v35 }
 0xae8   :  { %v2470_v30 = vpop.f32.mrf.mxu3 }
 0xae9   :  { %v2471_v32 = vadd.f32 %v4231_v1, %v2470_v30 }
 0xaeb   :  { %v2508_v24 = vmul.f32 0.2, %v2471_v32  ;;  %vm2492_vm2 = vcmp.ge.f32.partialorder %v2471_v32, 0.0 }
 0xaed   :  { %v2524_v37 = vsel %vm2492_vm2, %v2471_v32, %v2508_v24 }
 0xaf0   :  { %v2473_v4 = vpop.f32.mrf.mxu3 }
 0xaf1   :  { %v2474_v13 = vadd.f32 %v4231_v1, %v2473_v4 }
 0xaf3   :  { %v2509_v10 = vmul.f32 0.2, %v2474_v13  ;;  %vm2493_vm1 = vcmp.ge.f32.partialorder %v2474_v13, 0.0 }
 0xaf5   :  { %v2525_v56 = vsel %vm2493_vm1, %v2474_v13, %v2509_v10 }
 0xaf8   :  { %v2476_v48 = vpop.f32.mrf.mxu3 }
 0xaf9   :  { %v2477_v22 = vadd.f32 %v4231_v1, %v2476_v48 }
 0xafb   :  { %vm2494_vm0 = vcmp.ge.f32.partialorder %v2477_v22, 0.0  ;;  %v2510_v33 = vmul.f32 0.2, %v2477_v22 }
 0xafd   :  { %v2526_v58 = vsel %vm2494_vm0, %v2477_v22, %v2510_v33 }
 0xafe   :  { %2528 = vmatpush.msra.mxu0 %v2526_v58 }
 0xb00   :  { %2529 = vmatpush.msra.mxu0 %v2525_v56 }
 0xb02   :  { %2530 = vmatpush.msra.mxu0 %v2524_v37 }
 0xb04   :  { %2531 = vmatpush.msra.mxu0 %v2523_v14 }
 0xb06   :  { %2532 = vmatpush.msra.mxu0 %v2522_v50 }
 0xb08   :  { %2533 = vmatpush.msra.mxu0 %v2521_v0 }
 0xb0a   :  { %2534 = vmatpush.msra.mxu0 %v2520_v31 }
 0xb0c   :  { %2535 = vmatpush.msra.mxu0 %v2519_v63 }
 0xb0e   :  { %2536 = vmatpush.msra.mxu0 %v2518_v43 }
 0xb10   :  { %2537 = vmatpush.msra.mxu0 %v2517_v46 }
 0xb12   :  { %2538 = vmatpush.msra.mxu0 %v2516_v44 }
 0xb14   :  { %2539 = vmatpush.msra.mxu0 %v2515_v5 }
 0xb16   :  { %2540 = vmatpush.msra.mxu0 %v2514_v39 }
 0xb18   :  { %2541 = vmatpush.msra.mxu0 %v2513_v36 }
 0xb1a   :  { %2542 = vmatpush.msra.mxu0 %v2512_v21 }
 0xb1c   :  { %2543 = vmatpush.msra.mxu0 %v2511_v54 }
 0xb1d   :  { %2544 = vmatmul.f32.vlgmr.msra.gmra.mxu0 %v2527_v34 }
 0xb9a   :  { %v2545_v2 = vpop.f32.mrf.mxu0 }
 0xb9b   :  { %2548 = vst [vmem:[#allocation25] sm:$0xff] %v2545_v2 }
 0xb9c   :  { %2585 = dma.vmem_to_hbm [thread:$0]  %s2581_s2, 128, %s2583_s23, [#allocation24]  }
 0xb9d   :  { %3043 = dma.done.wait [#allocation4], 2048  }
 0xb9e   :  { %3044 = vsyncadd [#allocation4], 4294965248 }
 0xb9f   :  { %3045 = dma.done.wait [#allocation24], 2176  }
 0xba0   :  { %3046 = vsyncadd [#allocation24], 4294965120 }
 0xba1   :  { %2598 = vsyncpa [#allocation3], 1 }
 0xba2   :  { %2599 = vsyncpa [#allocation6], 1 }
 0xba3   :  { %2600 = vsyncpa [#allocation9], 1 }
 0xba4   :  { %2601 = vsyncpa [#allocation12], 1 }
 0xba5   :  { %2602 = vsyncpa [#allocation15], 1 }
 0xba6   :  { %2603 = vsyncpa [#allocation18], 1 }
 0xba7   :  { %2604 = vsyncpa [#allocation21], 1 }
 0xba8   :  { %2605 = vsyncpa [#allocation4], 1 }
 0xba9   :  { %2606 = vsyncpa [#allocation24], 1 }

</bundles_post_ra>
